<compile_context>
chip_gen: v7x
topology: tpu7x:2x2x1
jax: 0.10.0
libtpu: 0.0.40
codegen_flags: <defaults>
</compile_context>

<pallas_src>
import functools

import jax
import jax.numpy as jnp
import numpy as np
from jax.experimental import pallas as pl
from jax.experimental.pallas import tpu as pltpu


# ----------------------------------------------------------------------------
# Kernel 1: SimpleBlock (KPConv + bias + LeakyReLU) fused with GlobalAverageBlock
# ----------------------------------------------------------------------------
def _kpconv_gap_kernel(nbT_ref, nxT_ref, kpt_ref, wT_ref, b_ref, o_ref, acc_ref,
                       *, n_neighbors, n_kp_pad, c_in, inv_extent, inv_points):
    """One tile (TILE_P points) of one cloud, transposed lane-dense layout.

    nbT_ref : [3*H,   TP]    neighbor - query coordinates (h-major, xyz-minor)
    nxT_ref : [Cin*H, TP]    gathered neighbor features   (h-major, c-minor)
    kpt_ref : [Kp, 3]        kernel points (K padded to a multiple of 8 rows)
    wT_ref  : [Cout, Cin*Kp] KPConv weights, bf16, c-major flattened + transposed
    b_ref   : [Cout, 1]      BatchNormBlock(use_bn=False) bias
    o_ref   : [1, Cout, 1]   per-cloud global average (written at the last tile)
    acc_ref : [Cout, 1]      VMEM scratch: running per-cloud feature sum
    """
    j = pl.program_id(1)
    n_j = pl.num_programs(1)
    tp = nbT_ref.shape[1]

    @pl.when(j == 0)
    def _init():
        acc_ref[...] = jnp.zeros_like(acc_ref)

    nbT = nbT_ref[...]
    nxT = nxT_ref[...]
    kpt = kpt_ref[...]

    # kernel-point coordinates broadcast across the point (lane) axis, hoisted
    kx = jnp.broadcast_to(kpt[:, 0:1], (n_kp_pad, tp))
    ky = jnp.broadcast_to(kpt[:, 1:2], (n_kp_pad, tp))
    kz = jnp.broadcast_to(kpt[:, 2:3], (n_kp_pad, tp))

    # h-contraction on the VPU: acc[c][k, p] = sum_h influence(p, h, k) * x(p, h, c)
    acc = [jnp.zeros((n_kp_pad, tp), jnp.float32) for _ in range(c_in)]
    for h in range(n_neighbors):          # static unroll, H is small
        dx = nbT[3 * h + 0:3 * h + 1, :] - kx
        dy = nbT[3 * h + 1:3 * h + 2, :] - ky
        dz = nbT[3 * h + 2:3 * h + 3, :] - kz
        d2 = dx * dx + dy * dy + dz * dz
        # linear influence: clamp(1 - d / KP_extent, min=0)
        w_h = jnp.maximum(1.0 - jnp.sqrt(d2) * inv_extent, 0.0)          # [Kp, TP]
        for c in range(c_in):
            acc[c] = acc[c] + w_h * nxT[c_in * h + c:c_in * h + c + 1, :]

    wf_t = jnp.concatenate(acc, axis=0)                                   # [Cin*Kp, TP]
    # single MXU matmul over the whole (kernel-point x channel) contraction
    conv_t = jnp.dot(wT_ref[...], wf_t.astype(jnp.bfloat16),
                     preferred_element_type=jnp.float32)                  # [Cout, TP]
    out_t = conv_t + b_ref[...]                                           # use_bn=False bias
    out_t = jnp.where(out_t >= 0.0, out_t, 0.1 * out_t)                   # LeakyReLU(0.1)

    # GlobalAverageBlock numerator: per-cloud running sum over this tile's points
    acc_ref[...] += jnp.sum(out_t, axis=1, keepdims=True)

    @pl.when(j == n_j - 1)
    def _finish():
        o_ref[...] = (acc_ref[...] * inv_points)[None, :, :]


# ----------------------------------------------------------------------------
# Kernel 2: head_mlp + head_softmax fused (Linear -> +bias -> LeakyReLU) x 2
# ----------------------------------------------------------------------------
def _head_kernel(x_ref, w1_ref, b1_ref, w2_ref, b2_ref, o_ref):
    x = x_ref[...].astype(jnp.bfloat16)
    h = jnp.dot(x, w1_ref[...], preferred_element_type=jnp.float32) + b1_ref[...]
    h = jnp.where(h >= 0.0, h, 0.1 * h)
    y = jnp.dot(h.astype(jnp.bfloat16), w2_ref[...],
                preferred_element_type=jnp.float32) + b2_ref[...]
    y = jnp.where(y >= 0.0, y, 0.1 * y)
    o_ref[...] = y.astype(o_ref.dtype)


# ----------------------------------------------------------------------------
# Pallas wrappers
# ----------------------------------------------------------------------------
def kpconv_global_average(nbT, nxT, kpt_pad, wT, bias_col, *,
                          n_clouds, pts_per_cloud, tile_p, n_neighbors,
                          n_kp_pad, c_in, c_out, kp_extent):
    assert pts_per_cloud % tile_p == 0, "tile_p must divide points-per-cloud"
    assert tile_p % 128 == 0, "tile_p must be a multiple of 128 (lane axis)"
    # TODO(synk): ragged clouds (variable batch.lengths) need per-cloud masking here.
    n_ptiles = pts_per_cloud // tile_p

    kernel = functools.partial(
        _kpconv_gap_kernel, n_neighbors=n_neighbors, n_kp_pad=n_kp_pad, c_in=c_in,
        inv_extent=1.0 / kp_extent, inv_points=1.0 / pts_per_cloud)

    out = pl.pallas_call(
        kernel,
        out_shape=jax.ShapeDtypeStruct((n_clouds, c_out, 1), jnp.float32),
        grid=(n_clouds, n_ptiles),
        in_specs=[
            pl.BlockSpec((3 * n_neighbors, tile_p),
                         lambda b, j: (0, b * n_ptiles + j)),
            pl.BlockSpec((c_in * n_neighbors, tile_p),
                         lambda b, j: (0, b * n_ptiles + j)),
            pl.BlockSpec((n_kp_pad, 3), lambda b, j: (0, 0)),
            pl.BlockSpec((c_out, c_in * n_kp_pad), lambda b, j: (0, 0)),
            pl.BlockSpec((c_out, 1), lambda b, j: (0, 0)),
        ],
        out_specs=pl.BlockSpec((1, c_out, 1), lambda b, j: (b, 0, 0)),
        scratch_shapes=[pltpu.VMEM((c_out, 1), jnp.float32)],
        compiler_params=pltpu.CompilerParams(
            dimension_semantics=("parallel", "arbitrary"),
            vmem_limit_bytes=32 * 1024 * 1024),
    )(nbT, nxT, kpt_pad, wT, bias_col)
    return out[:, :, 0]                                   # [B, Cout]


def classification_head(pooled, w1, b1, w2, b2):
    n_clouds, c_mid = pooled.shape
    hidden = w1.shape[1]
    n_classes = w2.shape[1]
    # TODO(synk): tile the hidden (1024) axis across a grid if n_clouds / hidden grow.
    return pl.pallas_call(
        _head_kernel,
        out_shape=jax.ShapeDtypeStruct((n_clouds, n_classes), jnp.float32),
        grid=(1,),
        in_specs=[
            pl.BlockSpec((n_clouds, c_mid), lambda i: (0, 0)),
            pl.BlockSpec((c_mid, hidden), lambda i: (0, 0)),
            pl.BlockSpec((1, hidden), lambda i: (0, 0)),
            pl.BlockSpec((hidden, n_classes), lambda i: (0, 0)),
            pl.BlockSpec((1, n_classes), lambda i: (0, 0)),
        ],
        out_specs=pl.BlockSpec((n_clouds, n_classes), lambda i: (0, 0)),
    )(pooled,
      w1.astype(jnp.bfloat16), b1.reshape(1, hidden).astype(jnp.float32),
      w2.astype(jnp.bfloat16), b2.reshape(1, n_classes).astype(jnp.float32))


# ----------------------------------------------------------------------------
# Forward pass (glue gather in plain JAX, everything else in the two kernels)
# ----------------------------------------------------------------------------
def make_kpcnn_forward(*, n_clouds, pts_per_cloud, n_neighbors, n_kp, c_in,
                       c_mid, kp_extent, tile_p):
    n_kp_pad = ((n_kp + 7) // 8) * 8      # pad K to a sublane multiple; padded rows get zero weights

    def forward(params, points, features, neighb_inds):
        p_total = n_clouds * pts_per_cloud

        # KPConv gather glue (the [P,K,H] influence tensor is computed in-kernel;
        # only the minimal per-neighbor data is materialized).
        s_pts = jnp.concatenate([points, jnp.full((1, 3), 1e6, points.dtype)], axis=0)
        x_pad = jnp.concatenate([features, jnp.zeros((1, c_in), features.dtype)], axis=0)
        nb = s_pts[neighb_inds] - points[:, None, :]                    # [P, H, 3]
        nx = x_pad[neighb_inds]                                          # [P, H, Cin]
        # transposed lane-dense layout: points on the last (128-lane) axis
        nbT = nb.reshape(p_total, 3 * n_neighbors).T                     # [3H, P]
        nxT = nx.reshape(p_total, c_in * n_neighbors).T                  # [Cin*H, P]

        # parameter repacking (tiny, folded under jit)
        kpt_pad = jnp.concatenate(
            [params['kernel_points'],
             jnp.full((n_kp_pad - n_kp, 3), 1e6, jnp.float32)], axis=0)  # [Kp, 3]
        w = jnp.transpose(params['kpconv_w'], (1, 0, 2))                 # [Cin, K, Cout]
        w = jnp.concatenate(
            [w, jnp.zeros((c_in, n_kp_pad - n_kp, c_mid), jnp.float32)], axis=1)
        wT = w.reshape(c_in * n_kp_pad, c_mid).T.astype(jnp.bfloat16)    # [Cout, Cin*Kp]
        bias_col = params['simple_bias'].reshape(c_mid, 1)

        # SimpleBlock + GlobalAverageBlock (fused kernel)
        pooled = kpconv_global_average(
            nbT, nxT, kpt_pad, wT, bias_col,
            n_clouds=n_clouds, pts_per_cloud=pts_per_cloud, tile_p=tile_p,
            n_neighbors=n_neighbors, n_kp_pad=n_kp_pad, c_in=c_in, c_out=c_mid,
            kp_extent=kp_extent)                                         # [B, Cmid]

        # head_mlp + head_softmax (fused kernel)
        return classification_head(pooled,
                                   params['head_mlp_w'], params['head_mlp_b'],
                                   params['head_softmax_w'], params['head_softmax_b'])

    return jax.jit(forward)


# ----------------------------------------------------------------------------
# Pure-JAX reference (f32) for a tolerance check
# ----------------------------------------------------------------------------
def kpcnn_reference(params, points, features, neighb_inds, *,
                    n_clouds, pts_per_cloud, kp_extent):
    s_pts = jnp.concatenate([points, jnp.full((1, 3), 1e6, points.dtype)], axis=0)
    x_pad = jnp.concatenate(
        [features, jnp.zeros((1, features.shape[1]), features.dtype)], axis=0)
    neighbors = s_pts[neighb_inds] - points[:, None, :]
    differences = neighbors[:, :, None, :] - params['kernel_points'][None, None]
    sq_d = jnp.sum(differences ** 2, axis=3)
    all_w = jnp.maximum(1.0 - jnp.sqrt(sq_d) / kp_extent, 0.0)           # [P, H, K]
    neighb_x = x_pad[neighb_inds]                                        # [P, H, Cin]
    wf = jnp.einsum('phk,phc->pkc', all_w, neighb_x)
    out = jnp.einsum('pkc,kco->po', wf, params['kpconv_w']) + params['simple_bias']
    out = jnp.where(out >= 0.0, out, 0.1 * out)
    pooled = out.reshape(n_clouds, pts_per_cloud, -1).mean(axis=1)
    h = pooled @ params['head_mlp_w'] + params['head_mlp_b']
    h = jnp.where(h >= 0.0, h, 0.1 * h)
    y = h @ params['head_softmax_w'] + params['head_softmax_b']
    return jnp.where(y >= 0.0, y, 0.1 * y)


# ----------------------------------------------------------------------------
# Main
# ----------------------------------------------------------------------------
if __name__ == "__main__":
    # ---- KPCNN config (architecture=['simple','global_average'], use_bn=False) ----
    num_kernel_points = 15
    in_features_dim = 4
    first_features_dim = 32
    num_classes = 8
    first_subsampling_dl = 0.1
    conv_radius = 2.5
    kp_extent_cfg = 1.2

    r0 = first_subsampling_dl * conv_radius
    kp_extent = kp_extent_cfg * r0 / conv_radius

    B = 2                        # clouds per batch (parallel grid axis -> both v7x TCs)
    Ppc = 512                    # points per cloud (equal-length clouds)
    P = B * Ppc
    H = 16                       # neighbors per point
    Cmid = first_features_dim // 2   # SimpleBlock output dim
    TILE_P = 128                 # points per grid step (lane axis of every block)

    key = jax.random.PRNGKey(0)
    k_pts, k_feat, k_kp, k_w1, k_w2, k_w3 = jax.random.split(key, 6)

    # ---- synthetic batch ----
    points = jax.random.uniform(k_pts, (P, 3), jnp.float32) * 0.5
    features = jax.random.normal(k_feat, (P, in_features_dim), jnp.float32)
    d2 = jnp.sum((points[:, None, :] - points[None, :, :]) ** 2, axis=-1)
    _, neighb_inds = jax.lax.top_k(-d2, H)
    neighb_inds = neighb_inds.astype(jnp.int32)

    # ---- parameters (shapes follow the PyTorch module) ----
    kernel_points = jax.random.normal(k_kp, (num_kernel_points, 3), jnp.float32)
    kernel_points = kernel_points / (
        jnp.linalg.norm(kernel_points, axis=1, keepdims=True) + 1e-6) * kp_extent

    params = dict(
        kernel_points=kernel_points,
        kpconv_w=jax.random.normal(
            k_w1, (num_kernel_points, in_features_dim, Cmid), jnp.float32) * 0.1,
        simple_bias=jnp.zeros((Cmid,), jnp.float32),
        head_mlp_w=jax.random.normal(k_w2, (Cmid, 1024), jnp.float32) / jnp.sqrt(float(Cmid)),
        head_mlp_b=jnp.zeros((1024,), jnp.float32),
        head_softmax_w=jax.random.normal(k_w3, (1024, num_classes), jnp.float32) / 32.0,
        head_softmax_b=jnp.zeros((num_classes,), jnp.float32),
    )

    # TODO(synk): loss() / p2p_fitting_regularizer / accuracy are training-only; only forward().

    forward = make_kpcnn_forward(
        n_clouds=B, pts_per_cloud=Ppc, n_neighbors=H, n_kp=num_kernel_points,
        c_in=in_features_dim, c_mid=Cmid, kp_extent=kp_extent, tile_p=TILE_P)

    logits = jax.block_until_ready(forward(params, points, features, neighb_inds))
    assert logits.shape == (B, num_classes), logits.shape
    assert logits.dtype == jnp.float32
    assert bool(jnp.all(jnp.isfinite(logits)))

    ref = jax.block_until_ready(
        kpcnn_reference(params, points, features, neighb_inds,
                        n_clouds=B, pts_per_cloud=Ppc, kp_extent=kp_extent))
    np.testing.assert_allclose(np.asarray(logits), np.asarray(ref), rtol=5e-2, atol=5e-2)

    print("KERNEL_OK")
</pallas_src>

<mosaic_0001>
module attributes {stable_mosaic.version = 11 : i64} {
  func.func @_kpconv_gap_kernel(%arg0: i32, %arg1: i32, %arg2: memref<48x128xf32, #tpu.memory_space<vmem>>, %arg3: memref<64x128xf32, #tpu.memory_space<vmem>>, %arg4: memref<16x3xf32, #tpu.memory_space<vmem>>, %arg5: memref<16x64xbf16, #tpu.memory_space<vmem>>, %arg6: memref<16x1xf32, #tpu.memory_space<vmem>>, %arg7: memref<1x16x1xf32, #tpu.memory_space<vmem>>, %arg8: memref<16x1xf32, #tpu.memory_space<vmem>>) attributes {dimension_semantics = [#tpu.dimension_semantics<parallel>, #tpu.dimension_semantics<arbitrary>], iteration_bounds = array<i64: 2, 4>, scalar_prefetch = 0 : i64, scratch_operands = 1 : i64, tpu.core_type = #tpu.core_type<tc>, window_params = [{transform_indices = @transform_0, window_bounds = array<i64: 48, 128>}, {transform_indices = @transform_1, window_bounds = array<i64: 64, 128>}, {pipeline_mode = #tpu.pipeline_mode<synchronous>, transform_indices = @transform_2, window_bounds = array<i64: 16, 3>}, {pipeline_mode = #tpu.pipeline_mode<synchronous>, transform_indices = @transform_3, window_bounds = array<i64: 16, 64>}, {pipeline_mode = #tpu.pipeline_mode<synchronous>, transform_indices = @transform_4, window_bounds = array<i64: 16, 1>}, {transform_indices = @transform_5, window_bounds = array<i64: 1, 16, 1>}]} {
    %c0_i32 = arith.constant 0 : i32
    %0 = arith.cmpi eq, %arg1, %c0_i32 : i32
    %1 = arith.extui %0 : i1 to i32
    %c0_i32_0 = arith.constant 0 : i32
    %2 = arith.cmpi ne, %1, %c0_i32_0 : i32
    scf.if %2 {
      %cst_70 = arith.constant 0.000000e+00 : f32
      %631 = vector.broadcast %cst_70 : f32 to vector<16x1xf32>
      %c0_71 = arith.constant 0 : index
      %c0_72 = arith.constant 0 : index
      %632 = vector.load %arg8[%c0_71, %c0_72] : memref<16x1xf32, #tpu.memory_space<vmem>>, vector<16x1xf32>
      tpu.vector_store %arg8[%c0_71, %c0_72], %631 {strides = array<i32>} : memref<16x1xf32, #tpu.memory_space<vmem>>, vector<16x1xf32>,
    } else {
    }
    %c0 = arith.constant 0 : index
    %c0_1 = arith.constant 0 : index
    %3 = vector.load %arg2[%c0, %c0_1] : memref<48x128xf32, #tpu.memory_space<vmem>>, vector<48x128xf32>
    %c0_2 = arith.constant 0 : index
    %c0_3 = arith.constant 0 : index
    %4 = vector.load %arg3[%c0_2, %c0_3] : memref<64x128xf32, #tpu.memory_space<vmem>>, vector<64x128xf32>
    %c0_4 = arith.constant 0 : index
    %c0_5 = arith.constant 0 : index
    %5 = vector.load %arg4[%c0_4, %c0_5] : memref<16x3xf32, #tpu.memory_space<vmem>>, vector<16x3xf32>
    %6 = vector.extract_strided_slice %5 {offsets = [0, 0], sizes = [16, 1], strides = [1, 1]} : vector<16x3xf32> to vector<16x1xf32>
    %7 = vector.shape_cast %6 : vector<16x1xf32> to vector<16x1xf32>
    %8 = vector.broadcast %7 : vector<16x1xf32> to vector<16x128xf32>
    %9 = vector.extract_strided_slice %5 {offsets = [0, 1], sizes = [16, 1], strides = [1, 1]} : vector<16x3xf32> to vector<16x1xf32>
    %10 = vector.shape_cast %9 : vector<16x1xf32> to vector<16x1xf32>
    %11 = vector.broadcast %10 : vector<16x1xf32> to vector<16x128xf32>
    %12 = vector.extract_strided_slice %5 {offsets = [0, 2], sizes = [16, 1], strides = [1, 1]} : vector<16x3xf32> to vector<16x1xf32>
    %13 = vector.shape_cast %12 : vector<16x1xf32> to vector<16x1xf32>
    %14 = vector.broadcast %13 : vector<16x1xf32> to vector<16x128xf32>
    %cst = arith.constant 0.000000e+00 : f32
    %15 = vector.broadcast %cst : f32 to vector<16x128xf32>
    %cst_6 = arith.constant 0.000000e+00 : f32
    %16 = vector.broadcast %cst_6 : f32 to vector<16x128xf32>
    %cst_7 = arith.constant 0.000000e+00 : f32
    %17 = vector.broadcast %cst_7 : f32 to vector<16x128xf32>
    %cst_8 = arith.constant 0.000000e+00 : f32
    %18 = vector.broadcast %cst_8 : f32 to vector<16x128xf32>
    %19 = vector.extract_strided_slice %3 {offsets = [0, 0], sizes = [1, 128], strides = [1, 1]} : vector<48x128xf32> to vector<1x128xf32>
    %20 = vector.broadcast %19 : vector<1x128xf32> to vector<16x128xf32>
    %21 = arith.subf %20, %8 : vector<16x128xf32>
    %22 = vector.extract_strided_slice %3 {offsets = [1, 0], sizes = [1, 128], strides = [1, 1]} : vector<48x128xf32> to vector<1x128xf32>
    %23 = vector.broadcast %22 : vector<1x128xf32> to vector<16x128xf32>
    %24 = arith.subf %23, %11 : vector<16x128xf32>
    %25 = vector.extract_strided_slice %3 {offsets = [2, 0], sizes = [1, 128], strides = [1, 1]} : vector<48x128xf32> to vector<1x128xf32>
    %26 = vector.broadcast %25 : vector<1x128xf32> to vector<16x128xf32>
    %27 = arith.subf %26, %14 : vector<16x128xf32>
    %28 = arith.mulf %21, %21 : vector<16x128xf32>
    %29 = arith.mulf %24, %24 : vector<16x128xf32>
    %30 = arith.addf %28, %29 : vector<16x128xf32>
    %31 = arith.mulf %27, %27 : vector<16x128xf32>
    %32 = arith.addf %30, %31 : vector<16x128xf32>
    %33 = math.sqrt %32 : vector<16x128xf32>
    %cst_9 = arith.constant 8.33333301 : f32
    %34 = vector.broadcast %cst_9 : f32 to vector<16x128xf32>
    %35 = arith.mulf %33, %34 : vector<16x128xf32>
    %cst_10 = arith.constant 1.000000e+00 : f32
    %36 = vector.broadcast %cst_10 : f32 to vector<16x128xf32>
    %37 = arith.subf %36, %35 : vector<16x128xf32>
    %cst_11 = arith.constant 0.000000e+00 : f32
    %38 = vector.broadcast %cst_11 : f32 to vector<16x128xf32>
    %39 = arith.maximumf %37, %38 : vector<16x128xf32>
    %40 = vector.extract_strided_slice %4 {offsets = [0, 0], sizes = [1, 128], strides = [1, 1]} : vector<64x128xf32> to vector<1x128xf32>
    %41 = vector.broadcast %40 : vector<1x128xf32> to vector<16x128xf32>
    %42 = arith.mulf %39, %41 : vector<16x128xf32>
    %43 = arith.addf %15, %42 : vector<16x128xf32>
    %44 = vector.extract_strided_slice %4 {offsets = [1, 0], sizes = [1, 128], strides = [1, 1]} : vector<64x128xf32> to vector<1x128xf32>
    %45 = vector.broadcast %44 : vector<1x128xf32> to vector<16x128xf32>
    %46 = arith.mulf %39, %45 : vector<16x128xf32>
    %47 = arith.addf %16, %46 : vector<16x128xf32>
    %48 = vector.extract_strided_slice %4 {offsets = [2, 0], sizes = [1, 128], strides = [1, 1]} : vector<64x128xf32> to vector<1x128xf32>
    %49 = vector.broadcast %48 : vector<1x128xf32> to vector<16x128xf32>
    %50 = arith.mulf %39, %49 : vector<16x128xf32>
    %51 = arith.addf %17, %50 : vector<16x128xf32>
    %52 = vector.extract_strided_slice %4 {offsets = [3, 0], sizes = [1, 128], strides = [1, 1]} : vector<64x128xf32> to vector<1x128xf32>
    %53 = vector.broadcast %52 : vector<1x128xf32> to vector<16x128xf32>
    %54 = arith.mulf %39, %53 : vector<16x128xf32>
    %55 = arith.addf %18, %54 : vector<16x128xf32>
    %56 = vector.extract_strided_slice %3 {offsets = [3, 0], sizes = [1, 128], strides = [1, 1]} : vector<48x128xf32> to vector<1x128xf32>
    %57 = vector.broadcast %56 : vector<1x128xf32> to vector<16x128xf32>
    %58 = arith.subf %57, %8 : vector<16x128xf32>
    %59 = vector.extract_strided_slice %3 {offsets = [4, 0], sizes = [1, 128], strides = [1, 1]} : vector<48x128xf32> to vector<1x128xf32>
    %60 = vector.broadcast %59 : vector<1x128xf32> to vector<16x128xf32>
    %61 = arith.subf %60, %11 : vector<16x128xf32>
    %62 = vector.extract_strided_slice %3 {offsets = [5, 0], sizes = [1, 128], strides = [1, 1]} : vector<48x128xf32> to vector<1x128xf32>
    %63 = vector.broadcast %62 : vector<1x128xf32> to vector<16x128xf32>
    %64 = arith.subf %63, %14 : vector<16x128xf32>
    %65 = arith.mulf %58, %58 : vector<16x128xf32>
    %66 = arith.mulf %61, %61 : vector<16x128xf32>
    %67 = arith.addf %65, %66 : vector<16x128xf32>
    %68 = arith.mulf %64, %64 : vector<16x128xf32>
    %69 = arith.addf %67, %68 : vector<16x128xf32>
    %70 = math.sqrt %69 : vector<16x128xf32>
    %cst_12 = arith.constant 8.33333301 : f32
    %71 = vector.broadcast %cst_12 : f32 to vector<16x128xf32>
    %72 = arith.mulf %70, %71 : vector<16x128xf32>
    %cst_13 = arith.constant 1.000000e+00 : f32
    %73 = vector.broadcast %cst_13 : f32 to vector<16x128xf32>
    %74 = arith.subf %73, %72 : vector<16x128xf32>
    %cst_14 = arith.constant 0.000000e+00 : f32
    %75 = vector.broadcast %cst_14 : f32 to vector<16x128xf32>
    %76 = arith.maximumf %74, %75 : vector<16x128xf32>
    %77 = vector.extract_strided_slice %4 {offsets = [4, 0], sizes = [1, 128], strides = [1, 1]} : vector<64x128xf32> to vector<1x128xf32>
    %78 = vector.broadcast %77 : vector<1x128xf32> to vector<16x128xf32>
    %79 = arith.mulf %76, %78 : vector<16x128xf32>
    %80 = arith.addf %43, %79 : vector<16x128xf32>
    %81 = vector.extract_strided_slice %4 {offsets = [5, 0], sizes = [1, 128], strides = [1, 1]} : vector<64x128xf32> to vector<1x128xf32>
    %82 = vector.broadcast %81 : vector<1x128xf32> to vector<16x128xf32>
    %83 = arith.mulf %76, %82 : vector<16x128xf32>
    %84 = arith.addf %47, %83 : vector<16x128xf32>
    %85 = vector.extract_strided_slice %4 {offsets = [6, 0], sizes = [1, 128], strides = [1, 1]} : vector<64x128xf32> to vector<1x128xf32>
    %86 = vector.broadcast %85 : vector<1x128xf32> to vector<16x128xf32>
    %87 = arith.mulf %76, %86 : vector<16x128xf32>
    %88 = arith.addf %51, %87 : vector<16x128xf32>
    %89 = vector.extract_strided_slice %4 {offsets = [7, 0], sizes = [1, 128], strides = [1, 1]} : vector<64x128xf32> to vector<1x128xf32>
    %90 = vector.broadcast %89 : vector<1x128xf32> to vector<16x128xf32>
    %91 = arith.mulf %76, %90 : vector<16x128xf32>
    %92 = arith.addf %55, %91 : vector<16x128xf32>
    %93 = vector.extract_strided_slice %3 {offsets = [6, 0], sizes = [1, 128], strides = [1, 1]} : vector<48x128xf32> to vector<1x128xf32>
    %94 = vector.broadcast %93 : vector<1x128xf32> to vector<16x128xf32>
    %95 = arith.subf %94, %8 : vector<16x128xf32>
    %96 = vector.extract_strided_slice %3 {offsets = [7, 0], sizes = [1, 128], strides = [1, 1]} : vector<48x128xf32> to vector<1x128xf32>
    %97 = vector.broadcast %96 : vector<1x128xf32> to vector<16x128xf32>
    %98 = arith.subf %97, %11 : vector<16x128xf32>
    %99 = vector.extract_strided_slice %3 {offsets = [8, 0], sizes = [1, 128], strides = [1, 1]} : vector<48x128xf32> to vector<1x128xf32>
    %100 = vector.broadcast %99 : vector<1x128xf32> to vector<16x128xf32>
    %101 = arith.subf %100, %14 : vector<16x128xf32>
    %102 = arith.mulf %95, %95 : vector<16x128xf32>
    %103 = arith.mulf %98, %98 : vector<16x128xf32>
    %104 = arith.addf %102, %103 : vector<16x128xf32>
    %105 = arith.mulf %101, %101 : vector<16x128xf32>
    %106 = arith.addf %104, %105 : vector<16x128xf32>
    %107 = math.sqrt %106 : vector<16x128xf32>
    %cst_15 = arith.constant 8.33333301 : f32
    %108 = vector.broadcast %cst_15 : f32 to vector<16x128xf32>
    %109 = arith.mulf %107, %108 : vector<16x128xf32>
    %cst_16 = arith.constant 1.000000e+00 : f32
    %110 = vector.broadcast %cst_16 : f32 to vector<16x128xf32>
    %111 = arith.subf %110, %109 : vector<16x128xf32>
    %cst_17 = arith.constant 0.000000e+00 : f32
    %112 = vector.broadcast %cst_17 : f32 to vector<16x128xf32>
    %113 = arith.maximumf %111, %112 : vector<16x128xf32>
    %114 = vector.extract_strided_slice %4 {offsets = [8, 0], sizes = [1, 128], strides = [1, 1]} : vector<64x128xf32> to vector<1x128xf32>
    %115 = vector.broadcast %114 : vector<1x128xf32> to vector<16x128xf32>
    %116 = arith.mulf %113, %115 : vector<16x128xf32>
    %117 = arith.addf %80, %116 : vector<16x128xf32>
    %118 = vector.extract_strided_slice %4 {offsets = [9, 0], sizes = [1, 128], strides = [1, 1]} : vector<64x128xf32> to vector<1x128xf32>
    %119 = vector.broadcast %118 : vector<1x128xf32> to vector<16x128xf32>
    %120 = arith.mulf %113, %119 : vector<16x128xf32>
    %121 = arith.addf %84, %120 : vector<16x128xf32>
    %122 = vector.extract_strided_slice %4 {offsets = [10, 0], sizes = [1, 128], strides = [1, 1]} : vector<64x128xf32> to vector<1x128xf32>
    %123 = vector.broadcast %122 : vector<1x128xf32> to vector<16x128xf32>
    %124 = arith.mulf %113, %123 : vector<16x128xf32>
    %125 = arith.addf %88, %124 : vector<16x128xf32>
    %126 = vector.extract_strided_slice %4 {offsets = [11, 0], sizes = [1, 128], strides = [1, 1]} : vector<64x128xf32> to vector<1x128xf32>
    %127 = vector.broadcast %126 : vector<1x128xf32> to vector<16x128xf32>
    %128 = arith.mulf %113, %127 : vector<16x128xf32>
    %129 = arith.addf %92, %128 : vector<16x128xf32>
    %130 = vector.extract_strided_slice %3 {offsets = [9, 0], sizes = [1, 128], strides = [1, 1]} : vector<48x128xf32> to vector<1x128xf32>
    %131 = vector.broadcast %130 : vector<1x128xf32> to vector<16x128xf32>
    %132 = arith.subf %131, %8 : vector<16x128xf32>
    %133 = vector.extract_strided_slice %3 {offsets = [10, 0], sizes = [1, 128], strides = [1, 1]} : vector<48x128xf32> to vector<1x128xf32>
    %134 = vector.broadcast %133 : vector<1x128xf32> to vector<16x128xf32>
    %135 = arith.subf %134, %11 : vector<16x128xf32>
    %136 = vector.extract_strided_slice %3 {offsets = [11, 0], sizes = [1, 128], strides = [1, 1]} : vector<48x128xf32> to vector<1x128xf32>
    %137 = vector.broadcast %136 : vector<1x128xf32> to vector<16x128xf32>
    %138 = arith.subf %137, %14 : vector<16x128xf32>
    %139 = arith.mulf %132, %132 : vector<16x128xf32>
    %140 = arith.mulf %135, %135 : vector<16x128xf32>
    %141 = arith.addf %139, %140 : vector<16x128xf32>
    %142 = arith.mulf %138, %138 : vector<16x128xf32>
    %143 = arith.addf %141, %142 : vector<16x128xf32>
    %144 = math.sqrt %143 : vector<16x128xf32>
    %cst_18 = arith.constant 8.33333301 : f32
    %145 = vector.broadcast %cst_18 : f32 to vector<16x128xf32>
    %146 = arith.mulf %144, %145 : vector<16x128xf32>
    %cst_19 = arith.constant 1.000000e+00 : f32
    %147 = vector.broadcast %cst_19 : f32 to vector<16x128xf32>
    %148 = arith.subf %147, %146 : vector<16x128xf32>
    %cst_20 = arith.constant 0.000000e+00 : f32
    %149 = vector.broadcast %cst_20 : f32 to vector<16x128xf32>
    %150 = arith.maximumf %148, %149 : vector<16x128xf32>
    %151 = vector.extract_strided_slice %4 {offsets = [12, 0], sizes = [1, 128], strides = [1, 1]} : vector<64x128xf32> to vector<1x128xf32>
    %152 = vector.broadcast %151 : vector<1x128xf32> to vector<16x128xf32>
    %153 = arith.mulf %150, %152 : vector<16x128xf32>
    %154 = arith.addf %117, %153 : vector<16x128xf32>
    %155 = vector.extract_strided_slice %4 {offsets = [13, 0], sizes = [1, 128], strides = [1, 1]} : vector<64x128xf32> to vector<1x128xf32>
    %156 = vector.broadcast %155 : vector<1x128xf32> to vector<16x128xf32>
    %157 = arith.mulf %150, %156 : vector<16x128xf32>
    %158 = arith.addf %121, %157 : vector<16x128xf32>
    %159 = vector.extract_strided_slice %4 {offsets = [14, 0], sizes = [1, 128], strides = [1, 1]} : vector<64x128xf32> to vector<1x128xf32>
    %160 = vector.broadcast %159 : vector<1x128xf32> to vector<16x128xf32>
    %161 = arith.mulf %150, %160 : vector<16x128xf32>
    %162 = arith.addf %125, %161 : vector<16x128xf32>
    %163 = vector.extract_strided_slice %4 {offsets = [15, 0], sizes = [1, 128], strides = [1, 1]} : vector<64x128xf32> to vector<1x128xf32>
    %164 = vector.broadcast %163 : vector<1x128xf32> to vector<16x128xf32>
    %165 = arith.mulf %150, %164 : vector<16x128xf32>
    %166 = arith.addf %129, %165 : vector<16x128xf32>
    %167 = vector.extract_strided_slice %3 {offsets = [12, 0], sizes = [1, 128], strides = [1, 1]} : vector<48x128xf32> to vector<1x128xf32>
    %168 = vector.broadcast %167 : vector<1x128xf32> to vector<16x128xf32>
    %169 = arith.subf %168, %8 : vector<16x128xf32>
    %170 = vector.extract_strided_slice %3 {offsets = [13, 0], sizes = [1, 128], strides = [1, 1]} : vector<48x128xf32> to vector<1x128xf32>
    %171 = vector.broadcast %170 : vector<1x128xf32> to vector<16x128xf32>
    %172 = arith.subf %171, %11 : vector<16x128xf32>
    %173 = vector.extract_strided_slice %3 {offsets = [14, 0], sizes = [1, 128], strides = [1, 1]} : vector<48x128xf32> to vector<1x128xf32>
    %174 = vector.broadcast %173 : vector<1x128xf32> to vector<16x128xf32>
    %175 = arith.subf %174, %14 : vector<16x128xf32>
    %176 = arith.mulf %169, %169 : vector<16x128xf32>
    %177 = arith.mulf %172, %172 : vector<16x128xf32>
    %178 = arith.addf %176, %177 : vector<16x128xf32>
    %179 = arith.mulf %175, %175 : vector<16x128xf32>
    %180 = arith.addf %178, %179 : vector<16x128xf32>
    %181 = math.sqrt %180 : vector<16x128xf32>
    %cst_21 = arith.constant 8.33333301 : f32
    %182 = vector.broadcast %cst_21 : f32 to vector<16x128xf32>
    %183 = arith.mulf %181, %182 : vector<16x128xf32>
    %cst_22 = arith.constant 1.000000e+00 : f32
    %184 = vector.broadcast %cst_22 : f32 to vector<16x128xf32>
    %185 = arith.subf %184, %183 : vector<16x128xf32>
    %cst_23 = arith.constant 0.000000e+00 : f32
    %186 = vector.broadcast %cst_23 : f32 to vector<16x128xf32>
    %187 = arith.maximumf %185, %186 : vector<16x128xf32>
    %188 = vector.extract_strided_slice %4 {offsets = [16, 0], sizes = [1, 128], strides = [1, 1]} : vector<64x128xf32> to vector<1x128xf32>
    %189 = vector.broadcast %188 : vector<1x128xf32> to vector<16x128xf32>
    %190 = arith.mulf %187, %189 : vector<16x128xf32>
    %191 = arith.addf %154, %190 : vector<16x128xf32>
    %192 = vector.extract_strided_slice %4 {offsets = [17, 0], sizes = [1, 128], strides = [1, 1]} : vector<64x128xf32> to vector<1x128xf32>
    %193 = vector.broadcast %192 : vector<1x128xf32> to vector<16x128xf32>
    %194 = arith.mulf %187, %193 : vector<16x128xf32>
    %195 = arith.addf %158, %194 : vector<16x128xf32>
    %196 = vector.extract_strided_slice %4 {offsets = [18, 0], sizes = [1, 128], strides = [1, 1]} : vector<64x128xf32> to vector<1x128xf32>
    %197 = vector.broadcast %196 : vector<1x128xf32> to vector<16x128xf32>
    %198 = arith.mulf %187, %197 : vector<16x128xf32>
    %199 = arith.addf %162, %198 : vector<16x128xf32>
    %200 = vector.extract_strided_slice %4 {offsets = [19, 0], sizes = [1, 128], strides = [1, 1]} : vector<64x128xf32> to vector<1x128xf32>
    %201 = vector.broadcast %200 : vector<1x128xf32> to vector<16x128xf32>
    %202 = arith.mulf %187, %201 : vector<16x128xf32>
    %203 = arith.addf %166, %202 : vector<16x128xf32>
    %204 = vector.extract_strided_slice %3 {offsets = [15, 0], sizes = [1, 128], strides = [1, 1]} : vector<48x128xf32> to vector<1x128xf32>
    %205 = vector.broadcast %204 : vector<1x128xf32> to vector<16x128xf32>
    %206 = arith.subf %205, %8 : vector<16x128xf32>
    %207 = vector.extract_strided_slice %3 {offsets = [16, 0], sizes = [1, 128], strides = [1, 1]} : vector<48x128xf32> to vector<1x128xf32>
    %208 = vector.broadcast %207 : vector<1x128xf32> to vector<16x128xf32>
    %209 = arith.subf %208, %11 : vector<16x128xf32>
    %210 = vector.extract_strided_slice %3 {offsets = [17, 0], sizes = [1, 128], strides = [1, 1]} : vector<48x128xf32> to vector<1x128xf32>
    %211 = vector.broadcast %210 : vector<1x128xf32> to vector<16x128xf32>
    %212 = arith.subf %211, %14 : vector<16x128xf32>
    %213 = arith.mulf %206, %206 : vector<16x128xf32>
    %214 = arith.mulf %209, %209 : vector<16x128xf32>
    %215 = arith.addf %213, %214 : vector<16x128xf32>
    %216 = arith.mulf %212, %212 : vector<16x128xf32>
    %217 = arith.addf %215, %216 : vector<16x128xf32>
    %218 = math.sqrt %217 : vector<16x128xf32>
    %cst_24 = arith.constant 8.33333301 : f32
    %219 = vector.broadcast %cst_24 : f32 to vector<16x128xf32>
    %220 = arith.mulf %218, %219 : vector<16x128xf32>
    %cst_25 = arith.constant 1.000000e+00 : f32
    %221 = vector.broadcast %cst_25 : f32 to vector<16x128xf32>
    %222 = arith.subf %221, %220 : vector<16x128xf32>
    %cst_26 = arith.constant 0.000000e+00 : f32
    %223 = vector.broadcast %cst_26 : f32 to vector<16x128xf32>
    %224 = arith.maximumf %222, %223 : vector<16x128xf32>
    %225 = vector.extract_strided_slice %4 {offsets = [20, 0], sizes = [1, 128], strides = [1, 1]} : vector<64x128xf32> to vector<1x128xf32>
    %226 = vector.broadcast %225 : vector<1x128xf32> to vector<16x128xf32>
    %227 = arith.mulf %224, %226 : vector<16x128xf32>
    %228 = arith.addf %191, %227 : vector<16x128xf32>
    %229 = vector.extract_strided_slice %4 {offsets = [21, 0], sizes = [1, 128], strides = [1, 1]} : vector<64x128xf32> to vector<1x128xf32>
    %230 = vector.broadcast %229 : vector<1x128xf32> to vector<16x128xf32>
    %231 = arith.mulf %224, %230 : vector<16x128xf32>
    %232 = arith.addf %195, %231 : vector<16x128xf32>
    %233 = vector.extract_strided_slice %4 {offsets = [22, 0], sizes = [1, 128], strides = [1, 1]} : vector<64x128xf32> to vector<1x128xf32>
    %234 = vector.broadcast %233 : vector<1x128xf32> to vector<16x128xf32>
    %235 = arith.mulf %224, %234 : vector<16x128xf32>
    %236 = arith.addf %199, %235 : vector<16x128xf32>
    %237 = vector.extract_strided_slice %4 {offsets = [23, 0], sizes = [1, 128], strides = [1, 1]} : vector<64x128xf32> to vector<1x128xf32>
    %238 = vector.broadcast %237 : vector<1x128xf32> to vector<16x128xf32>
    %239 = arith.mulf %224, %238 : vector<16x128xf32>
    %240 = arith.addf %203, %239 : vector<16x128xf32>
    %241 = vector.extract_strided_slice %3 {offsets = [18, 0], sizes = [1, 128], strides = [1, 1]} : vector<48x128xf32> to vector<1x128xf32>
    %242 = vector.broadcast %241 : vector<1x128xf32> to vector<16x128xf32>
    %243 = arith.subf %242, %8 : vector<16x128xf32>
    %244 = vector.extract_strided_slice %3 {offsets = [19, 0], sizes = [1, 128], strides = [1, 1]} : vector<48x128xf32> to vector<1x128xf32>
    %245 = vector.broadcast %244 : vector<1x128xf32> to vector<16x128xf32>
    %246 = arith.subf %245, %11 : vector<16x128xf32>
    %247 = vector.extract_strided_slice %3 {offsets = [20, 0], sizes = [1, 128], strides = [1, 1]} : vector<48x128xf32> to vector<1x128xf32>
    %248 = vector.broadcast %247 : vector<1x128xf32> to vector<16x128xf32>
    %249 = arith.subf %248, %14 : vector<16x128xf32>
    %250 = arith.mulf %243, %243 : vector<16x128xf32>
    %251 = arith.mulf %246, %246 : vector<16x128xf32>
    %252 = arith.addf %250, %251 : vector<16x128xf32>
    %253 = arith.mulf %249, %249 : vector<16x128xf32>
    %254 = arith.addf %252, %253 : vector<16x128xf32>
    %255 = math.sqrt %254 : vector<16x128xf32>
    %cst_27 = arith.constant 8.33333301 : f32
    %256 = vector.broadcast %cst_27 : f32 to vector<16x128xf32>
    %257 = arith.mulf %255, %256 : vector<16x128xf32>
    %cst_28 = arith.constant 1.000000e+00 : f32
    %258 = vector.broadcast %cst_28 : f32 to vector<16x128xf32>
    %259 = arith.subf %258, %257 : vector<16x128xf32>
    %cst_29 = arith.constant 0.000000e+00 : f32
    %260 = vector.broadcast %cst_29 : f32 to vector<16x128xf32>
    %261 = arith.maximumf %259, %260 : vector<16x128xf32>
    %262 = vector.extract_strided_slice %4 {offsets = [24, 0], sizes = [1, 128], strides = [1, 1]} : vector<64x128xf32> to vector<1x128xf32>
    %263 = vector.broadcast %262 : vector<1x128xf32> to vector<16x128xf32>
    %264 = arith.mulf %261, %263 : vector<16x128xf32>
    %265 = arith.addf %228, %264 : vector<16x128xf32>
    %266 = vector.extract_strided_slice %4 {offsets = [25, 0], sizes = [1, 128], strides = [1, 1]} : vector<64x128xf32> to vector<1x128xf32>
    %267 = vector.broadcast %266 : vector<1x128xf32> to vector<16x128xf32>
    %268 = arith.mulf %261, %267 : vector<16x128xf32>
    %269 = arith.addf %232, %268 : vector<16x128xf32>
    %270 = vector.extract_strided_slice %4 {offsets = [26, 0], sizes = [1, 128], strides = [1, 1]} : vector<64x128xf32> to vector<1x128xf32>
    %271 = vector.broadcast %270 : vector<1x128xf32> to vector<16x128xf32>
    %272 = arith.mulf %261, %271 : vector<16x128xf32>
    %273 = arith.addf %236, %272 : vector<16x128xf32>
    %274 = vector.extract_strided_slice %4 {offsets = [27, 0], sizes = [1, 128], strides = [1, 1]} : vector<64x128xf32> to vector<1x128xf32>
    %275 = vector.broadcast %274 : vector<1x128xf32> to vector<16x128xf32>
    %276 = arith.mulf %261, %275 : vector<16x128xf32>
    %277 = arith.addf %240, %276 : vector<16x128xf32>
    %278 = vector.extract_strided_slice %3 {offsets = [21, 0], sizes = [1, 128], strides = [1, 1]} : vector<48x128xf32> to vector<1x128xf32>
    %279 = vector.broadcast %278 : vector<1x128xf32> to vector<16x128xf32>
    %280 = arith.subf %279, %8 : vector<16x128xf32>
    %281 = vector.extract_strided_slice %3 {offsets = [22, 0], sizes = [1, 128], strides = [1, 1]} : vector<48x128xf32> to vector<1x128xf32>
    %282 = vector.broadcast %281 : vector<1x128xf32> to vector<16x128xf32>
    %283 = arith.subf %282, %11 : vector<16x128xf32>
    %284 = vector.extract_strided_slice %3 {offsets = [23, 0], sizes = [1, 128], strides = [1, 1]} : vector<48x128xf32> to vector<1x128xf32>
    %285 = vector.broadcast %284 : vector<1x128xf32> to vector<16x128xf32>
    %286 = arith.subf %285, %14 : vector<16x128xf32>
    %287 = arith.mulf %280, %280 : vector<16x128xf32>
    %288 = arith.mulf %283, %283 : vector<16x128xf32>
    %289 = arith.addf %287, %288 : vector<16x128xf32>
    %290 = arith.mulf %286, %286 : vector<16x128xf32>
    %291 = arith.addf %289, %290 : vector<16x128xf32>
    %292 = math.sqrt %291 : vector<16x128xf32>
    %cst_30 = arith.constant 8.33333301 : f32
    %293 = vector.broadcast %cst_30 : f32 to vector<16x128xf32>
    %294 = arith.mulf %292, %293 : vector<16x128xf32>
    %cst_31 = arith.constant 1.000000e+00 : f32
    %295 = vector.broadcast %cst_31 : f32 to vector<16x128xf32>
    %296 = arith.subf %295, %294 : vector<16x128xf32>
    %cst_32 = arith.constant 0.000000e+00 : f32
    %297 = vector.broadcast %cst_32 : f32 to vector<16x128xf32>
    %298 = arith.maximumf %296, %297 : vector<16x128xf32>
    %299 = vector.extract_strided_slice %4 {offsets = [28, 0], sizes = [1, 128], strides = [1, 1]} : vector<64x128xf32> to vector<1x128xf32>
    %300 = vector.broadcast %299 : vector<1x128xf32> to vector<16x128xf32>
    %301 = arith.mulf %298, %300 : vector<16x128xf32>
    %302 = arith.addf %265, %301 : vector<16x128xf32>
    %303 = vector.extract_strided_slice %4 {offsets = [29, 0], sizes = [1, 128], strides = [1, 1]} : vector<64x128xf32> to vector<1x128xf32>
    %304 = vector.broadcast %303 : vector<1x128xf32> to vector<16x128xf32>
    %305 = arith.mulf %298, %304 : vector<16x128xf32>
    %306 = arith.addf %269, %305 : vector<16x128xf32>
    %307 = vector.extract_strided_slice %4 {offsets = [30, 0], sizes = [1, 128], strides = [1, 1]} : vector<64x128xf32> to vector<1x128xf32>
    %308 = vector.broadcast %307 : vector<1x128xf32> to vector<16x128xf32>
    %309 = arith.mulf %298, %308 : vector<16x128xf32>
    %310 = arith.addf %273, %309 : vector<16x128xf32>
    %311 = vector.extract_strided_slice %4 {offsets = [31, 0], sizes = [1, 128], strides = [1, 1]} : vector<64x128xf32> to vector<1x128xf32>
    %312 = vector.broadcast %311 : vector<1x128xf32> to vector<16x128xf32>
    %313 = arith.mulf %298, %312 : vector<16x128xf32>
    %314 = arith.addf %277, %313 : vector<16x128xf32>
    %315 = vector.extract_strided_slice %3 {offsets = [24, 0], sizes = [1, 128], strides = [1, 1]} : vector<48x128xf32> to vector<1x128xf32>
    %316 = vector.broadcast %315 : vector<1x128xf32> to vector<16x128xf32>
    %317 = arith.subf %316, %8 : vector<16x128xf32>
    %318 = vector.extract_strided_slice %3 {offsets = [25, 0], sizes = [1, 128], strides = [1, 1]} : vector<48x128xf32> to vector<1x128xf32>
    %319 = vector.broadcast %318 : vector<1x128xf32> to vector<16x128xf32>
    %320 = arith.subf %319, %11 : vector<16x128xf32>
    %321 = vector.extract_strided_slice %3 {offsets = [26, 0], sizes = [1, 128], strides = [1, 1]} : vector<48x128xf32> to vector<1x128xf32>
    %322 = vector.broadcast %321 : vector<1x128xf32> to vector<16x128xf32>
    %323 = arith.subf %322, %14 : vector<16x128xf32>
    %324 = arith.mulf %317, %317 : vector<16x128xf32>
    %325 = arith.mulf %320, %320 : vector<16x128xf32>
    %326 = arith.addf %324, %325 : vector<16x128xf32>
    %327 = arith.mulf %323, %323 : vector<16x128xf32>
    %328 = arith.addf %326, %327 : vector<16x128xf32>
    %329 = math.sqrt %328 : vector<16x128xf32>
    %cst_33 = arith.constant 8.33333301 : f32
    %330 = vector.broadcast %cst_33 : f32 to vector<16x128xf32>
    %331 = arith.mulf %329, %330 : vector<16x128xf32>
    %cst_34 = arith.constant 1.000000e+00 : f32
    %332 = vector.broadcast %cst_34 : f32 to vector<16x128xf32>
    %333 = arith.subf %332, %331 : vector<16x128xf32>
    %cst_35 = arith.constant 0.000000e+00 : f32
    %334 = vector.broadcast %cst_35 : f32 to vector<16x128xf32>
    %335 = arith.maximumf %333, %334 : vector<16x128xf32>
    %336 = vector.extract_strided_slice %4 {offsets = [32, 0], sizes = [1, 128], strides = [1, 1]} : vector<64x128xf32> to vector<1x128xf32>
    %337 = vector.broadcast %336 : vector<1x128xf32> to vector<16x128xf32>
    %338 = arith.mulf %335, %337 : vector<16x128xf32>
    %339 = arith.addf %302, %338 : vector<16x128xf32>
    %340 = vector.extract_strided_slice %4 {offsets = [33, 0], sizes = [1, 128], strides = [1, 1]} : vector<64x128xf32> to vector<1x128xf32>
    %341 = vector.broadcast %340 : vector<1x128xf32> to vector<16x128xf32>
    %342 = arith.mulf %335, %341 : vector<16x128xf32>
    %343 = arith.addf %306, %342 : vector<16x128xf32>
    %344 = vector.extract_strided_slice %4 {offsets = [34, 0], sizes = [1, 128], strides = [1, 1]} : vector<64x128xf32> to vector<1x128xf32>
    %345 = vector.broadcast %344 : vector<1x128xf32> to vector<16x128xf32>
    %346 = arith.mulf %335, %345 : vector<16x128xf32>
    %347 = arith.addf %310, %346 : vector<16x128xf32>
    %348 = vector.extract_strided_slice %4 {offsets = [35, 0], sizes = [1, 128], strides = [1, 1]} : vector<64x128xf32> to vector<1x128xf32>
    %349 = vector.broadcast %348 : vector<1x128xf32> to vector<16x128xf32>
    %350 = arith.mulf %335, %349 : vector<16x128xf32>
    %351 = arith.addf %314, %350 : vector<16x128xf32>
    %352 = vector.extract_strided_slice %3 {offsets = [27, 0], sizes = [1, 128], strides = [1, 1]} : vector<48x128xf32> to vector<1x128xf32>
    %353 = vector.broadcast %352 : vector<1x128xf32> to vector<16x128xf32>
    %354 = arith.subf %353, %8 : vector<16x128xf32>
    %355 = vector.extract_strided_slice %3 {offsets = [28, 0], sizes = [1, 128], strides = [1, 1]} : vector<48x128xf32> to vector<1x128xf32>
    %356 = vector.broadcast %355 : vector<1x128xf32> to vector<16x128xf32>
    %357 = arith.subf %356, %11 : vector<16x128xf32>
    %358 = vector.extract_strided_slice %3 {offsets = [29, 0], sizes = [1, 128], strides = [1, 1]} : vector<48x128xf32> to vector<1x128xf32>
    %359 = vector.broadcast %358 : vector<1x128xf32> to vector<16x128xf32>
    %360 = arith.subf %359, %14 : vector<16x128xf32>
    %361 = arith.mulf %354, %354 : vector<16x128xf32>
    %362 = arith.mulf %357, %357 : vector<16x128xf32>
    %363 = arith.addf %361, %362 : vector<16x128xf32>
    %364 = arith.mulf %360, %360 : vector<16x128xf32>
    %365 = arith.addf %363, %364 : vector<16x128xf32>
    %366 = math.sqrt %365 : vector<16x128xf32>
    %cst_36 = arith.constant 8.33333301 : f32
    %367 = vector.broadcast %cst_36 : f32 to vector<16x128xf32>
    %368 = arith.mulf %366, %367 : vector<16x128xf32>
    %cst_37 = arith.constant 1.000000e+00 : f32
    %369 = vector.broadcast %cst_37 : f32 to vector<16x128xf32>
    %370 = arith.subf %369, %368 : vector<16x128xf32>
    %cst_38 = arith.constant 0.000000e+00 : f32
    %371 = vector.broadcast %cst_38 : f32 to vector<16x128xf32>
    %372 = arith.maximumf %370, %371 : vector<16x128xf32>
    %373 = vector.extract_strided_slice %4 {offsets = [36, 0], sizes = [1, 128], strides = [1, 1]} : vector<64x128xf32> to vector<1x128xf32>
    %374 = vector.broadcast %373 : vector<1x128xf32> to vector<16x128xf32>
    %375 = arith.mulf %372, %374 : vector<16x128xf32>
    %376 = arith.addf %339, %375 : vector<16x128xf32>
    %377 = vector.extract_strided_slice %4 {offsets = [37, 0], sizes = [1, 128], strides = [1, 1]} : vector<64x128xf32> to vector<1x128xf32>
    %378 = vector.broadcast %377 : vector<1x128xf32> to vector<16x128xf32>
    %379 = arith.mulf %372, %378 : vector<16x128xf32>
    %380 = arith.addf %343, %379 : vector<16x128xf32>
    %381 = vector.extract_strided_slice %4 {offsets = [38, 0], sizes = [1, 128], strides = [1, 1]} : vector<64x128xf32> to vector<1x128xf32>
    %382 = vector.broadcast %381 : vector<1x128xf32> to vector<16x128xf32>
    %383 = arith.mulf %372, %382 : vector<16x128xf32>
    %384 = arith.addf %347, %383 : vector<16x128xf32>
    %385 = vector.extract_strided_slice %4 {offsets = [39, 0], sizes = [1, 128], strides = [1, 1]} : vector<64x128xf32> to vector<1x128xf32>
    %386 = vector.broadcast %385 : vector<1x128xf32> to vector<16x128xf32>
    %387 = arith.mulf %372, %386 : vector<16x128xf32>
    %388 = arith.addf %351, %387 : vector<16x128xf32>
    %389 = vector.extract_strided_slice %3 {offsets = [30, 0], sizes = [1, 128], strides = [1, 1]} : vector<48x128xf32> to vector<1x128xf32>
    %390 = vector.broadcast %389 : vector<1x128xf32> to vector<16x128xf32>
    %391 = arith.subf %390, %8 : vector<16x128xf32>
    %392 = vector.extract_strided_slice %3 {offsets = [31, 0], sizes = [1, 128], strides = [1, 1]} : vector<48x128xf32> to vector<1x128xf32>
    %393 = vector.broadcast %392 : vector<1x128xf32> to vector<16x128xf32>
    %394 = arith.subf %393, %11 : vector<16x128xf32>
    %395 = vector.extract_strided_slice %3 {offsets = [32, 0], sizes = [1, 128], strides = [1, 1]} : vector<48x128xf32> to vector<1x128xf32>
    %396 = vector.broadcast %395 : vector<1x128xf32> to vector<16x128xf32>
    %397 = arith.subf %396, %14 : vector<16x128xf32>
    %398 = arith.mulf %391, %391 : vector<16x128xf32>
    %399 = arith.mulf %394, %394 : vector<16x128xf32>
    %400 = arith.addf %398, %399 : vector<16x128xf32>
    %401 = arith.mulf %397, %397 : vector<16x128xf32>
    %402 = arith.addf %400, %401 : vector<16x128xf32>
    %403 = math.sqrt %402 : vector<16x128xf32>
    %cst_39 = arith.constant 8.33333301 : f32
    %404 = vector.broadcast %cst_39 : f32 to vector<16x128xf32>
    %405 = arith.mulf %403, %404 : vector<16x128xf32>
    %cst_40 = arith.constant 1.000000e+00 : f32
    %406 = vector.broadcast %cst_40 : f32 to vector<16x128xf32>
    %407 = arith.subf %406, %405 : vector<16x128xf32>
    %cst_41 = arith.constant 0.000000e+00 : f32
    %408 = vector.broadcast %cst_41 : f32 to vector<16x128xf32>
    %409 = arith.maximumf %407, %408 : vector<16x128xf32>
    %410 = vector.extract_strided_slice %4 {offsets = [40, 0], sizes = [1, 128], strides = [1, 1]} : vector<64x128xf32> to vector<1x128xf32>
    %411 = vector.broadcast %410 : vector<1x128xf32> to vector<16x128xf32>
    %412 = arith.mulf %409, %411 : vector<16x128xf32>
    %413 = arith.addf %376, %412 : vector<16x128xf32>
    %414 = vector.extract_strided_slice %4 {offsets = [41, 0], sizes = [1, 128], strides = [1, 1]} : vector<64x128xf32> to vector<1x128xf32>
    %415 = vector.broadcast %414 : vector<1x128xf32> to vector<16x128xf32>
    %416 = arith.mulf %409, %415 : vector<16x128xf32>
    %417 = arith.addf %380, %416 : vector<16x128xf32>
    %418 = vector.extract_strided_slice %4 {offsets = [42, 0], sizes = [1, 128], strides = [1, 1]} : vector<64x128xf32> to vector<1x128xf32>
    %419 = vector.broadcast %418 : vector<1x128xf32> to vector<16x128xf32>
    %420 = arith.mulf %409, %419 : vector<16x128xf32>
    %421 = arith.addf %384, %420 : vector<16x128xf32>
    %422 = vector.extract_strided_slice %4 {offsets = [43, 0], sizes = [1, 128], strides = [1, 1]} : vector<64x128xf32> to vector<1x128xf32>
    %423 = vector.broadcast %422 : vector<1x128xf32> to vector<16x128xf32>
    %424 = arith.mulf %409, %423 : vector<16x128xf32>
    %425 = arith.addf %388, %424 : vector<16x128xf32>
    %426 = vector.extract_strided_slice %3 {offsets = [33, 0], sizes = [1, 128], strides = [1, 1]} : vector<48x128xf32> to vector<1x128xf32>
    %427 = vector.broadcast %426 : vector<1x128xf32> to vector<16x128xf32>
    %428 = arith.subf %427, %8 : vector<16x128xf32>
    %429 = vector.extract_strided_slice %3 {offsets = [34, 0], sizes = [1, 128], strides = [1, 1]} : vector<48x128xf32> to vector<1x128xf32>
    %430 = vector.broadcast %429 : vector<1x128xf32> to vector<16x128xf32>
    %431 = arith.subf %430, %11 : vector<16x128xf32>
    %432 = vector.extract_strided_slice %3 {offsets = [35, 0], sizes = [1, 128], strides = [1, 1]} : vector<48x128xf32> to vector<1x128xf32>
    %433 = vector.broadcast %432 : vector<1x128xf32> to vector<16x128xf32>
    %434 = arith.subf %433, %14 : vector<16x128xf32>
    %435 = arith.mulf %428, %428 : vector<16x128xf32>
    %436 = arith.mulf %431, %431 : vector<16x128xf32>
    %437 = arith.addf %435, %436 : vector<16x128xf32>
    %438 = arith.mulf %434, %434 : vector<16x128xf32>
    %439 = arith.addf %437, %438 : vector<16x128xf32>
    %440 = math.sqrt %439 : vector<16x128xf32>
    %cst_42 = arith.constant 8.33333301 : f32
    %441 = vector.broadcast %cst_42 : f32 to vector<16x128xf32>
    %442 = arith.mulf %440, %441 : vector<16x128xf32>
    %cst_43 = arith.constant 1.000000e+00 : f32
    %443 = vector.broadcast %cst_43 : f32 to vector<16x128xf32>
    %444 = arith.subf %443, %442 : vector<16x128xf32>
    %cst_44 = arith.constant 0.000000e+00 : f32
    %445 = vector.broadcast %cst_44 : f32 to vector<16x128xf32>
    %446 = arith.maximumf %444, %445 : vector<16x128xf32>
    %447 = vector.extract_strided_slice %4 {offsets = [44, 0], sizes = [1, 128], strides = [1, 1]} : vector<64x128xf32> to vector<1x128xf32>
    %448 = vector.broadcast %447 : vector<1x128xf32> to vector<16x128xf32>
    %449 = arith.mulf %446, %448 : vector<16x128xf32>
    %450 = arith.addf %413, %449 : vector<16x128xf32>
    %451 = vector.extract_strided_slice %4 {offsets = [45, 0], sizes = [1, 128], strides = [1, 1]} : vector<64x128xf32> to vector<1x128xf32>
    %452 = vector.broadcast %451 : vector<1x128xf32> to vector<16x128xf32>
    %453 = arith.mulf %446, %452 : vector<16x128xf32>
    %454 = arith.addf %417, %453 : vector<16x128xf32>
    %455 = vector.extract_strided_slice %4 {offsets = [46, 0], sizes = [1, 128], strides = [1, 1]} : vector<64x128xf32> to vector<1x128xf32>
    %456 = vector.broadcast %455 : vector<1x128xf32> to vector<16x128xf32>
    %457 = arith.mulf %446, %456 : vector<16x128xf32>
    %458 = arith.addf %421, %457 : vector<16x128xf32>
    %459 = vector.extract_strided_slice %4 {offsets = [47, 0], sizes = [1, 128], strides = [1, 1]} : vector<64x128xf32> to vector<1x128xf32>
    %460 = vector.broadcast %459 : vector<1x128xf32> to vector<16x128xf32>
    %461 = arith.mulf %446, %460 : vector<16x128xf32>
    %462 = arith.addf %425, %461 : vector<16x128xf32>
    %463 = vector.extract_strided_slice %3 {offsets = [36, 0], sizes = [1, 128], strides = [1, 1]} : vector<48x128xf32> to vector<1x128xf32>
    %464 = vector.broadcast %463 : vector<1x128xf32> to vector<16x128xf32>
    %465 = arith.subf %464, %8 : vector<16x128xf32>
    %466 = vector.extract_strided_slice %3 {offsets = [37, 0], sizes = [1, 128], strides = [1, 1]} : vector<48x128xf32> to vector<1x128xf32>
    %467 = vector.broadcast %466 : vector<1x128xf32> to vector<16x128xf32>
    %468 = arith.subf %467, %11 : vector<16x128xf32>
    %469 = vector.extract_strided_slice %3 {offsets = [38, 0], sizes = [1, 128], strides = [1, 1]} : vector<48x128xf32> to vector<1x128xf32>
    %470 = vector.broadcast %469 : vector<1x128xf32> to vector<16x128xf32>
    %471 = arith.subf %470, %14 : vector<16x128xf32>
    %472 = arith.mulf %465, %465 : vector<16x128xf32>
    %473 = arith.mulf %468, %468 : vector<16x128xf32>
    %474 = arith.addf %472, %473 : vector<16x128xf32>
    %475 = arith.mulf %471, %471 : vector<16x128xf32>
    %476 = arith.addf %474, %475 : vector<16x128xf32>
    %477 = math.sqrt %476 : vector<16x128xf32>
    %cst_45 = arith.constant 8.33333301 : f32
    %478 = vector.broadcast %cst_45 : f32 to vector<16x128xf32>
    %479 = arith.mulf %477, %478 : vector<16x128xf32>
    %cst_46 = arith.constant 1.000000e+00 : f32
    %480 = vector.broadcast %cst_46 : f32 to vector<16x128xf32>
    %481 = arith.subf %480, %479 : vector<16x128xf32>
    %cst_47 = arith.constant 0.000000e+00 : f32
    %482 = vector.broadcast %cst_47 : f32 to vector<16x128xf32>
    %483 = arith.maximumf %481, %482 : vector<16x128xf32>
    %484 = vector.extract_strided_slice %4 {offsets = [48, 0], sizes = [1, 128], strides = [1, 1]} : vector<64x128xf32> to vector<1x128xf32>
    %485 = vector.broadcast %484 : vector<1x128xf32> to vector<16x128xf32>
    %486 = arith.mulf %483, %485 : vector<16x128xf32>
    %487 = arith.addf %450, %486 : vector<16x128xf32>
    %488 = vector.extract_strided_slice %4 {offsets = [49, 0], sizes = [1, 128], strides = [1, 1]} : vector<64x128xf32> to vector<1x128xf32>
    %489 = vector.broadcast %488 : vector<1x128xf32> to vector<16x128xf32>
    %490 = arith.mulf %483, %489 : vector<16x128xf32>
    %491 = arith.addf %454, %490 : vector<16x128xf32>
    %492 = vector.extract_strided_slice %4 {offsets = [50, 0], sizes = [1, 128], strides = [1, 1]} : vector<64x128xf32> to vector<1x128xf32>
    %493 = vector.broadcast %492 : vector<1x128xf32> to vector<16x128xf32>
    %494 = arith.mulf %483, %493 : vector<16x128xf32>
    %495 = arith.addf %458, %494 : vector<16x128xf32>
    %496 = vector.extract_strided_slice %4 {offsets = [51, 0], sizes = [1, 128], strides = [1, 1]} : vector<64x128xf32> to vector<1x128xf32>
    %497 = vector.broadcast %496 : vector<1x128xf32> to vector<16x128xf32>
    %498 = arith.mulf %483, %497 : vector<16x128xf32>
    %499 = arith.addf %462, %498 : vector<16x128xf32>
    %500 = vector.extract_strided_slice %3 {offsets = [39, 0], sizes = [1, 128], strides = [1, 1]} : vector<48x128xf32> to vector<1x128xf32>
    %501 = vector.broadcast %500 : vector<1x128xf32> to vector<16x128xf32>
    %502 = arith.subf %501, %8 : vector<16x128xf32>
    %503 = vector.extract_strided_slice %3 {offsets = [40, 0], sizes = [1, 128], strides = [1, 1]} : vector<48x128xf32> to vector<1x128xf32>
    %504 = vector.broadcast %503 : vector<1x128xf32> to vector<16x128xf32>
    %505 = arith.subf %504, %11 : vector<16x128xf32>
    %506 = vector.extract_strided_slice %3 {offsets = [41, 0], sizes = [1, 128], strides = [1, 1]} : vector<48x128xf32> to vector<1x128xf32>
    %507 = vector.broadcast %506 : vector<1x128xf32> to vector<16x128xf32>
    %508 = arith.subf %507, %14 : vector<16x128xf32>
    %509 = arith.mulf %502, %502 : vector<16x128xf32>
    %510 = arith.mulf %505, %505 : vector<16x128xf32>
    %511 = arith.addf %509, %510 : vector<16x128xf32>
    %512 = arith.mulf %508, %508 : vector<16x128xf32>
    %513 = arith.addf %511, %512 : vector<16x128xf32>
    %514 = math.sqrt %513 : vector<16x128xf32>
    %cst_48 = arith.constant 8.33333301 : f32
    %515 = vector.broadcast %cst_48 : f32 to vector<16x128xf32>
    %516 = arith.mulf %514, %515 : vector<16x128xf32>
    %cst_49 = arith.constant 1.000000e+00 : f32
    %517 = vector.broadcast %cst_49 : f32 to vector<16x128xf32>
    %518 = arith.subf %517, %516 : vector<16x128xf32>
    %cst_50 = arith.constant 0.000000e+00 : f32
    %519 = vector.broadcast %cst_50 : f32 to vector<16x128xf32>
    %520 = arith.maximumf %518, %519 : vector<16x128xf32>
    %521 = vector.extract_strided_slice %4 {offsets = [52, 0], sizes = [1, 128], strides = [1, 1]} : vector<64x128xf32> to vector<1x128xf32>
    %522 = vector.broadcast %521 : vector<1x128xf32> to vector<16x128xf32>
    %523 = arith.mulf %520, %522 : vector<16x128xf32>
    %524 = arith.addf %487, %523 : vector<16x128xf32>
    %525 = vector.extract_strided_slice %4 {offsets = [53, 0], sizes = [1, 128], strides = [1, 1]} : vector<64x128xf32> to vector<1x128xf32>
    %526 = vector.broadcast %525 : vector<1x128xf32> to vector<16x128xf32>
    %527 = arith.mulf %520, %526 : vector<16x128xf32>
    %528 = arith.addf %491, %527 : vector<16x128xf32>
    %529 = vector.extract_strided_slice %4 {offsets = [54, 0], sizes = [1, 128], strides = [1, 1]} : vector<64x128xf32> to vector<1x128xf32>
    %530 = vector.broadcast %529 : vector<1x128xf32> to vector<16x128xf32>
    %531 = arith.mulf %520, %530 : vector<16x128xf32>
    %532 = arith.addf %495, %531 : vector<16x128xf32>
    %533 = vector.extract_strided_slice %4 {offsets = [55, 0], sizes = [1, 128], strides = [1, 1]} : vector<64x128xf32> to vector<1x128xf32>
    %534 = vector.broadcast %533 : vector<1x128xf32> to vector<16x128xf32>
    %535 = arith.mulf %520, %534 : vector<16x128xf32>
    %536 = arith.addf %499, %535 : vector<16x128xf32>
    %537 = vector.extract_strided_slice %3 {offsets = [42, 0], sizes = [1, 128], strides = [1, 1]} : vector<48x128xf32> to vector<1x128xf32>
    %538 = vector.broadcast %537 : vector<1x128xf32> to vector<16x128xf32>
    %539 = arith.subf %538, %8 : vector<16x128xf32>
    %540 = vector.extract_strided_slice %3 {offsets = [43, 0], sizes = [1, 128], strides = [1, 1]} : vector<48x128xf32> to vector<1x128xf32>
    %541 = vector.broadcast %540 : vector<1x128xf32> to vector<16x128xf32>
    %542 = arith.subf %541, %11 : vector<16x128xf32>
    %543 = vector.extract_strided_slice %3 {offsets = [44, 0], sizes = [1, 128], strides = [1, 1]} : vector<48x128xf32> to vector<1x128xf32>
    %544 = vector.broadcast %543 : vector<1x128xf32> to vector<16x128xf32>
    %545 = arith.subf %544, %14 : vector<16x128xf32>
    %546 = arith.mulf %539, %539 : vector<16x128xf32>
    %547 = arith.mulf %542, %542 : vector<16x128xf32>
    %548 = arith.addf %546, %547 : vector<16x128xf32>
    %549 = arith.mulf %545, %545 : vector<16x128xf32>
    %550 = arith.addf %548, %549 : vector<16x128xf32>
    %551 = math.sqrt %550 : vector<16x128xf32>
    %cst_51 = arith.constant 8.33333301 : f32
    %552 = vector.broadcast %cst_51 : f32 to vector<16x128xf32>
    %553 = arith.mulf %551, %552 : vector<16x128xf32>
    %cst_52 = arith.constant 1.000000e+00 : f32
    %554 = vector.broadcast %cst_52 : f32 to vector<16x128xf32>
    %555 = arith.subf %554, %553 : vector<16x128xf32>
    %cst_53 = arith.constant 0.000000e+00 : f32
    %556 = vector.broadcast %cst_53 : f32 to vector<16x128xf32>
    %557 = arith.maximumf %555, %556 : vector<16x128xf32>
    %558 = vector.extract_strided_slice %4 {offsets = [56, 0], sizes = [1, 128], strides = [1, 1]} : vector<64x128xf32> to vector<1x128xf32>
    %559 = vector.broadcast %558 : vector<1x128xf32> to vector<16x128xf32>
    %560 = arith.mulf %557, %559 : vector<16x128xf32>
    %561 = arith.addf %524, %560 : vector<16x128xf32>
    %562 = vector.extract_strided_slice %4 {offsets = [57, 0], sizes = [1, 128], strides = [1, 1]} : vector<64x128xf32> to vector<1x128xf32>
    %563 = vector.broadcast %562 : vector<1x128xf32> to vector<16x128xf32>
    %564 = arith.mulf %557, %563 : vector<16x128xf32>
    %565 = arith.addf %528, %564 : vector<16x128xf32>
    %566 = vector.extract_strided_slice %4 {offsets = [58, 0], sizes = [1, 128], strides = [1, 1]} : vector<64x128xf32> to vector<1x128xf32>
    %567 = vector.broadcast %566 : vector<1x128xf32> to vector<16x128xf32>
    %568 = arith.mulf %557, %567 : vector<16x128xf32>
    %569 = arith.addf %532, %568 : vector<16x128xf32>
    %570 = vector.extract_strided_slice %4 {offsets = [59, 0], sizes = [1, 128], strides = [1, 1]} : vector<64x128xf32> to vector<1x128xf32>
    %571 = vector.broadcast %570 : vector<1x128xf32> to vector<16x128xf32>
    %572 = arith.mulf %557, %571 : vector<16x128xf32>
    %573 = arith.addf %536, %572 : vector<16x128xf32>
    %574 = vector.extract_strided_slice %3 {offsets = [45, 0], sizes = [1, 128], strides = [1, 1]} : vector<48x128xf32> to vector<1x128xf32>
    %575 = vector.broadcast %574 : vector<1x128xf32> to vector<16x128xf32>
    %576 = arith.subf %575, %8 : vector<16x128xf32>
    %577 = vector.extract_strided_slice %3 {offsets = [46, 0], sizes = [1, 128], strides = [1, 1]} : vector<48x128xf32> to vector<1x128xf32>
    %578 = vector.broadcast %577 : vector<1x128xf32> to vector<16x128xf32>
    %579 = arith.subf %578, %11 : vector<16x128xf32>
    %580 = vector.extract_strided_slice %3 {offsets = [47, 0], sizes = [1, 128], strides = [1, 1]} : vector<48x128xf32> to vector<1x128xf32>
    %581 = vector.broadcast %580 : vector<1x128xf32> to vector<16x128xf32>
    %582 = arith.subf %581, %14 : vector<16x128xf32>
    %583 = arith.mulf %576, %576 : vector<16x128xf32>
    %584 = arith.mulf %579, %579 : vector<16x128xf32>
    %585 = arith.addf %583, %584 : vector<16x128xf32>
    %586 = arith.mulf %582, %582 : vector<16x128xf32>
    %587 = arith.addf %585, %586 : vector<16x128xf32>
    %588 = math.sqrt %587 : vector<16x128xf32>
    %cst_54 = arith.constant 8.33333301 : f32
    %589 = vector.broadcast %cst_54 : f32 to vector<16x128xf32>
    %590 = arith.mulf %588, %589 : vector<16x128xf32>
    %cst_55 = arith.constant 1.000000e+00 : f32
    %591 = vector.broadcast %cst_55 : f32 to vector<16x128xf32>
    %592 = arith.subf %591, %590 : vector<16x128xf32>
    %cst_56 = arith.constant 0.000000e+00 : f32
    %593 = vector.broadcast %cst_56 : f32 to vector<16x128xf32>
    %594 = arith.maximumf %592, %593 : vector<16x128xf32>
    %595 = vector.extract_strided_slice %4 {offsets = [60, 0], sizes = [1, 128], strides = [1, 1]} : vector<64x128xf32> to vector<1x128xf32>
    %596 = vector.broadcast %595 : vector<1x128xf32> to vector<16x128xf32>
    %597 = arith.mulf %594, %596 : vector<16x128xf32>
    %598 = arith.addf %561, %597 : vector<16x128xf32>
    %599 = vector.extract_strided_slice %4 {offsets = [61, 0], sizes = [1, 128], strides = [1, 1]} : vector<64x128xf32> to vector<1x128xf32>
    %600 = vector.broadcast %599 : vector<1x128xf32> to vector<16x128xf32>
    %601 = arith.mulf %594, %600 : vector<16x128xf32>
    %602 = arith.addf %565, %601 : vector<16x128xf32>
    %603 = vector.extract_strided_slice %4 {offsets = [62, 0], sizes = [1, 128], strides = [1, 1]} : vector<64x128xf32> to vector<1x128xf32>
    %604 = vector.broadcast %603 : vector<1x128xf32> to vector<16x128xf32>
    %605 = arith.mulf %594, %604 : vector<16x128xf32>
    %606 = arith.addf %569, %605 : vector<16x128xf32>
    %607 = vector.extract_strided_slice %4 {offsets = [63, 0], sizes = [1, 128], strides = [1, 1]} : vector<64x128xf32> to vector<1x128xf32>
    %608 = vector.broadcast %607 : vector<1x128xf32> to vector<16x128xf32>
    %609 = arith.mulf %594, %608 : vector<16x128xf32>
    %610 = arith.addf %573, %609 : vector<16x128xf32>
    %611 = tpu.concatenate %598, %602, %606, %610 in 0 : vector<16x128xf32>, vector<16x128xf32>, vector<16x128xf32>, vector<16x128xf32> -> vector<64x128xf32>
    %c0_57 = arith.constant 0 : index
    %c0_58 = arith.constant 0 : index
    %612 = vector.load %arg5[%c0_57, %c0_58] : memref<16x64xbf16, #tpu.memory_space<vmem>>, vector<16x64xbf16>
    %613 = arith.truncf %611 : vector<64x128xf32> to vector<64x128xbf16>
    %cst_59 = arith.constant dense<0.000000e+00> : vector<16x128xf32>
    %614 = tpu.matmul %612, %613, %cst_59 {dimension_numbers = #tpu.dot_dimension_numbers<[1], [0], [0], [1], [0, 0, 1, 1], [], []>} : vector<16x64xbf16>, vector<64x128xbf16>, vector<16x128xf32> -> vector<16x128xf32>
    %c0_60 = arith.constant 0 : index
    %c0_61 = arith.constant 0 : index
    %615 = vector.load %arg6[%c0_60, %c0_61] : memref<16x1xf32, #tpu.memory_space<vmem>>, vector<16x1xf32>
    %616 = vector.broadcast %615 : vector<16x1xf32> to vector<16x128xf32>
    %617 = arith.addf %614, %616 : vector<16x128xf32>
    %cst_62 = arith.constant 0.000000e+00 : f32
    %618 = vector.broadcast %cst_62 : f32 to vector<16x128xf32>
    %619 = arith.cmpf oge, %617, %618 : vector<16x128xf32>
    %cst_63 = arith.constant 1.000000e-01 : f32
    %620 = vector.broadcast %cst_63 : f32 to vector<16x128xf32>
    %621 = arith.mulf %620, %617 : vector<16x128xf32>
    %622 = arith.select %619, %617, %621 : vector<16x128xi1>, vector<16x128xf32>
    %c0_64 = arith.constant 0 : index
    %c0_65 = arith.constant 0 : index
    %623 = vector.load %arg8[%c0_64, %c0_65] : memref<16x1xf32, #tpu.memory_space<vmem>>, vector<16x1xf32>
    %cst_66 = arith.constant dense<0.000000e+00> : vector<16xf32>
    %624 = vector.multi_reduction <add>, %622, %cst_66 [1] : vector<16x128xf32> to vector<16xf32>
    %625 = vector.shape_cast %624 : vector<16xf32> to vector<16x1xf32>
    %626 = arith.addf %623, %625 : vector<16x1xf32>
    %c0_67 = arith.constant 0 : index
    %c0_68 = arith.constant 0 : index
    %627 = vector.load %arg8[%c0_67, %c0_68] : memref<16x1xf32, #tpu.memory_space<vmem>>, vector<16x1xf32>
    tpu.vector_store %arg8[%c0_67, %c0_68], %626 {strides = array<i32>} : memref<16x1xf32, #tpu.memory_space<vmem>>, vector<16x1xf32>,
    %c3_i32 = arith.constant 3 : i32
    %628 = arith.cmpi eq, %arg1, %c3_i32 : i32
    %629 = arith.extui %628 : i1 to i32
    %c0_i32_69 = arith.constant 0 : i32
    %630 = arith.cmpi ne, %629, %c0_i32_69 : i32
    scf.if %630 {
      %c0_70 = arith.constant 0 : index
      %c0_71 = arith.constant 0 : index
      %631 = vector.load %arg8[%c0_70, %c0_71] : memref<16x1xf32, #tpu.memory_space<vmem>>, vector<16x1xf32>
      %cst_72 = arith.constant 0.001953125 : f32
      %632 = vector.broadcast %cst_72 : f32 to vector<16x1xf32>
      %633 = arith.mulf %631, %632 : vector<16x1xf32>
      %634 = vector.shape_cast %633 : vector<16x1xf32> to vector<1x16x1xf32>
      %c0_73 = arith.constant 0 : index
      %c0_74 = arith.constant 0 : index
      %c0_75 = arith.constant 0 : index
      %635 = vector.load %arg7[%c0_73, %c0_74, %c0_75] : memref<1x16x1xf32, #tpu.memory_space<vmem>>, vector<1x16x1xf32>
      tpu.vector_store %arg7[%c0_73, %c0_74, %c0_75], %634 {strides = array<i32>} : memref<1x16x1xf32, #tpu.memory_space<vmem>>, vector<1x16x1xf32>,
    } else {
    }
    return
  }
  func.func @transform_0(%arg0: i32, %arg1: i32) -> (i32, i32) {
    %c4_i32 = arith.constant 4 : i32
    %0 = arith.muli %arg0, %c4_i32 : i32
    %1 = arith.addi %0, %arg1 : i32
    %c0_i32 = arith.constant 0 : i32
    %c0_i32_0 = arith.constant 0 : i32
    return %c0_i32, %1 : i32, i32
  }
  func.func @transform_1(%arg0: i32, %arg1: i32) -> (i32, i32) {
    %c4_i32 = arith.constant 4 : i32
    %0 = arith.muli %arg0, %c4_i32 : i32
    %1 = arith.addi %0, %arg1 : i32
    %c0_i32 = arith.constant 0 : i32
    %c0_i32_0 = arith.constant 0 : i32
    return %c0_i32, %1 : i32, i32
  }
  func.func @transform_2(%arg0: i32, %arg1: i32) -> (i32, i32) {
    %c0_i32 = arith.constant 0 : i32
    %c0_i32_0 = arith.constant 0 : i32
    %c0_i32_1 = arith.constant 0 : i32
    return %c0_i32, %c0_i32_0 : i32, i32
  }
  func.func @transform_3(%arg0: i32, %arg1: i32) -> (i32, i32) {
    %c0_i32 = arith.constant 0 : i32
    %c0_i32_0 = arith.constant 0 : i32
    %c0_i32_1 = arith.constant 0 : i32
    return %c0_i32, %c0_i32_0 : i32, i32
  }
  func.func @transform_4(%arg0: i32, %arg1: i32) -> (i32, i32) {
    %c0_i32 = arith.constant 0 : i32
    %c0_i32_0 = arith.constant 0 : i32
    %c0_i32_1 = arith.constant 0 : i32
    return %c0_i32, %c0_i32_0 : i32, i32
  }
  func.func @transform_5(%arg0: i32, %arg1: i32) -> (i32, i32, i32) {
    %c0_i32 = arith.constant 0 : i32
    %c0_i32_0 = arith.constant 0 : i32
    %c0_i32_1 = arith.constant 0 : i32
    return %arg0, %c0_i32, %c0_i32_0 : i32, i32, i32
  }
}

module attributes {stable_mosaic.version = 11 : i64} {
  func.func @_head_kernel(%arg0: i32, %arg1: memref<2x16xf32, #tpu.memory_space<vmem>>, %arg2: memref<16x1024xbf16, #tpu.memory_space<vmem>>, %arg3: memref<1x1024xf32, #tpu.memory_space<vmem>>, %arg4: memref<1024x8xbf16, #tpu.memory_space<vmem>>, %arg5: memref<1x8xf32, #tpu.memory_space<vmem>>, %arg6: memref<2x8xf32, #tpu.memory_space<vmem>>) attributes {dimension_semantics = [#tpu.dimension_semantics<arbitrary>], iteration_bounds = array<i64: 1>, scalar_prefetch = 0 : i64, scratch_operands = 0 : i64, tpu.core_type = #tpu.core_type<tc>, window_params = [{pipeline_mode = #tpu.pipeline_mode<synchronous>, transform_indices = @transform_0, window_bounds = array<i64: 2, 16>}, {pipeline_mode = #tpu.pipeline_mode<synchronous>, transform_indices = @transform_1, window_bounds = array<i64: 16, 1024>}, {pipeline_mode = #tpu.pipeline_mode<synchronous>, transform_indices = @transform_2, window_bounds = array<i64: 1, 1024>}, {pipeline_mode = #tpu.pipeline_mode<synchronous>, transform_indices = @transform_3, window_bounds = array<i64: 1024, 8>}, {pipeline_mode = #tpu.pipeline_mode<synchronous>, transform_indices = @transform_4, window_bounds = array<i64: 1, 8>}, {pipeline_mode = #tpu.pipeline_mode<synchronous>, transform_indices = @transform_5, window_bounds = array<i64: 2, 8>}]} {
    %c0 = arith.constant 0 : index
    %c0_0 = arith.constant 0 : index
    %0 = vector.load %arg1[%c0, %c0_0] : memref<2x16xf32, #tpu.memory_space<vmem>>, vector<2x16xf32>
    %1 = arith.truncf %0 : vector<2x16xf32> to vector<2x16xbf16>
    %c0_1 = arith.constant 0 : index
    %c0_2 = arith.constant 0 : index
    %2 = vector.load %arg2[%c0_1, %c0_2] : memref<16x1024xbf16, #tpu.memory_space<vmem>>, vector<16x1024xbf16>
    %cst = arith.constant dense<0.000000e+00> : vector<2x1024xf32>
    %3 = tpu.matmul %1, %2, %cst {dimension_numbers = #tpu.dot_dimension_numbers<[1], [0], [0], [1], [0, 0, 1, 1], [], []>} : vector<2x16xbf16>, vector<16x1024xbf16>, vector<2x1024xf32> -> vector<2x1024xf32>
    %c0_3 = arith.constant 0 : index
    %c0_4 = arith.constant 0 : index
    %4 = vector.load %arg3[%c0_3, %c0_4] : memref<1x1024xf32, #tpu.memory_space<vmem>>, vector<1x1024xf32>
    %5 = vector.broadcast %4 : vector<1x1024xf32> to vector<2x1024xf32>
    %6 = arith.addf %3, %5 : vector<2x1024xf32>
    %cst_5 = arith.constant 0.000000e+00 : f32
    %7 = vector.broadcast %cst_5 : f32 to vector<2x1024xf32>
    %8 = arith.cmpf oge, %6, %7 : vector<2x1024xf32>
    %cst_6 = arith.constant 1.000000e-01 : f32
    %9 = vector.broadcast %cst_6 : f32 to vector<2x1024xf32>
    %10 = arith.mulf %9, %6 : vector<2x1024xf32>
    %11 = arith.select %8, %6, %10 : vector<2x1024xi1>, vector<2x1024xf32>
    %12 = arith.truncf %11 : vector<2x1024xf32> to vector<2x1024xbf16>
    %c0_7 = arith.constant 0 : index
    %c0_8 = arith.constant 0 : index
    %13 = vector.load %arg4[%c0_7, %c0_8] : memref<1024x8xbf16, #tpu.memory_space<vmem>>, vector<1024x8xbf16>
    %cst_9 = arith.constant dense<0.000000e+00> : vector<2x8xf32>
    %14 = tpu.matmul %12, %13, %cst_9 {dimension_numbers = #tpu.dot_dimension_numbers<[1], [0], [0], [1], [0, 0, 1, 1], [], []>} : vector<2x1024xbf16>, vector<1024x8xbf16>, vector<2x8xf32> -> vector<2x8xf32>
    %c0_10 = arith.constant 0 : index
    %c0_11 = arith.constant 0 : index
    %15 = vector.load %arg5[%c0_10, %c0_11] : memref<1x8xf32, #tpu.memory_space<vmem>>, vector<1x8xf32>
    %16 = vector.broadcast %15 : vector<1x8xf32> to vector<2x8xf32>
    %17 = arith.addf %14, %16 : vector<2x8xf32>
    %cst_12 = arith.constant 0.000000e+00 : f32
    %18 = vector.broadcast %cst_12 : f32 to vector<2x8xf32>
    %19 = arith.cmpf oge, %17, %18 : vector<2x8xf32>
    %cst_13 = arith.constant 1.000000e-01 : f32
    %20 = vector.broadcast %cst_13 : f32 to vector<2x8xf32>
    %21 = arith.mulf %20, %17 : vector<2x8xf32>
    %22 = arith.select %19, %17, %21 : vector<2x8xi1>, vector<2x8xf32>
    %c0_14 = arith.constant 0 : index
    %c0_15 = arith.constant 0 : index
    %23 = vector.load %arg6[%c0_14, %c0_15] : memref<2x8xf32, #tpu.memory_space<vmem>>, vector<2x8xf32>
    tpu.vector_store %arg6[%c0_14, %c0_15], %22 {strides = array<i32>} : memref<2x8xf32, #tpu.memory_space<vmem>>, vector<2x8xf32>,
    return
  }
  func.func @transform_0(%arg0: i32) -> (i32, i32) {
    %c0_i32 = arith.constant 0 : i32
    %c0_i32_0 = arith.constant 0 : i32
    %c0_i32_1 = arith.constant 0 : i32
    return %c0_i32, %c0_i32_0 : i32, i32
  }
  func.func @transform_1(%arg0: i32) -> (i32, i32) {
    %c0_i32 = arith.constant 0 : i32
    %c0_i32_0 = arith.constant 0 : i32
    %c0_i32_1 = arith.constant 0 : i32
    return %c0_i32, %c0_i32_0 : i32, i32
  }
  func.func @transform_2(%arg0: i32) -> (i32, i32) {
    %c0_i32 = arith.constant 0 : i32
    %c0_i32_0 = arith.constant 0 : i32
    %c0_i32_1 = arith.constant 0 : i32
    return %c0_i32, %c0_i32_0 : i32, i32
  }
  func.func @transform_3(%arg0: i32) -> (i32, i32) {
    %c0_i32 = arith.constant 0 : i32
    %c0_i32_0 = arith.constant 0 : i32
    %c0_i32_1 = arith.constant 0 : i32
    return %c0_i32, %c0_i32_0 : i32, i32
  }
  func.func @transform_4(%arg0: i32) -> (i32, i32) {
    %c0_i32 = arith.constant 0 : i32
    %c0_i32_0 = arith.constant 0 : i32
    %c0_i32_1 = arith.constant 0 : i32
    return %c0_i32, %c0_i32_0 : i32, i32
  }
  func.func @transform_5(%arg0: i32) -> (i32, i32) {
    %c0_i32 = arith.constant 0 : i32
    %c0_i32_0 = arith.constant 0 : i32
    %c0_i32_1 = arith.constant 0 : i32
    return %c0_i32, %c0_i32_0 : i32, i32
  }
}

</mosaic_0001>

<bundles_post_ra>
// kernel: forward.2
= control target key start
LH: loop header
LB: loop body
LE: loop exit
PB: predicated region body
PF: predicated region fallthrough
CT: control target
= control target key end

     0   :  { %s2182_s18 = smov 0   ;;  %s2184_s19 = smov 0   ;;  %s3463_s0 = inlined_call_operand.vmem [shape: f32[48,1024], index: 0, kind: input, shape index: {}]   ;;  %s3464_s1 = inlined_call_operand.vmem [shape: f32[64,1024], index: 1, kind: input, shape index: {}]   ;;  %s3465_s2 = inlined_call_operand.vmem [shape: f32[16,3], index: 2, kind: input, shape index: {}]   ;;  %s3466_s3 = inlined_call_operand.vmem [shape: bf16[16,64], index: 3, kind: input, shape index: {}]   ;;  %s3467_s4 = inlined_call_operand.vmem [shape: f32[16,1], index: 4, kind: input, shape index: {}]   ;;  %s3468_s5 = inlined_call_operand.vmem [shape: f32[2,16,1], index: 5, kind: output, shape index: {}]  }
   0x1   :  { %s2186_s20 = smov 0   ;;  %s2188_s21 = smov 0  }
   0x2   :  { %s2190_s22 = smov 0   ;;  %s2192_s23 = smov 0  }
   0x3   :  { %s2194_s24 = smov 0  }
   0x4 LB: > { %s24_s25 = sadd.s32 1, %s2136_s22  ;;  %s27_s26 = sadd.s32 1, %s2140_s23  ;;  %s2144_s24 = sphi %s2194_s24, %s15_s24   ;;  %s2140_s23 = sphi %s2192_s23, %s3594_s23   ;;  %s2136_s22 = sphi %s2190_s22, %s3593_s22   ;;  %s2132_s21 = sphi %s2188_s21, %s3592_s21   ;;  %s2128_s20 = sphi %s2186_s20, %s3591_s20   ;;  %s2124_s19 = sphi %s2184_s19, %s3590_s19   ;;  %s2120_s18 = sphi %s2182_s18, %s3589_s18  }
   0x5   : > { %p25_p0 = scmp.ge.s32.totalorder %s24_s25, 4  ;;  %p45_p1 = scmp.ne.s32.totalorder %s2124_s19, %s2120_s18 }
   0x6   : > { %p46_p2 = scmp.eq.s32.totalorder %s2144_s24, 0  ;;  %s1910_s27 = sshll.u32 %s2140_s23, 2 }
   0x7   : > { %s3596_s25 = smov (%p25_p0, %s24_s25), 0  ;;  %s3598_s26 = smov (!%p25_p0, %s27_s26), %s2140_s23 }
   0x8   : > { %p29_p3 = scmp.ge.s32.totalorder %s3598_s26, 2  ;;  %p2226_p4 = por %p46_p2, %p45_p1 }
   0x9   : > { %s2233_s29 = sadd.s32 %s2136_s22, %s1910_s27  ;;  %s38_s8 = sadd.s32 1, %s2124_s19 }
   0xa   : > { %s3600_s26 = smov (%p29_p3, %s3598_s26), 0  ;;  %p1915_p6 = scmp.ge.s32.totalorder %s2144_s24, 8 }
   0xb   : > { %s1911_s30 = sshll.u32 %s3600_s26, 2 }
   0xc   : > { %s34_s6 = sadd.s32 %s1911_s30, %s3596_s25  ;;  %199 = sbr.rel (%p1915_p6) target bundleno = 41 (0x29), region = 28 }
   0xd   : > { %s35_s7 = ssub.s32 %s2233_s29, %s34_s6 }
   0xe   : > { %p36_p5 = scmp.eq.s32.totalorder %s35_s7, 0 }
  0x10   : > { %s2240_s9 = scalar_select %p36_p5, %s2124_s19, %s38_s8  }
  0x13   : > { %202 = sbr.rel (!%p2226_p4) target bundleno = 29 (0x1d), region = 32  ;;  %s204_s10 = sand.u32 (%p2226_p4), 1, %s2124_s19  }
  0x14   : > { %s1917_s11 = sshll.u32 (%p2226_p4), %s2233_s29, 3  ;;  %s1949_s12 = smul.u32 (%p2226_p4), 48, %s204_s10 }
  0x15   : > { %s210_s15 = scalar_lea.vmem (%p2226_p4), %s3463_s0, %s1917_s11 }
  0x16   : > { %v248_v0 = vld [vmem:[%s210_s15] sm:$0xff] (%p2226_p4)  ;;  %s206_s16 = scalar_lea.vmem (%p2226_p4), [#allocation3], %s1949_s12 }
  0x17   : > { %v250_v1 = vld [vmem:[%s210_s15 + $0x40] sm:$0xff] (%p2226_p4)  ;;  %249 = vst [vmem:[%s206_s16] sm:$0xff] (%p2226_p4), %v248_v0 }
  0x18   : > { %v252_v2 = vld [vmem:[%s210_s15 + $0x80] sm:$0xff] (%p2226_p4)  ;;  %251 = vst [vmem:[%s206_s16 + $0x8] sm:$0xff] (%p2226_p4), %v250_v1 }
  0x19   : > { %v254_v3 = vld [vmem:[%s210_s15 + $0xc0] sm:$0xff] (%p2226_p4)  ;;  %253 = vst [vmem:[%s206_s16 + $0x10] sm:$0xff] (%p2226_p4), %v252_v2 }
  0x1a   : > { %v256_v4 = vld [vmem:[%s210_s15 + $0x100] sm:$0xff]  ;;  %255 = vst [vmem:[%s206_s16 + $0x18] sm:$0xff] %v254_v3 }
  0x1b   : > { %v258_v5 = vld [vmem:[%s210_s15 + $0x140] sm:$0xff]  ;;  %257 = vst [vmem:[%s206_s16 + $0x20] sm:$0xff] %v256_v4 }
  0x1c   : > { %259 = vst [vmem:[%s206_s16 + $0x28] sm:$0xff] %v258_v5 }
  0x1d PF: > { %265 = sbr.rel (!%p2226_p4) target bundleno = 41 (0x29), region = 70  ;;  %s267_s17 = sand.u32 (%p2226_p4), 1, %s2124_s19  }
  0x1e   : > { %s1920_s27 = sshll.u32 (%p2226_p4), %s2233_s29, 3  ;;  %s1918_s30 = sshll.u32 (%p2226_p4), %s267_s17, 6 }
  0x1f   : > { %s273_s8 = scalar_lea.vmem (%p2226_p4), %s3464_s1, %s1920_s27  ;;  %s269_s10 = scalar_lea.vmem (%p2226_p4), [#allocation4], %s1918_s30 }
  0x20   : > { %v315_v6 = vld [vmem:[%s273_s8] sm:$0xff] (%p2226_p4) }
  0x21   : > { %v317_v7 = vld [vmem:[%s273_s8 + $0x40] sm:$0xff] (%p2226_p4)  ;;  %316 = vst [vmem:[%s269_s10] sm:$0xff] (%p2226_p4), %v315_v6 }
  0x22   : > { %v319_v8 = vld [vmem:[%s273_s8 + $0x80] sm:$0xff] (%p2226_p4)  ;;  %318 = vst [vmem:[%s269_s10 + $0x8] sm:$0xff] (%p2226_p4), %v317_v7 }
  0x23   : > { %320 = vst [vmem:[%s269_s10 + $0x10] sm:$0xff] (%p2226_p4), %v319_v8  ;;  %v321_v9 = vld [vmem:[%s273_s8 + $0xc0] sm:$0xff] (%p2226_p4) }
  0x24   : > { %v323_v10 = vld [vmem:[%s273_s8 + $0x100] sm:$0xff]  ;;  %322 = vst [vmem:[%s269_s10 + $0x18] sm:$0xff] %v321_v9 }
  0x25   : > { %v325_v11 = vld [vmem:[%s273_s8 + $0x140] sm:$0xff]  ;;  %324 = vst [vmem:[%s269_s10 + $0x20] sm:$0xff] %v323_v10 }
  0x26   : > { %326 = vst [vmem:[%s269_s10 + $0x28] sm:$0xff] %v325_v11  ;;  %v327_v12 = vld [vmem:[%s273_s8 + $0x180] sm:$0xff] }
  0x27   : > { %v329_v13 = vld [vmem:[%s273_s8 + $0x1c0] sm:$0xff]  ;;  %328 = vst [vmem:[%s269_s10 + $0x30] sm:$0xff] %v327_v12 }
  0x28   : > { %330 = vst [vmem:[%s269_s10 + $0x38] sm:$0xff] %v329_v13 }
  0x29 PF: > { %p1921_p7 = scmp.ge.s32.totalorder %s2144_s24, 1  ;;  %p335_p8 = scmp.lt.s32.totalorder %s2144_s24, 9 }
  0x2b   : > { %p336_p9 = pnand %p1921_p7, %p335_p8 }
  0x2d   : > { %339 = sbr.rel (%p336_p9) target bundleno = 808 (0x328), region = 108 }
  0x34   : > { %s342_s28 = sand.u32 1, %s2120_s18   ;;  %p384_p10 = scmp.lt.s32.totalorder %s2132_s21, 1 }
  0x35   : > { %s1950_s29 = smul.u32 48, %s342_s28  ;;  %s1922_s11 = sshll.u32 %s342_s28, 6 }
  0x36   : > { %s3602_s21 = smov (!%p384_p10, %s2132_s21), 1  ;;  %s2269_s17 = scalar_lea.vmem [#allocation4], %s1922_s11 }
  0x37   : > { %s1931_s12 = sshll.u32 %s3602_s21, 4  ;;  %s2267_s16 = scalar_lea.vmem [#allocation3], %s1950_s29 }
  0x38   : > { %s2265_s15 = scalar_lea.vmem %s3468_s5, %s1931_s12  ;;  %p1925_p11 = scmp.ne.s32.totalorder %s2128_s20, 0 }
  0x39   : > { %vm394_vm0 = vcmask (!%p1925_p11), 7168   ;;  %v2146_v14 = vmov (!%p1925_p11), 0.0  }
  0x3a   : > { %393 = sbr.rel (%p1925_p11) target bundleno = 65 (0x41), region = 120  ;;  %395 = vst.msk [vmem:[#allocation2] sm:$0xff] (!%p1925_p11), %vm394_vm0, %v2146_v14  ;;  %396 = vst.msk [vmem:[#allocation2 + $0x8] sm:$0xff] (!%p1925_p11), %vm394_vm0, %v2146_v14 }
  0x41 PF: > { %v411_v15 = vld [vmem:[%s3465_s2] sm:$0xff]  ;;  %v2147_v16 = vmov 1   ;;  %v2148_v17 = vmov 0   ;;  %v412_v18 = vld [vmem:[%s3465_s2 + $0x8] sm:$0xff]  ;;  %v2149_v19 = vmov 2   ;;  %v3469_v20 = vmov 0.0  }
  0x42   : > { %2014 = vset.pattern.permute.xlu1 %v2147_v16  ;;  %2013 = vset.pattern.permute.xlu0 %v2148_v17  ;;  %v439_v21 = vlaneseq  ;;  %v397_v27 = vld [vmem:[%s2267_s16] sm:$0xff]  ;;  %v398_v31 = vld [vmem:[%s2267_s16 + $0x8] sm:$0xff]  ;;  %v399_v33 = vld [vmem:[%s2267_s16 + $0x10] sm:$0xff]  ;;  %p1928_p12 = scmp.ne.s32.totalorder %s2128_s20, 3 }
  0x43   : > { %424 = vperm.xlu1 %2014, %v411_v15   ;;  %415 = vperm.xlu0 %2013, %v411_v15   ;;  %v403_v38 = vld [vmem:[%s2269_s17] sm:$0xff]  ;;  %v404_v39 = vld [vmem:[%s2269_s17 + $0x8] sm:$0xff]  ;;  %v405_v53 = vld [vmem:[%s2269_s17 + $0x10] sm:$0xff] }
  0x44   : > { %1937 = vmatprep.subr.bf16.mxu0 %v3469_v20  ;;  %v440_v22 = vshrl.u32 %v439_v21, 7  ;;  %v400_v48 = vld [vmem:[%s2267_s16 + $0x18] sm:$0xff]  ;;  %v2396_v9 = vld [vmem:[%s2267_s16 + $0x20] sm:$0xff] }
  0x45   : > { %v406_v58 = vld [vmem:[%s2269_s17 + $0x18] sm:$0xff] }
  0x46   : > { %v2279_v23 = vsub.s32 0, %v440_v22  ;;  %v2281_v24 = vsub.s32 1, %v440_v22  ;;  %v2283_v25 = vsub.s32 3, %v440_v22  ;;  %v2285_v26 = vsub.s32 4, %v440_v22 }
  0x47   : > { %428 = vperm.xlu1 %2014, %v412_v18   ;;  %420 = vperm.xlu0 %2013, %v412_v18   ;;  %v2288_v28 = vsub.s32 2, %v440_v22  ;;  %v2290_v29 = vsub.s32 6, %v440_v22  ;;  %v2292_v30 = vsub.s32 7, %v440_v22  ;;  %v2295_v32 = vsub.s32 5, %v440_v22 }
  0x48   : > { %3518 = vst [vmem:[#allocation5_spill] sm:$0xff] %v2283_v25  ;;  %v442_v34 = vrot.slane %v397_v27, %v2279_v23  ;;  %v448_v35 = vrot.slane %v397_v27, %v2281_v24  ;;  %v522_v36 = vrot.slane %v397_v27, %v2283_v25  ;;  %v2302_v37 = vrot.slane %v397_v27, %v2285_v26 }
  0x49   : > { %3519 = vst [vmem:[#allocation6_spill] sm:$0xff] %v2288_v28  ;;  %3520 = vst [vmem:[#allocation7_spill] sm:$0xff] %v2292_v30  ;;  %v602_v40 = vrot.slane %v397_v27, %v2290_v29  ;;  %v2308_v41 = vrot.slane %v397_v27, %v2292_v30  ;;  %v2311_v42 = vrot.slane %v398_v31, %v2281_v24 }
  0x4a   : > { %3521 = vst [vmem:[#allocation8_spill] sm:$0xff] %v2295_v32  ;;  %v2314_v43 = vrot.slane %v398_v31, %v2288_v28  ;;  %v2317_v44 = vrot.slane %v397_v27, %v2288_v28  ;;  %v2320_v45 = vrot.slane %v397_v27, %v2295_v32  ;;  %v2323_v46 = vrot.slane %v398_v31, %v2279_v23 }
  0x4b   : > { %2016 = vset.pattern.permute.xlu1 %v2149_v19  ;;  %2015 = vset.pattern.permute.xlu0 %v2149_v19  ;;  %v2326_v47 = vrot.slane %v398_v31, %v2285_v26  ;;  %v2330_v49 = vrot.slane %v398_v31, %v2283_v25  ;;  %v2333_v50 = vrot.slane %v398_v31, %v2295_v32 }
  0x4c   : > { %436 = vperm.xlu1 %2016, %v412_v18   ;;  %432 = vperm.xlu0 %2015, %v411_v15   ;;  %v2336_v51 = vrot.slane %v398_v31, %v2292_v30  ;;  %v2339_v52 = vrot.slane %v399_v33, %v2279_v23  ;;  %v2343_v54 = vrot.slane %v403_v38, %v2279_v23 }
  0x4d   : > { %v2346_v55 = vrot.slane %v403_v38, %v2285_v26  ;;  %v2349_v56 = vrot.slane %v404_v39, %v2279_v23  ;;  %v2352_v57 = vrot.slane %v398_v31, %v2290_v29  ;;  %v2356_v59 = vrot.slane %v404_v39, %v2285_v26 }
  0x4e   : > { %v2359_v60 = vrot.slane %v399_v33, %v2288_v28  ;;  %v2362_v61 = vrot.slane %v399_v33, %v2283_v25  ;;  %v2365_v62 = vrot.slane %v399_v33, %v2295_v32  ;;  %v2368_v63 = vrot.slane %v399_v33, %v2281_v24 }
  0x4f   : > { %v2371_v0 = vrot.slane %v399_v33, %v2285_v26  ;;  %v2374_v1 = vrot.slane %v399_v33, %v2290_v29  ;;  %v2377_v2 = vrot.slane %v400_v48, %v2279_v23  ;;  %v2380_v3 = vrot.slane %v405_v53, %v2279_v23 }
  0x50   : > { %2017 = vset.pattern.permute.xlu1 %v2148_v17  ;;  %2018 = vset.pattern.permute.xlu0 %v2148_v17  ;;  %v2383_v4 = vrot.slane %v399_v33, %v2292_v30  ;;  %v2386_v5 = vrot.slane %v400_v48, %v2281_v24  ;;  %v2389_v6 = vrot.slane %v400_v48, %v2283_v25 }
  0x51   : > { %3522 = vst [vmem:[#allocation9_spill] sm:$0xff] %v2377_v2  ;;  %3523 = vst [vmem:[#allocation10_spill] sm:$0xff] %v2380_v3  ;;  %v2399_v10 = vrot.slane %v405_v53, %v2285_v26  ;;  %v2402_v11 = vrot.slane %v406_v58, %v2279_v23  ;;  %v2405_v12 = vrot.slane %v400_v48, %v2288_v28 }
  0x52   : > { %3524 = vst [vmem:[#allocation11_spill] sm:$0xff] %v2386_v5  ;;  %3525 = vst [vmem:[#allocation12_spill] sm:$0xff] %v2389_v6  ;;  %v2408_v13 = vrot.slane %v400_v48, %v2285_v26  ;;  %v2419_v21 = vrot.slane %v400_v48, %v2290_v29  ;;  %v2422_v22 = vrot.slane %v400_v48, %v2292_v30 }
  0x53   : > { %3526 = vst [vmem:[#allocation13_spill] sm:$0xff] %v2399_v10  ;;  %3527 = vst [vmem:[#allocation14_spill] sm:$0xff] %v2402_v11  ;;  %v2425_v31 = vrot.slane %v406_v58, %v2285_v26  ;;  %v2428_v33 = vrot.slane %v400_v48, %v2295_v32  ;;  %v2432_v38 = vrot.slane %v2396_v9, %v2281_v24 }
  0x54   : > { %3528 = vst [vmem:[#allocation15_spill] sm:$0xff] %v2405_v12  ;;  %3529 = vst [vmem:[#allocation16_spill] sm:$0xff] %v2408_v13  ;;  %v407_v12 = vld [vmem:[%s2269_s17 + $0x20] sm:$0xff] }
  0x55   : > { %3530 = vst [vmem:[#allocation17_spill] sm:$0xff] %v2419_v21  ;;  %3531 = vst [vmem:[#allocation18_spill] sm:$0xff] %v2422_v22 }
  0x56   : > { %3532 = vst [vmem:[#allocation19_spill] sm:$0xff] %v2425_v31  ;;  %3533 = vst [vmem:[#allocation20_spill] sm:$0xff] %v2428_v33  ;;  %v2446_v33 = vrot.slane %v2396_v9, %v2279_v23 }
  0x57   : > { %3534 = vst [vmem:[#allocation21_spill] sm:$0xff] %v2432_v38 }
  0x58   : > { %3535 = vst [vmem:[#allocation22_spill] sm:$0xff] %v2446_v33 }
  0xc2   : > { %v2391_v7 = vpop.permute.xlu1 %424  ;;  %v2393_v8 = vpop.permute.xlu0 %415 }
  0xc3   : > { %v443_v14 = vsub.f32 %v442_v34, %v2393_v8  ;;  %v449_v15 = vsub.f32 %v448_v35, %v2391_v7  ;;  %v523_v16 = vsub.f32 %v522_v36, %v2393_v8  ;;  %v529_v17 = vsub.f32 %v2302_v37, %v2391_v7 }
  0xc4   : > { %v603_v18 = vsub.f32 %v602_v40, %v2393_v8  ;;  %v609_v19 = vsub.f32 %v2308_v41, %v2391_v7 }
  0xc5   : > { %v457_v27 = vmul.f32 %v443_v14, %v443_v14  ;;  %v459_v20 = vmul.f32 %v449_v15, %v449_v15  ;;  %v537_v21 = vmul.f32 %v523_v16, %v523_v16  ;;  %v539_v11 = vmul.f32 %v529_v17, %v529_v17 }
  0xc6   : > { %v2434_v39 = vpop.permute.xlu1 %428  ;;  %v2436_v53 = vpop.permute.xlu0 %420  ;;  %v617_v13 = vmul.f32 %v603_v18, %v603_v18  ;;  %v619_v48 = vmul.f32 %v609_v19, %v609_v19  ;;  %v2450_v15 = vrot.slane %v2396_v9, %v2288_v28  ;;  %v689_v18 = vsub.f32 %v2314_v43, %v2391_v7 }
  0xc7   : > { %v444_v14 = vsub.f32 %v442_v34, %v2436_v53  ;;  %v450_v58 = vsub.f32 %v448_v35, %v2434_v39  ;;  %v524_v31 = vsub.f32 %v522_v36, %v2436_v53  ;;  %v530_v22 = vsub.f32 %v2302_v37, %v2434_v39 }
  0xc8   : > { %v604_v38 = vsub.f32 %v602_v40, %v2436_v53  ;;  %3536 = vst [vmem:[#allocation23_spill] sm:$0xff] %v2450_v15  ;;  %v610_v35 = vsub.f32 %v2308_v41, %v2434_v39  ;;  %v2456_v36 = vrot.slane %v2396_v9, %v2285_v26  ;;  %v461_v37 = vadd.f32 %v459_v20, %v457_v27 }
  0xc9   : > { %v458_v16 = vmul.f32 %v444_v14, %v444_v14  ;;  %v460_v34 = vmul.f32 %v450_v58, %v450_v58  ;;  %v541_v17 = vadd.f32 %v539_v11, %v537_v21  ;;  %v683_v40 = vsub.f32 %v2311_v42, %v2393_v8 }
  0xca   : > { %3537 = vst [vmem:[#allocation24_spill] sm:$0xff] %v2456_v36  ;;  %v538_v14 = vmul.f32 %v524_v31, %v524_v31  ;;  %v540_v58 = vmul.f32 %v530_v22, %v530_v22  ;;  %v618_v41 = vmul.f32 %v604_v38, %v604_v38  ;;  %v621_v33 = vadd.f32 %v619_v48, %v617_v13 }
  0xcb   : > { %v2462_v19 = vpop.permute.xlu1 %436  ;;  %v2464_v15 = vpop.permute.xlu0 %432  ;;  %v462_v27 = vadd.f32 %v460_v34, %v458_v16  ;;  %v620_v13 = vmul.f32 %v610_v35, %v610_v35  ;;  %v684_v3 = vsub.f32 %v2311_v42, %v2436_v53  ;;  %v2495_v42 = vrot.slane %v407_v12, %v2279_v23 }
  0xcc   : > { %v455_v36 = vsub.f32 %v2317_v44, %v2464_v15  ;;  %v456_v20 = vsub.f32 %v2317_v44, %v2462_v19  ;;  %v535_v11 = vsub.f32 %v2320_v45, %v2464_v15  ;;  %v536_v21 = vsub.f32 %v2320_v45, %v2462_v19 }
  0xcd   : > { %v615_v31 = vsub.f32 %v2323_v46, %v2464_v15  ;;  %v616_v22 = vsub.f32 %v2323_v46, %v2462_v19  ;;  %v542_v44 = vadd.f32 %v540_v58, %v538_v14  ;;  %v690_v46 = vsub.f32 %v2314_v43, %v2434_v39 }
  0xce   : > { %v463_v38 = vmul.f32 %v455_v36, %v455_v36  ;;  %v464_v48 = vmul.f32 %v456_v20, %v456_v20  ;;  %v543_v6 = vmul.f32 %v535_v11, %v535_v11  ;;  %v544_v10 = vmul.f32 %v536_v21, %v536_v21 }
  0xcf   : > { %v623_v5 = vmul.f32 %v615_v31, %v615_v31  ;;  %v624_v2 = vmul.f32 %v616_v22, %v616_v22  ;;  %v622_v36 = vadd.f32 %v620_v13, %v618_v41  ;;  %v697_v20 = vmul.f32 %v683_v40, %v683_v40 }
  0xd0   : > { %v2481_v45 = vadd.f32 %v463_v38, %v461_v37  ;;  %v2483_v16 = vadd.f32 %v464_v48, %v462_v27  ;;  %v2485_v34 = vadd.f32 %v543_v6, %v541_v17  ;;  %v2489_v35 = vadd.f32 %v544_v10, %v542_v44 }
  0xd1   : > { %v699_v11 = vmul.f32 %v689_v18, %v689_v18  ;;  %v2492_v14 = vadd.f32 %v623_v5, %v621_v33  ;;  %v2499_v37 = vrot.slane %v2396_v9, %v2295_v32  ;;  %v2502_v6 = vadd.f32 %v624_v2, %v622_v36 }
  0xd2   : > { %2020 = vrsqrt.f32 %v2481_v45  ;;  %v695_v43 = vsub.f32 %v2330_v49, %v2464_v15  ;;  %v2508_v10 = vrot.slane %v2396_v9, %v2283_v25  ;;  %v696_v5 = vsub.f32 %v2330_v49, %v2462_v19 }
  0xd3   : > { %2022 = vrsqrt.f32 %v2483_v16  ;;  %v698_v33 = vmul.f32 %v684_v3, %v684_v3  ;;  %v700_v17 = vmul.f32 %v690_v46, %v690_v46  ;;  %v701_v40 = vadd.f32 %v699_v11, %v697_v20 }
  0xd4   : > { %2024 = vrsqrt.f32 %v2485_v34  ;;  %v2515_v2 = vrot.slane %v407_v12, %v2285_v26  ;;  %v2519_v18 = vrot.slane %v2396_v9, %v2292_v30  ;;  %vm469_vm1 = vcmp.eq.f32.partialorder %v2481_v45, inf }
  0xd5   : > { %2026 = vrsqrt.f32 %v2489_v35  ;;  %v472_v58 = vand.u32 2147483648, %v2481_v45  ;;  %v763_v49 = vsub.f32 %v2326_v47, %v2393_v8  ;;  %vm471_vm2 = vcmp.eq.f32.partialorder %v2481_v45, 0.0 }
  0xd6   : > { %3538 = vst [vmem:[#allocation25_spill] sm:$0xff] %v2519_v18  ;;  %2028 = vrsqrt.f32 %v2492_v14  ;;  %vm476_vm3 = vcmp.eq.f32.partialorder %v2483_v16, inf  ;;  %v479_v3 = vand.u32 2147483648, %v2483_v16  ;;  %v552_v12 = vand.u32 2147483648, %v2485_v34 }
  0xd7   : > { %2030 = vrsqrt.f32 %v2502_v6  ;;  %vm478_vm4 = vcmp.eq.f32.partialorder %v2483_v16, 0.0  ;;  %vm549_vm5 = vcmp.eq.f32.partialorder %v2485_v34, inf  ;;  %v559_v41 = vand.u32 2147483648, %v2489_v35 }
  0xd8   : > { %v702_v21 = vadd.f32 %v700_v17, %v698_v33  ;;  %v703_v27 = vmul.f32 %v695_v43, %v695_v43  ;;  %v704_v31 = vmul.f32 %v696_v5, %v696_v5  ;;  %vm551_vm6 = vcmp.eq.f32.partialorder %v2485_v34, 0.0 }
  0xd9   : > { %vm556_vm7 = vcmp.eq.f32.partialorder %v2489_v35, inf  ;;  %v764_v22 = vsub.f32 %v2326_v47, %v2436_v53  ;;  %v769_v13 = vsub.f32 %v2333_v50, %v2391_v7  ;;  %v770_v38 = vsub.f32 %v2333_v50, %v2434_v39 }
  0xda   : > { %v775_v48 = vsub.f32 %v2352_v57, %v2464_v15  ;;  %vm558_vm8 = vcmp.eq.f32.partialorder %v2489_v35, 0.0  ;;  %v2545_v44 = vadd.f32 %v703_v27, %v701_v40  ;;  %v2547_v46 = vadd.f32 %v704_v31, %v702_v21 }
  0xdb   : > { %v776_v36 = vsub.f32 %v2352_v57, %v2462_v19  ;;  %v777_v20 = vmul.f32 %v763_v49, %v763_v49  ;;  %vm629_vm9 = vcmp.eq.f32.partialorder %v2492_v14, inf  ;;  %vm631_vm10 = vcmp.eq.f32.partialorder %v2492_v14, 0.0 }
  0xdc   : > { %v632_v47 = vand.u32 2147483648, %v2492_v14  ;;  %v779_v50 = vmul.f32 %v769_v13, %v769_v13  ;;  %v2021_v11 = vpop.eup %2020  ;;  %vm636_vm11 = vcmp.eq.f32.partialorder %v2502_v6, inf  ;;  %vm638_vm12 = vcmp.eq.f32.partialorder %v2502_v6, 0.0 }
  0xdd   : > { %2032 = vrsqrt.f32 %v2545_v44  ;;  %v783_v43 = vmul.f32 %v775_v48, %v775_v48  ;;  %v2023_v5 = vpop.eup %2022  ;;  %v468_v33 = vmul.f32 %v2021_v11, %v2481_v45  ;;  %v639_v57 = vand.u32 2147483648, %v2502_v6 }
  0xde   : > { %2034 = vrsqrt.f32 %v2547_v46  ;;  %v778_v17 = vmul.f32 %v764_v22, %v764_v22  ;;  %v2025_v40 = vpop.eup %2024  ;;  %v475_v49 = vmul.f32 %v2023_v5, %v2483_v16  ;;  %v780_v21 = vmul.f32 %v770_v38, %v770_v38 }
  0xdf   : > { %v781_v27 = vadd.f32 %v779_v50, %v777_v20  ;;  %v784_v31 = vmul.f32 %v776_v36, %v776_v36  ;;  %v2027_v13 = vpop.eup %2026  ;;  %v470_v30 = vsel %vm469_vm1, %v2481_v45, %v468_v33  ;;  %v548_v48 = vmul.f32 %v2025_v40, %v2485_v34 }
  0xe0   : > { %v712_v11 = vand.u32 2147483648, %v2545_v44  ;;  %v719_v32 = vand.u32 2147483648, %v2547_v46  ;;  %v2029_v18 = vpop.eup %2028  ;;  %v473_v22 = vsel %vm471_vm2, %v472_v58, %v470_v30  ;;  %v477_v38 = vsel %vm476_vm3, %v2483_v16, %v475_v49 }
  0xe1   : > { %v555_v36 = vmul.f32 %v2027_v13, %v2489_v35  ;;  %vm709_vm13 = vcmp.eq.f32.partialorder %v2545_v44, inf  ;;  %v2574_v20 = vadd.f32 %v783_v43, %v781_v27  ;;  %v2031_v50 = vpop.eup %2030  ;;  %v480_v5 = vsel %vm478_vm4, %v479_v3, %v477_v38 }
  0xe2   : > { %v481_v33 = vmul.f32 8.333333, %v473_v22  ;;  %v550_v45 = vsel %vm549_vm5, %v2485_v34, %v548_v48  ;;  %v628_v30 = vmul.f32 %v2029_v18, %v2492_v14  ;;  %vm711_vm14 = vcmp.eq.f32.partialorder %v2545_v44, 0.0 }
  0xe3   : > { %vm716_vm15 = vcmp.eq.f32.partialorder %v2547_v46, inf  ;;  %v482_v58 = vmul.f32 8.333333, %v480_v5  ;;  %v553_v43 = vsel %vm551_vm6, %v552_v12, %v550_v45  ;;  %v557_v16 = vsel %vm556_vm7, %v2489_v35, %v555_v36 }
  0xe4   : > { %v635_v3 = vmul.f32 %v2031_v50, %v2502_v6  ;;  %vm718_vm0 = vcmp.eq.f32.partialorder %v2547_v46, 0.0  ;;  %v483_v40 = vsub.f32 1.0, %v481_v33  ;;  %v560_v18 = vsel %vm558_vm8, %v559_v41, %v557_v16 }
  0xe5   : > { %v561_v49 = vmul.f32 8.333333, %v553_v43  ;;  %v630_v27 = vsel %vm629_vm9, %v2492_v14, %v628_v30  ;;  %v484_v13 = vsub.f32 1.0, %v482_v58  ;;  %v562_v34 = vmul.f32 8.333333, %v560_v18  ;;  %v2621_v18 = vld [vmem:[%s2269_s17 + $0x28] sm:$0xff] }
  0xe6   : > { %v633_v12 = vsel %vm631_vm10, %v632_v47, %v630_v27  ;;  %v637_v48 = vsel %vm636_vm11, %v2502_v6, %v635_v3  ;;  %v2601_v22 = vmax.f32 %v483_v40, 0.0  ;;  %v782_v14 = vadd.f32 %v780_v21, %v778_v17  ;;  %v2618_v40 = vld [vmem:[%s2267_s16 + $0x28] sm:$0xff] }
  0xe7   : > { %v563_v38 = vsub.f32 1.0, %v561_v49  ;;  %v640_v35 = vsel %vm638_vm12, %v639_v57, %v637_v48  ;;  %v641_v41 = vmul.f32 8.333333, %v633_v12  ;;  %v2033_v36 = vpop.eup %2032  ;;  %v2605_v50 = vmax.f32 %v484_v13, 0.0 }
  0xe8   : > { %v564_v5 = vsub.f32 1.0, %v562_v34  ;;  %v642_v33 = vmul.f32 8.333333, %v640_v35  ;;  %v2035_v47 = vpop.eup %2034  ;;  %v491_v45 = vmul.f32 %v2343_v54, %v2601_v22  ;;  %v708_v43 = vmul.f32 %v2033_v36, %v2545_v44 }
  0xe9   : > { %v2609_v30 = vmax.f32 %v563_v38, 0.0  ;;  %v643_v58 = vsub.f32 1.0, %v641_v41  ;;  %v715_v16 = vmul.f32 %v2035_v47, %v2547_v46  ;;  %v2615_v3 = vadd.f32 %v784_v31, %v782_v14 }
  0xea   : > { %v2612_v6 = vmax.f32 %v564_v5, 0.0  ;;  %v644_v57 = vsub.f32 1.0, %v642_v33  ;;  %v710_v49 = vsel %vm709_vm13, %v2545_v44, %v708_v43  ;;  %2036 = vrsqrt.f32 %v2574_v20 }
  0xeb   : > { %v571_v17 = vmul.f32 %v2346_v55, %v2609_v30  ;;  %v2625_v21 = vmax.f32 %v643_v58, 0.0  ;;  %v492_v27 = vmul.f32 %v2343_v54, %v2605_v50  ;;  %v713_v13 = vsel %vm711_vm14, %v712_v11, %v710_v49 }
  0xec   : > { %v572_v31 = vmul.f32 %v2346_v55, %v2612_v6  ;;  %v717_v34 = vsel %vm716_vm15, %v2547_v46, %v715_v16  ;;  %v2640_v48 = vmax.f32 %v644_v57, 0.0  ;;  %v2646_v35 = vrot.slane %v2396_v9, %v2290_v29 }
  0xed   : > { %v573_v12 = vadd.f32 %v571_v17, %v491_v45  ;;  %v720_v38 = vsel %vm718_vm0, %v719_v32, %v717_v34  ;;  %v721_v54 = vmul.f32 8.333333, %v713_v13  ;;  %v2650_v55 = vrot.slane %v2621_v18, %v2279_v23 }
  0xee   : > { %v2654_v44 = vrot.slane %v2618_v40, %v2279_v23  ;;  %v2658_v11 = vrot.slane %v2618_v40, %v2288_v28  ;;  %v651_v32 = vmul.f32 %v2349_v56, %v2625_v21  ;;  %v722_v46 = vmul.f32 8.333333, %v720_v38 }
  0xef   : > { %v843_v9 = vsub.f32 %v2336_v51, %v2393_v8  ;;  %v844_v41 = vsub.f32 %v2336_v51, %v2436_v53  ;;  %v574_v36 = vadd.f32 %v572_v31, %v492_v27  ;;  %2038 = vrsqrt.f32 %v2615_v3 }
  0xf0   : > { %v2669_v5 = vrot.slane %v2618_v40, %v2281_v24  ;;  %v2673_v33 = vrot.slane %v2618_v40, %v2283_v25  ;;  %v652_v14 = vmul.f32 %v2349_v56, %v2640_v48  ;;  %v653_v47 = vadd.f32 %v651_v32, %v573_v12  ;;  %v3553_v25 = vld [vmem:[#allocation14_spill] sm:$0xff] }
  0xf1   : > { %vm789_vm1 = vcmp.eq.f32.partialorder %v2574_v20, inf  ;;  %v849_v51 = vsub.f32 %v2339_v52, %v2391_v7  ;;  %v723_v45 = vsub.f32 1.0, %v721_v54  ;;  %v850_v58 = vsub.f32 %v2339_v52, %v2434_v39 }
  0xf2   : > { %v855_v43 = vsub.f32 %v2368_v63, %v2464_v15  ;;  %v856_v57 = vsub.f32 %v2368_v63, %v2462_v19  ;;  %v724_v16 = vsub.f32 1.0, %v722_v46  ;;  %v857_v17 = vmul.f32 %v843_v9, %v843_v9 }
  0xf3   : > { %v858_v49 = vmul.f32 %v844_v41, %v844_v41  ;;  %v859_v56 = vmul.f32 %v849_v51, %v849_v51  ;;  %vm791_vm2 = vcmp.eq.f32.partialorder %v2574_v20, 0.0  ;;  %v860_v27 = vmul.f32 %v850_v58, %v850_v58 }
  0xf4   : > { %v863_v31 = vmul.f32 %v855_v43, %v855_v43  ;;  %v864_v13 = vmul.f32 %v856_v57, %v856_v57  ;;  %v2037_v34 = vpop.eup %2036  ;;  %v654_v12 = vadd.f32 %v652_v14, %v574_v36  ;;  %v792_v38 = vand.u32 2147483648, %v2574_v20 }
  0xf5   : > { %v861_v52 = vadd.f32 %v859_v56, %v857_v17  ;;  %v923_v54 = vsub.f32 %v2359_v60, %v2393_v8  ;;  %v2690_v32 = vmax.f32 %v723_v45, 0.0  ;;  %v788_v63 = vmul.f32 %v2037_v34, %v2574_v20 }
  0xf6   : > { %v862_v46 = vadd.f32 %v860_v27, %v858_v49  ;;  %v924_v9 = vsub.f32 %v2359_v60, %v2436_v53  ;;  %v2695_v41 = vmax.f32 %v724_v16, 0.0  ;;  %v929_v36 = vsub.f32 %v2362_v61, %v2391_v7 }
  0xf7   : > { %v2697_v51 = vadd.f32 %v863_v31, %v861_v52  ;;  %v930_v14 = vsub.f32 %v2362_v61, %v2434_v39  ;;  %v790_v45 = vsel %vm789_vm1, %v2574_v20, %v788_v63  ;;  %v935_v43 = vsub.f32 %v2371_v0, %v2464_v15 }
  0xf8   : > { %v2706_v58 = vadd.f32 %v864_v13, %v862_v46  ;;  %v936_v60 = vsub.f32 %v2371_v0, %v2462_v19  ;;  %v793_v57 = vsel %vm791_vm2, %v792_v38, %v790_v45  ;;  %vm796_vm3 = vcmp.eq.f32.partialorder %v2615_v3, inf }
  0xf9   : > { %2040 = vrsqrt.f32 %v2697_v51  ;;  %v937_v61 = vmul.f32 %v923_v54, %v923_v54  ;;  %v2039_v16 = vpop.eup %2038  ;;  %vm798_vm4 = vcmp.eq.f32.partialorder %v2615_v3, 0.0  ;;  %v801_v17 = vmul.f32 8.333333, %v793_v57 }
  0xfa   : > { %2042 = vrsqrt.f32 %v2706_v58  ;;  %v938_v49 = vmul.f32 %v924_v9, %v924_v9  ;;  %v731_v56 = vmul.f32 %v2356_v59, %v2690_v32  ;;  %v795_v0 = vmul.f32 %v2039_v16, %v2615_v3 }
  0xfb   : > { %v799_v20 = vand.u32 2147483648, %v2615_v3  ;;  %v939_v27 = vmul.f32 %v929_v36, %v929_v36  ;;  %v732_v31 = vmul.f32 %v2356_v59, %v2695_v41  ;;  %v940_v13 = vmul.f32 %v930_v14, %v930_v14 }
  0xfc   : > { %v943_v34 = vmul.f32 %v935_v43, %v935_v43  ;;  %v944_v38 = vmul.f32 %v936_v60, %v936_v60  ;;  %v733_v52 = vadd.f32 %v731_v56, %v653_v47  ;;  %v797_v54 = vsel %vm796_vm3, %v2615_v3, %v795_v0 }
  0xfd   : > { %v803_v63 = vsub.f32 1.0, %v801_v17  ;;  %v941_v46 = vadd.f32 %v939_v27, %v937_v61  ;;  %v2727_v9 = vadd.f32 %v732_v31, %v654_v12  ;;  %v800_v45 = vsel %vm798_vm4, %v799_v20, %v797_v54 }
  0xfe   : > { %v942_v57 = vadd.f32 %v940_v13, %v938_v49  ;;  %v1003_v36 = vsub.f32 %v2365_v62, %v2393_v8  ;;  %v802_v59 = vmul.f32 8.333333, %v800_v45  ;;  %vm869_vm5 = vcmp.eq.f32.partialorder %v2697_v51, inf }
  0xff   : > { %v2734_v14 = vadd.f32 %v943_v34, %v941_v46  ;;  %v1004_v47 = vsub.f32 %v2365_v62, %v2436_v53  ;;  %v1009_v12 = vsub.f32 %v2374_v1, %v2391_v7  ;;  %v1010_v3 = vsub.f32 %v2374_v1, %v2434_v39  ;;  %v3540_v34 = vld [vmem:[#allocation10_spill] sm:$0xff] }
 0x100   : > { %v2738_v43 = vadd.f32 %v944_v38, %v942_v57  ;;  %v1015_v60 = vsub.f32 %v2383_v4, %v2464_v15  ;;  %v2746_v61 = vmax.f32 %v803_v63, 0.0  ;;  %vm871_vm6 = vcmp.eq.f32.partialorder %v2697_v51, 0.0 }
 0x101   : > { %2044 = vrsqrt.f32 %v2734_v14  ;;  %v1016_v62 = vsub.f32 %v2383_v4, %v2462_v19  ;;  %v872_v16 = vand.u32 2147483648, %v2697_v51  ;;  %vm876_vm7 = vcmp.eq.f32.partialorder %v2706_v58, inf }
 0x102   : > { %3539 = vst [vmem:[#allocation26_spill] sm:$0xff] %v2746_v61  ;;  %2046 = vrsqrt.f32 %v2738_v43  ;;  %v1017_v17 = vmul.f32 %v1003_v36, %v1003_v36  ;;  %v804_v49 = vsub.f32 1.0, %v802_v59  ;;  %vm878_vm8 = vcmp.eq.f32.partialorder %v2706_v58, 0.0 }
 0x103   : > { %v2041_v1 = vpop.eup %2040  ;;  %v879_v56 = vand.u32 2147483648, %v2706_v58  ;;  %v1018_v0 = vmul.f32 %v1004_v47, %v1004_v47  ;;  %v1019_v31 = vmul.f32 %v1009_v12, %v1009_v12  ;;  %v1020_v13 = vmul.f32 %v1010_v3, %v1010_v3 }
 0x104   : > { %v2043_v20 = vpop.eup %2042  ;;  %v868_v27 = vmul.f32 %v2041_v1, %v2697_v51  ;;  %v1023_v4 = vmul.f32 %v1015_v60, %v1015_v60  ;;  %v811_v38 = vmul.f32 %v3540_v34, %v2746_v61  ;;  %vm949_vm9 = vcmp.eq.f32.partialorder %v2734_v14, inf }
 0x105   : > { %v875_v54 = vmul.f32 %v2043_v20, %v2706_v58  ;;  %v1024_v63 = vmul.f32 %v1016_v62, %v1016_v62  ;;  %vm951_vm10 = vcmp.eq.f32.partialorder %v2734_v14, 0.0  ;;  %v1021_v45 = vadd.f32 %v1019_v31, %v1017_v17  ;;  %v3544_v31 = vld [vmem:[#allocation15_spill] sm:$0xff] }
 0x106   : > { %v870_v46 = vsel %vm869_vm5, %v2697_v51, %v868_v27  ;;  %v1022_v57 = vadd.f32 %v1020_v13, %v1018_v0  ;;  %v2766_v36 = vmax.f32 %v804_v49, 0.0  ;;  %v813_v59 = vadd.f32 %v811_v38, %v733_v52  ;;  %v3542_v52 = vld [vmem:[#allocation9_spill] sm:$0xff] }
 0x107   : > { %v873_v47 = vsel %vm871_vm6, %v872_v16, %v870_v46  ;;  %v877_v12 = vsel %vm876_vm7, %v2706_v58, %v875_v54  ;;  %v2775_v62 = vadd.f32 %v1023_v4, %v1021_v45  ;;  %v952_v49 = vand.u32 2147483648, %v2734_v14  ;;  %v3543_v58 = vld [vmem:[#allocation11_spill] sm:$0xff] }
 0x108   : > { %3541 = vst [vmem:[#allocation10_spill] sm:$0xff] %v2766_v36  ;;  %v880_v3 = vsel %vm878_vm8, %v879_v56, %v877_v12  ;;  %v881_v60 = vmul.f32 8.333333, %v873_v47  ;;  %v2777_v1 = vadd.f32 %v1024_v63, %v1022_v57  ;;  %v1083_v0 = vsub.f32 %v3542_v52, %v2393_v8 }
 0x109   : > { %v882_v17 = vmul.f32 8.333333, %v880_v3  ;;  %v1084_v51 = vsub.f32 %v3542_v52, %v2436_v53  ;;  %2048 = vrsqrt.f32 %v2775_v62  ;;  %v1089_v56 = vsub.f32 %v3543_v58, %v2391_v7 }
 0x10a   : > { %v883_v16 = vsub.f32 1.0, %v881_v60  ;;  %v1090_v20 = vsub.f32 %v3543_v58, %v2434_v39  ;;  %vm956_vm11 = vcmp.eq.f32.partialorder %v2738_v43, inf  ;;  %vm958_vm12 = vcmp.eq.f32.partialorder %v2738_v43, 0.0 }
 0x10b   : > { %v2045_v27 = vpop.eup %2044  ;;  %2050 = vrsqrt.f32 %v2777_v1  ;;  %v1095_v13 = vsub.f32 %v3544_v31, %v2464_v15  ;;  %v812_v38 = vmul.f32 %v3540_v34, %v2766_v36  ;;  %v884_v54 = vsub.f32 1.0, %v882_v17 }
 0x10c   : > { %v2047_v4 = vpop.eup %2046  ;;  %v948_v63 = vmul.f32 %v2045_v27, %v2734_v14  ;;  %v959_v46 = vand.u32 2147483648, %v2738_v43  ;;  %v1096_v57 = vsub.f32 %v3544_v31, %v2462_v19  ;;  %v1097_v47 = vmul.f32 %v1083_v0, %v1083_v0 }
 0x10d   : > { %v955_v45 = vmul.f32 %v2047_v4, %v2738_v43  ;;  %v1098_v12 = vmul.f32 %v1084_v51, %v1084_v51  ;;  %v2801_v3 = vmax.f32 %v883_v16, 0.0  ;;  %v1099_v52 = vmul.f32 %v1089_v56, %v1089_v56 }
 0x10e   : > { %v950_v60 = vsel %vm949_vm9, %v2734_v14, %v948_v63  ;;  %v1100_v34 = vmul.f32 %v1090_v20, %v1090_v20  ;;  %v814_v17 = vadd.f32 %v812_v38, %v2727_v9  ;;  %v1103_v31 = vmul.f32 %v1095_v13, %v1095_v13  ;;  %v3547_v14 = vld [vmem:[#allocation13_spill] sm:$0xff] }
 0x10f   : > { %3545 = vst [vmem:[#allocation9_spill] sm:$0xff] %v2801_v3  ;;  %v953_v58 = vsel %vm951_vm10, %v952_v49, %v950_v60  ;;  %v957_v27 = vsel %vm956_vm11, %v2738_v43, %v955_v45  ;;  %v2812_v0 = vmax.f32 %v884_v54, 0.0  ;;  %v1101_v4 = vadd.f32 %v1099_v52, %v1097_v47  ;;  %v3548_v52 = vld [vmem:[#allocation12_spill] sm:$0xff] }
 0x110   : > { %v960_v51 = vsel %vm958_vm12, %v959_v46, %v957_v27  ;;  %v961_v16 = vmul.f32 8.333333, %v953_v58  ;;  %vm1029_vm13 = vcmp.eq.f32.partialorder %v2775_v62, inf  ;;  %v1102_v56 = vadd.f32 %v1100_v34, %v1098_v12 }
 0x111   : > { %3546 = vst [vmem:[#allocation11_spill] sm:$0xff] %v2812_v0  ;;  %v962_v63 = vmul.f32 8.333333, %v960_v51  ;;  %v1104_v9 = vmul.f32 %v1096_v57, %v1096_v57  ;;  %v891_v49 = vmul.f32 %v3547_v14, %v2801_v3  ;;  %vm1031_vm14 = vcmp.eq.f32.partialorder %v2775_v62, 0.0 }
 0x112   : > { %v1032_v20 = vand.u32 2147483648, %v2775_v62  ;;  %v2821_v13 = vadd.f32 %v1103_v31, %v1101_v4  ;;  %v963_v38 = vsub.f32 1.0, %v961_v16  ;;  %vm1036_vm15 = vcmp.eq.f32.partialorder %v2777_v1, inf }
 0x113   : > { %vm1038_vm0 = vcmp.eq.f32.partialorder %v2777_v1, 0.0  ;;  %v2825_v43 = vadd.f32 %v1104_v9, %v1102_v56  ;;  %v2049_v54 = vpop.eup %2048  ;;  %v892_v46 = vmul.f32 %v3547_v14, %v2812_v0  ;;  %v893_v45 = vadd.f32 %v891_v49, %v813_v59  ;;  %v3549_v59 = vld [vmem:[#allocation16_spill] sm:$0xff] }
 0x114   : > { %v1039_v57 = vand.u32 2147483648, %v2777_v1  ;;  %2052 = vrsqrt.f32 %v2821_v13  ;;  %v964_v12 = vsub.f32 1.0, %v962_v63  ;;  %v1028_v60 = vmul.f32 %v2049_v54, %v2775_v62  ;;  %v3551_v56 = vld [vmem:[#allocation20_spill] sm:$0xff] }
 0x115   : > { %v2051_v47 = vpop.eup %2050  ;;  %2054 = vrsqrt.f32 %v2825_v43  ;;  %v1163_v34 = vsub.f32 %v3548_v52, %v2393_v8  ;;  %v1164_v27 = vsub.f32 %v3548_v52, %v2436_v53  ;;  %v1169_v31 = vsub.f32 %v3549_v59, %v2391_v7 }
 0x116   : > { %v1035_v58 = vmul.f32 %v2051_v47, %v2777_v1  ;;  %v1170_v51 = vsub.f32 %v3549_v59, %v2434_v39  ;;  %v894_v16 = vadd.f32 %v892_v46, %v814_v17  ;;  %v2842_v4 = vmax.f32 %v963_v38, 0.0 }
 0x117   : > { %v1030_v63 = vsel %vm1029_vm13, %v2775_v62, %v1028_v60  ;;  %v1175_v9 = vsub.f32 %v3551_v56, %v2464_v15  ;;  %vm1109_vm1 = vcmp.eq.f32.partialorder %v2821_v13, inf  ;;  %v1176_v17 = vsub.f32 %v3551_v56, %v2462_v19 }
 0x118   : > { %3550 = vst [vmem:[#allocation15_spill] sm:$0xff] %v2842_v4  ;;  %v1033_v14 = vsel %vm1031_vm14, %v1032_v20, %v1030_v63  ;;  %v1037_v49 = vsel %vm1036_vm15, %v2777_v1, %v1035_v58  ;;  %v2857_v38 = vmax.f32 %v964_v12, 0.0  ;;  %v1177_v47 = vmul.f32 %v1163_v34, %v1163_v34 }
 0x119   : > { %v1040_v54 = vsel %vm1038_vm0, %v1039_v57, %v1037_v49  ;;  %v1041_v46 = vmul.f32 8.333333, %v1033_v14  ;;  %v1178_v52 = vmul.f32 %v1164_v27, %v1164_v27  ;;  %v1179_v62 = vmul.f32 %v1169_v31, %v1169_v31  ;;  %v3554_v57 = vld [vmem:[#allocation17_spill] sm:$0xff] }
 0x11a   : > { %3552 = vst [vmem:[#allocation13_spill] sm:$0xff] %v2857_v38  ;;  %v1042_v60 = vmul.f32 8.333333, %v1040_v54  ;;  %v1180_v20 = vmul.f32 %v1170_v51, %v1170_v51  ;;  %vm1111_vm2 = vcmp.eq.f32.partialorder %v2821_v13, 0.0  ;;  %v1183_v58 = vmul.f32 %v1175_v9, %v1175_v9 }
 0x11b   : > { %v1043_v59 = vsub.f32 1.0, %v1041_v46  ;;  %v1184_v63 = vmul.f32 %v1176_v17, %v1176_v17  ;;  %v971_v28 = vmul.f32 %v3553_v25, %v2842_v4  ;;  %v1112_v12 = vand.u32 2147483648, %v2821_v13 }
 0x11c   : > { %v1181_v56 = vadd.f32 %v1179_v62, %v1177_v47  ;;  %v1182_v0 = vadd.f32 %v1180_v20, %v1178_v52  ;;  %v1044_v1 = vsub.f32 1.0, %v1042_v60  ;;  %vm1116_vm3 = vcmp.eq.f32.partialorder %v2825_v43, inf  ;;  %v3555_v47 = vld [vmem:[#allocation18_spill] sm:$0xff] }
 0x11d   : > { %vm1118_vm4 = vcmp.eq.f32.partialorder %v2825_v43, 0.0  ;;  %v1243_v34 = vsub.f32 %v3554_v57, %v2393_v8  ;;  %v972_v31 = vmul.f32 %v3553_v25, %v2857_v38  ;;  %v1244_v14 = vsub.f32 %v3554_v57, %v2436_v53  ;;  %v3557_v38 = vld [vmem:[#allocation19_spill] sm:$0xff] }
 0x11e   : > { %v2053_v27 = vpop.eup %2052  ;;  %v2871_v51 = vadd.f32 %v1183_v58, %v1181_v56  ;;  %v2873_v9 = vadd.f32 %v1184_v63, %v1182_v0  ;;  %v2877_v17 = vmax.f32 %v1043_v59, 0.0  ;;  %v1119_v46 = vand.u32 2147483648, %v2825_v43  ;;  %v3556_v0 = vld [vmem:[#allocation22_spill] sm:$0xff] }
 0x11f   : > { %v2055_v49 = vpop.eup %2054  ;;  %v1108_v54 = vmul.f32 %v2053_v27, %v2821_v13  ;;  %v1249_v60 = vsub.f32 %v3555_v47, %v2391_v7  ;;  %v1250_v25 = vsub.f32 %v3555_v47, %v2434_v39  ;;  %v1255_v62 = vsub.f32 %v3556_v0, %v2464_v15 }
 0x120   : > { %v1115_v52 = vmul.f32 %v2055_v49, %v2825_v43  ;;  %2056 = vrsqrt.f32 %v2871_v51  ;;  %v2889_v20 = vmax.f32 %v1044_v1, 0.0  ;;  %v1256_v58 = vsub.f32 %v3556_v0, %v2462_v19 }
 0x121   : > { %v1110_v59 = vsel %vm1109_vm1, %v2821_v13, %v1108_v54  ;;  %v1257_v63 = vmul.f32 %v1243_v34, %v1243_v34  ;;  %2058 = vrsqrt.f32 %v2873_v9  ;;  %v1258_v27 = vmul.f32 %v1244_v14, %v1244_v14 }
 0x122   : > { %v1113_v56 = vsel %vm1111_vm2, %v1112_v12, %v1110_v59  ;;  %v1117_v57 = vsel %vm1116_vm3, %v2825_v43, %v1115_v52  ;;  %v973_v1 = vadd.f32 %v971_v28, %v893_v45  ;;  %v974_v49 = vadd.f32 %v972_v31, %v894_v16  ;;  %v3558_v45 = vld [vmem:[#allocation21_spill] sm:$0xff] }
 0x123   : > { %v1120_v47 = vsel %vm1118_vm4, %v1119_v46, %v1117_v57  ;;  %v1121_v54 = vmul.f32 8.333333, %v1113_v56  ;;  %v1051_v0 = vmul.f32 %v3557_v38, %v2877_v17  ;;  %v1259_v4 = vmul.f32 %v1249_v60, %v1249_v60  ;;  %v3559_v46 = vld [vmem:[#allocation23_spill] sm:$0xff] }
 0x124   : > { %v1122_v34 = vmul.f32 8.333333, %v1120_v47  ;;  %v1260_v13 = vmul.f32 %v1250_v25, %v1250_v25  ;;  %v1052_v12 = vmul.f32 %v3557_v38, %v2889_v20  ;;  %v1263_v52 = vmul.f32 %v1255_v62, %v1255_v62 }
 0x125   : > { %v1123_v59 = vsub.f32 1.0, %v1121_v54  ;;  %v1264_v3 = vmul.f32 %v1256_v58, %v1256_v58  ;;  %v1261_v14 = vadd.f32 %v1259_v4, %v1257_v63  ;;  %v1323_v43 = vsub.f32 %v3558_v45, %v2393_v8 }
 0x126   : > { %v1124_v36 = vsub.f32 1.0, %v1122_v34  ;;  %v1262_v28 = vadd.f32 %v1260_v13, %v1258_v27  ;;  %v1053_v16 = vadd.f32 %v1051_v0, %v973_v1  ;;  %vm1189_vm5 = vcmp.eq.f32.partialorder %v2871_v51, inf }
 0x127   : > { %v1324_v31 = vsub.f32 %v3558_v45, %v2436_v53  ;;  %v1329_v60 = vsub.f32 %v3559_v46, %v2391_v7  ;;  %v2915_v25 = vmax.f32 %v1123_v59, 0.0  ;;  %vm1191_vm6 = vcmp.eq.f32.partialorder %v2871_v51, 0.0 }
 0x128   : > { %v2918_v38 = vadd.f32 %v1263_v52, %v1261_v14  ;;  %v2920_v4 = vadd.f32 %v1264_v3, %v1262_v28  ;;  %v2922_v62 = vmax.f32 %v1124_v36, 0.0  ;;  %v1192_v58 = vand.u32 2147483648, %v2871_v51 }
 0x129   : > { %v1330_v63 = vsub.f32 %v3559_v46, %v2434_v39  ;;  %v1335_v56 = vsub.f32 %v2508_v10, %v2464_v15  ;;  %v1336_v27 = vsub.f32 %v2508_v10, %v2462_v19  ;;  %v1337_v1 = vmul.f32 %v1323_v43, %v1323_v43 }
 0x12a   : > { %v2057_v57 = vpop.eup %2056  ;;  %2060 = vrsqrt.f32 %v2918_v38  ;;  %v1339_v47 = vmul.f32 %v1329_v60, %v1329_v60  ;;  %v1054_v3 = vadd.f32 %v1052_v12, %v974_v49  ;;  %v1338_v54 = vmul.f32 %v1324_v31, %v1324_v31 }
 0x12b   : > { %v1188_v36 = vmul.f32 %v2057_v57, %v2871_v51  ;;  %2062 = vrsqrt.f32 %v2920_v4  ;;  %v2059_v0 = vpop.eup %2058  ;;  %v1131_v34 = vmul.f32 %v2495_v42, %v2915_v25  ;;  %vm1196_vm7 = vcmp.eq.f32.partialorder %v2873_v9, inf }
 0x12c   : > { %vm1198_vm8 = vcmp.eq.f32.partialorder %v2873_v9, 0.0  ;;  %v1199_v13 = vand.u32 2147483648, %v2873_v9  ;;  %v1132_v10 = vmul.f32 %v2495_v42, %v2922_v62  ;;  %v1195_v12 = vmul.f32 %v2059_v0, %v2873_v9 }
 0x12d   : > { %v1190_v49 = vsel %vm1189_vm5, %v2871_v51, %v1188_v36  ;;  %v1340_v59 = vmul.f32 %v1330_v63, %v1330_v63  ;;  %v1341_v14 = vadd.f32 %v1339_v47, %v1337_v1  ;;  %v1343_v28 = vmul.f32 %v1335_v56, %v1335_v56  ;;  %v1725_v1 = vld [vmem:[%s3467_s4] sm:$0xff]  ;;  %v1726_v47 = vld [vmem:[%s3467_s4 + $0x8] sm:$0xff] }
 0x12e   : > { %v1193_v52 = vsel %vm1191_vm6, %v1192_v58, %v1190_v49  ;;  %v1344_v45 = vmul.f32 %v1336_v27, %v1336_v27  ;;  %v1197_v43 = vsel %vm1196_vm7, %v2873_v9, %v1195_v12  ;;  %vm1269_vm9 = vcmp.eq.f32.partialorder %v2918_v38, inf  ;;  %v3560_v58 = vld [vmem:[#allocation24_spill] sm:$0xff]  ;;  %1729 = vperm.xlu1 %2017, %v1725_v1   ;;  %1734 = vperm.xlu0 %2018, %v1726_v47  }
 0x12f   : > { %v1201_v31 = vmul.f32 8.333333, %v1193_v52  ;;  %v1342_v46 = vadd.f32 %v1340_v59, %v1338_v54  ;;  %v1133_v42 = vadd.f32 %v1131_v34, %v1053_v16  ;;  %v1200_v60 = vsel %vm1198_vm8, %v1199_v13, %v1197_v43 }
 0x130   : > { %vm1271_vm10 = vcmp.eq.f32.partialorder %v2918_v38, 0.0  ;;  %v2950_v57 = vadd.f32 %v1343_v28, %v1341_v14  ;;  %v1202_v36 = vmul.f32 8.333333, %v1200_v60  ;;  %v1272_v63 = vand.u32 2147483648, %v2918_v38 }
 0x131   : > { %v2953_v51 = vadd.f32 %v1344_v45, %v1342_v46  ;;  %v1403_v56 = vsub.f32 %v3560_v58, %v2393_v8  ;;  %v1404_v9 = vsub.f32 %v3560_v58, %v2436_v53  ;;  %v1409_v16 = vsub.f32 %v2499_v37, %v2391_v7 }
 0x132   : > { %2064 = vrsqrt.f32 %v2950_v57  ;;  %v1410_v27 = vsub.f32 %v2499_v37, %v2434_v39  ;;  %v1134_v54 = vadd.f32 %v1132_v10, %v1054_v3  ;;  %v1203_v0 = vsub.f32 1.0, %v1201_v31 }
 0x133   : > { %v1204_v34 = vsub.f32 1.0, %v1202_v36  ;;  %2066 = vrsqrt.f32 %v2953_v51  ;;  %vm1276_vm11 = vcmp.eq.f32.partialorder %v2920_v4, inf  ;;  %vm1278_vm12 = vcmp.eq.f32.partialorder %v2920_v4, 0.0 }
 0x134   : > { %v2061_v13 = vpop.eup %2060  ;;  %v1279_v37 = vand.u32 2147483648, %v2920_v4  ;;  %v1415_v49 = vsub.f32 %v2646_v35, %v2464_v15  ;;  %v2979_v3 = vrot.slane %v2621_v18, %v2285_v26  ;;  %v1416_v10 = vsub.f32 %v2646_v35, %v2462_v19 }
 0x135   : > { %v2063_v12 = vpop.eup %2062  ;;  %v1268_v59 = vmul.f32 %v2061_v13, %v2918_v38  ;;  %v1417_v52 = vmul.f32 %v1403_v56, %v1403_v56  ;;  %v1418_v28 = vmul.f32 %v1404_v9, %v1404_v9  ;;  %v1419_v45 = vmul.f32 %v1409_v16, %v1409_v16  ;;  %v3011_v13 = vld [vmem:[%s2269_s17 + $0x30] sm:$0xff] }
 0x136   : > { %v1275_v14 = vmul.f32 %v2063_v12, %v2920_v4  ;;  %v1420_v43 = vmul.f32 %v1410_v27, %v1410_v27  ;;  %v2984_v31 = vmax.f32 %v1203_v0, 0.0  ;;  %v2986_v46 = vmax.f32 %v1204_v34, 0.0 }
 0x137   : > { %v1270_v60 = vsel %vm1269_vm9, %v2918_v38, %v1268_v59  ;;  %v1423_v36 = vmul.f32 %v1415_v49, %v1415_v49  ;;  %vm1349_vm13 = vcmp.eq.f32.partialorder %v2950_v57, inf  ;;  %v1421_v58 = vadd.f32 %v1419_v45, %v1417_v52 }
 0x138   : > { %3561 = vst [vmem:[#allocation12_spill] sm:$0xff] %v2984_v31  ;;  %3562 = vst [vmem:[#allocation16_spill] sm:$0xff] %v2986_v46  ;;  %v1273_v18 = vsel %vm1271_vm10, %v1272_v63, %v1270_v60  ;;  %v1277_v35 = vsel %vm1276_vm11, %v2920_v4, %v1275_v14  ;;  %v1422_v16 = vadd.f32 %v1420_v43, %v1418_v28  ;;  %vm1351_vm14 = vcmp.eq.f32.partialorder %v2950_v57, 0.0  ;;  %v3563_v28 = vld [vmem:[#allocation25_spill] sm:$0xff] }
 0x139   : > { %v1280_v56 = vsel %vm1278_vm12, %v1279_v37, %v1277_v35  ;;  %v1281_v9 = vmul.f32 8.333333, %v1273_v18  ;;  %v1424_v27 = vmul.f32 %v1416_v10, %v1416_v10  ;;  %v1352_v38 = vand.u32 2147483648, %v2950_v57 }
 0x13a   : > { %v1282_v1 = vmul.f32 8.333333, %v1280_v56  ;;  %v3001_v63 = vadd.f32 %v1423_v36, %v1421_v58  ;;  %v1211_v47 = vmul.f32 %v2515_v2, %v2984_v31  ;;  %v1212_v0 = vmul.f32 %v2515_v2, %v2986_v46 }
 0x13b   : > { %vm1356_vm15 = vcmp.eq.f32.partialorder %v2953_v51, inf  ;;  %v3008_v4 = vadd.f32 %v1424_v27, %v1422_v16  ;;  %v1283_v37 = vsub.f32 1.0, %v1281_v9  ;;  %vm1358_vm0 = vcmp.eq.f32.partialorder %v2953_v51, 0.0 }
 0x13c   : > { %v2065_v34 = vpop.eup %2064  ;;  %v1359_v49 = vand.u32 2147483648, %v2953_v51  ;;  %2068 = vrsqrt.f32 %v3001_v63  ;;  %v1213_v59 = vadd.f32 %v1211_v47, %v1133_v42  ;;  %v1214_v10 = vadd.f32 %v1212_v0, %v1134_v54 }
 0x13d   : > { %v2067_v12 = vpop.eup %2066  ;;  %v1348_v52 = vmul.f32 %v2065_v34, %v2950_v57  ;;  %2070 = vrsqrt.f32 %v3008_v4  ;;  %v1284_v2 = vsub.f32 1.0, %v1282_v1  ;;  %v1483_v45 = vsub.f32 %v3563_v28, %v2393_v8 }
 0x13e   : > { %v1355_v14 = vmul.f32 %v2067_v12, %v2953_v51  ;;  %v1484_v43 = vsub.f32 %v3563_v28, %v2436_v53  ;;  %v3028_v42 = vrot.slane %v3011_v13, %v2279_v23  ;;  %v1489_v54 = vsub.f32 %v2654_v44, %v2391_v7 }
 0x13f   : > { %v1350_v60 = vsel %vm1349_vm13, %v2950_v57, %v1348_v52  ;;  %v1490_v36 = vsub.f32 %v2654_v44, %v2434_v39  ;;  %v3034_v18 = vmax.f32 %v1283_v37, 0.0  ;;  %vm1429_vm1 = vcmp.eq.f32.partialorder %v3001_v63, inf }
 0x140   : > { %v1353_v35 = vsel %vm1351_vm14, %v1352_v38, %v1350_v60  ;;  %v1357_v58 = vsel %vm1356_vm15, %v2953_v51, %v1355_v14  ;;  %v1495_v56 = vsub.f32 %v2669_v5, %v2464_v15  ;;  %vm1431_vm2 = vcmp.eq.f32.partialorder %v3001_v63, 0.0 }
 0x141   : > { %3564 = vst [vmem:[#allocation20_spill] sm:$0xff] %v3034_v18  ;;  %v1360_v9 = vsel %vm1358_vm0, %v1359_v49, %v1357_v58  ;;  %v1361_v16 = vmul.f32 8.333333, %v1353_v35  ;;  %v1432_v44 = vand.u32 2147483648, %v3001_v63  ;;  %v1496_v57 = vsub.f32 %v2669_v5, %v2462_v19 }
 0x142   : > { %v3050_v27 = vmax.f32 %v1284_v2, 0.0  ;;  %v1362_v1 = vmul.f32 8.333333, %v1360_v9  ;;  %v1497_v38 = vmul.f32 %v1483_v45, %v1483_v45  ;;  %v1498_v47 = vmul.f32 %v1484_v43, %v1484_v43 }
 0x143   : > { %v1363_v0 = vsub.f32 1.0, %v1361_v16  ;;  %v1499_v34 = vmul.f32 %v1489_v54, %v1489_v54  ;;  %v1500_v37 = vmul.f32 %v1490_v36, %v1490_v36  ;;  %v1503_v12 = vmul.f32 %v1495_v56, %v1495_v56 }
 0x144   : > { %v1291_v51 = vmul.f32 %v2650_v55, %v3034_v18  ;;  %v1364_v49 = vsub.f32 1.0, %v1362_v1  ;;  %vm1436_vm3 = vcmp.eq.f32.partialorder %v3008_v4, inf  ;;  %v1504_v52 = vmul.f32 %v1496_v57, %v1496_v57 }
 0x145   : > { %v3055_v14 = vmax.f32 %v1363_v0, 0.0  ;;  %vm1438_vm4 = vcmp.eq.f32.partialorder %v3008_v4, 0.0  ;;  %v1501_v5 = vadd.f32 %v1499_v34, %v1497_v38  ;;  %v1502_v2 = vadd.f32 %v1500_v37, %v1498_v47 }
 0x146   : > { %v2069_v28 = vpop.eup %2068  ;;  %v1292_v45 = vmul.f32 %v2650_v55, %v3050_v27  ;;  %v1293_v43 = vadd.f32 %v1291_v51, %v1213_v59  ;;  %v1439_v60 = vand.u32 2147483648, %v3008_v4  ;;  %v1574_v54 = vrot.slane %v2618_v40, %v2285_v26 }
 0x147   : > { %3565 = vst [vmem:[#allocation14_spill] sm:$0xff] %v3055_v14  ;;  %v2071_v36 = vpop.eup %2070  ;;  %v1428_v35 = vmul.f32 %v2069_v28, %v3001_v63  ;;  %v3064_v58 = vadd.f32 %v1503_v12, %v1501_v5  ;;  %v3066_v56 = vadd.f32 %v1504_v52, %v1502_v2  ;;  %v1563_v9 = vsub.f32 %v2658_v11, %v2393_v8 }
 0x148   : > { %v3070_v16 = vmax.f32 %v1364_v49, 0.0  ;;  %v1435_v55 = vmul.f32 %v2071_v36, %v3008_v4  ;;  %v1564_v59 = vsub.f32 %v2658_v11, %v2436_v53  ;;  %v1569_v57 = vsub.f32 %v2673_v33, %v2391_v7 }
 0x149   : > { %v1371_v1 = vmul.f32 %v2979_v3, %v3055_v14  ;;  %v1430_v38 = vsel %vm1429_vm1, %v3001_v63, %v1428_v35  ;;  %2072 = vrsqrt.f32 %v3064_v58  ;;  %v1570_v47 = vsub.f32 %v2673_v33, %v2434_v39 }
 0x14a   : > { %3566 = vst [vmem:[#allocation17_spill] sm:$0xff] %v3070_v16  ;;  %v1433_v0 = vsel %vm1431_vm2, %v1432_v44, %v1430_v38  ;;  %v1437_v11 = vsel %vm1436_vm3, %v3008_v4, %v1435_v55  ;;  %v1575_v34 = vsub.f32 %v1574_v54, %v2464_v15  ;;  %v1576_v37 = vsub.f32 %v1574_v54, %v2462_v19 }
 0x14b   : > { %v1294_v12 = vadd.f32 %v1292_v45, %v1214_v10  ;;  %v1440_v51 = vsel %vm1438_vm4, %v1439_v60, %v1437_v11  ;;  %v1441_v49 = vmul.f32 8.333333, %v1433_v0  ;;  %2074 = vrsqrt.f32 %v3066_v56  ;;  %v3117_v11 = vld [vmem:[%s2269_s17 + $0x38] sm:$0xff] }
 0x14c   : > { %v1372_v33 = vmul.f32 %v2979_v3, %v3070_v16  ;;  %v1373_v63 = vadd.f32 %v1371_v1, %v1293_v43  ;;  %v1442_v44 = vmul.f32 8.333333, %v1440_v51  ;;  %v3099_v52 = vrot.slane %v3011_v13, %v2285_v26  ;;  %v3567_v43 = vld [vmem:[#allocation8_spill] sm:$0xff] }
 0x14d   : > { %v1443_v5 = vsub.f32 1.0, %v1441_v49  ;;  %v1577_v2 = vmul.f32 %v1563_v9, %v1563_v9  ;;  %v1578_v28 = vmul.f32 %v1564_v59, %v1564_v59  ;;  %v1579_v54 = vmul.f32 %v1569_v57, %v1569_v57 }
 0x14e   : > { %v1444_v10 = vsub.f32 1.0, %v1442_v44  ;;  %v1580_v4 = vmul.f32 %v1570_v47, %v1570_v47  ;;  %v1583_v45 = vmul.f32 %v1575_v34, %v1575_v34  ;;  %v1584_v60 = vmul.f32 %v1576_v37, %v1576_v37  ;;  %v3568_v47 = vld [vmem:[#allocation7_spill] sm:$0xff] }
 0x14f   : > { %v3101_v36 = vmax.f32 %v1443_v5, 0.0  ;;  %vm1509_vm5 = vcmp.eq.f32.partialorder %v3064_v58, inf  ;;  %v1581_v3 = vadd.f32 %v1579_v54, %v1577_v2  ;;  %v1642_v35 = vrot.slane %v2618_v40, %v3567_v43 }
 0x150   : > { %v1374_v55 = vadd.f32 %v1372_v33, %v1294_v12  ;;  %vm1511_vm6 = vcmp.eq.f32.partialorder %v3064_v58, 0.0  ;;  %v1582_v1 = vadd.f32 %v1580_v4, %v1578_v28  ;;  %v1648_v9 = vrot.slane %v2618_v40, %v2290_v29 }
 0x151   : > { %v3109_v59 = vmax.f32 %v1444_v10, 0.0  ;;  %v1512_v57 = vand.u32 2147483648, %v3064_v58  ;;  %v3112_v38 = vadd.f32 %v1583_v45, %v1581_v3  ;;  %v1654_v0 = vrot.slane %v2618_v40, %v3568_v47 }
 0x152   : > { %v1451_v34 = vmul.f32 %v3028_v42, %v3101_v36  ;;  %vm1516_vm7 = vcmp.eq.f32.partialorder %v3066_v56, inf  ;;  %v3122_v37 = vadd.f32 %v1584_v60, %v1582_v1  ;;  %v1643_v12 = vsub.f32 %v1642_v35, %v2393_v8 }
 0x153   : > { %v2073_v51 = vpop.eup %2072  ;;  %2076 = vrsqrt.f32 %v3112_v38  ;;  %v1644_v49 = vsub.f32 %v1642_v35, %v2436_v53  ;;  %v1649_v33 = vsub.f32 %v1648_v9, %v2391_v7  ;;  %v1650_v40 = vsub.f32 %v1648_v9, %v2434_v39 }
 0x154   : > { %v1508_v44 = vmul.f32 %v2073_v51, %v3064_v58  ;;  %vm1518_vm8 = vcmp.eq.f32.partialorder %v3066_v56, 0.0  ;;  %v1519_v5 = vand.u32 2147483648, %v3066_v56  ;;  %2078 = vrsqrt.f32 %v3122_v37 }
 0x155   : > { %v2075_v2 = vpop.eup %2074  ;;  %v1452_v8 = vmul.f32 %v3028_v42, %v3109_v59  ;;  %v1453_v28 = vadd.f32 %v1451_v34, %v1373_v63  ;;  %v3137_v53 = vrot.slane %v3117_v11, %v2279_v23  ;;  %v1655_v7 = vsub.f32 %v1654_v0, %v2464_v15 }
 0x156   : > { %v1510_v39 = vsel %vm1509_vm5, %v3064_v58, %v1508_v44  ;;  %v1515_v54 = vmul.f32 %v2075_v2, %v3066_v56  ;;  %v1656_v10 = vsub.f32 %v1654_v0, %v2462_v19  ;;  %v1657_v4 = vmul.f32 %v1643_v12, %v1643_v12  ;;  %v3156_v12 = vld [vmem:[%s2269_s17] sm:$0xff] }
 0x157   : > { %v1513_v45 = vsel %vm1511_vm6, %v1512_v57, %v1510_v39  ;;  %vm1589_vm9 = vcmp.eq.f32.partialorder %v3112_v38, inf  ;;  %v1658_v42 = vmul.f32 %v1644_v49, %v1644_v49  ;;  %v1659_v23 = vmul.f32 %v1649_v33, %v1649_v33 }
 0x158   : > { %v1660_v63 = vmul.f32 %v1650_v40, %v1650_v40  ;;  %v1517_v15 = vsel %vm1516_vm7, %v3066_v56, %v1515_v54  ;;  %v1521_v60 = vmul.f32 8.333333, %v1513_v45  ;;  %vm1591_vm10 = vcmp.eq.f32.partialorder %v3112_v38, 0.0 }
 0x159   : > { %v1663_v3 = vmul.f32 %v1655_v7, %v1655_v7  ;;  %v1664_v35 = vmul.f32 %v1656_v10, %v1656_v10  ;;  %v1454_v19 = vadd.f32 %v1452_v8, %v1374_v55  ;;  %v1520_v58 = vsel %vm1518_vm8, %v1519_v5, %v1517_v15  ;;  %v3177_v8 = vld [vmem:[%s2269_s17 + $0x8] sm:$0xff] }
 0x15a   : > { %v1661_v1 = vadd.f32 %v1659_v23, %v1657_v4  ;;  %v1662_v9 = vadd.f32 %v1660_v63, %v1658_v42  ;;  %v1522_v57 = vmul.f32 8.333333, %v1520_v58  ;;  %v1523_v0 = vsub.f32 1.0, %v1521_v60 }
 0x15b   : > { %v1592_v34 = vand.u32 2147483648, %v3112_v38  ;;  %v498_v51 = vrot.slane %v3156_v12, %v2281_v24  ;;  %vm1596_vm11 = vcmp.eq.f32.partialorder %v3122_v37, inf  ;;  %vm1598_vm12 = vcmp.eq.f32.partialorder %v3122_v37, 0.0 }
 0x15c   : > { %v3162_v55 = vadd.f32 %v1663_v3, %v1661_v1  ;;  %v3164_v56 = vadd.f32 %v1664_v35, %v1662_v9  ;;  %v1524_v49 = vsub.f32 1.0, %v1522_v57  ;;  %v3166_v33 = vmax.f32 %v1523_v0, 0.0 }
 0x15d   : > { %v1599_v40 = vand.u32 2147483648, %v3122_v37  ;;  %v578_v44 = vrot.slane %v3156_v12, %v3567_v43  ;;  %v2077_v5 = vpop.eup %2076  ;;  %v3174_v2 = vrot.slane %v3117_v11, %v2285_v26  ;;  %v658_v7 = vrot.slane %v3177_v8, %v2281_v24 }
 0x15e   : > { %3569 = vst [vmem:[#allocation18_spill] sm:$0xff] %v3166_v33  ;;  %2080 = vrsqrt.f32 %v3162_v55  ;;  %v738_v39 = vrot.slane %v3177_v8, %v3567_v43  ;;  %v2079_v54 = vpop.eup %2078  ;;  %v3183_v10 = vmax.f32 %v1524_v49, 0.0  ;;  %v1588_v4 = vmul.f32 %v2077_v5, %v3112_v38 }
 0x15f   : > { %2082 = vrsqrt.f32 %v3164_v56  ;;  %v499_v45 = vmul.f32 %v498_v51, %v2601_v22  ;;  %v1531_v26 = vmul.f32 %v3099_v52, %v3166_v33  ;;  %v1595_v42 = vmul.f32 %v2079_v54, %v3122_v37  ;;  %v3217_v54 = vld [vmem:[%s2269_s17 + $0x10] sm:$0xff] }
 0x160   : > { %v1672_v23 = vand.u32 2147483648, %v3162_v55  ;;  %v500_v63 = vmul.f32 %v498_v51, %v2605_v50  ;;  %v1532_v15 = vmul.f32 %v3099_v52, %v3183_v10  ;;  %v1590_v60 = vsel %vm1589_vm9, %v3112_v38, %v1588_v4 }
 0x161   : > { %v1679_v3 = vand.u32 2147483648, %v3164_v56  ;;  %v579_v35 = vmul.f32 %v578_v44, %v2609_v30  ;;  %v1533_v58 = vadd.f32 %v1531_v26, %v1453_v28  ;;  %v1593_v1 = vsel %vm1591_vm10, %v1592_v34, %v1590_v60  ;;  %v3224_v60 = vld [vmem:[%s2269_s17 + $0x18] sm:$0xff] }
 0x162   : > { %v1597_v9 = vsel %vm1596_vm11, %v3122_v37, %v1595_v42  ;;  %vm1669_vm13 = vcmp.eq.f32.partialorder %v3162_v55, inf  ;;  %v580_v52 = vmul.f32 %v578_v44, %v2612_v6  ;;  %v1601_v0 = vmul.f32 8.333333, %v1593_v1 }
 0x163   : > { %v1600_v57 = vsel %vm1598_vm12, %v1599_v40, %v1597_v9  ;;  %vm1671_vm14 = vcmp.eq.f32.partialorder %v3162_v55, 0.0  ;;  %vm1676_vm15 = vcmp.eq.f32.partialorder %v3164_v56, inf  ;;  %v581_v38 = vadd.f32 %v579_v35, %v499_v45 }
 0x164   : > { %v659_v28 = vmul.f32 %v658_v7, %v2625_v21  ;;  %v1602_v34 = vmul.f32 8.333333, %v1600_v57  ;;  %vm1678_vm0 = vcmp.eq.f32.partialorder %v3164_v56, 0.0  ;;  %v582_v51 = vadd.f32 %v580_v52, %v500_v63 }
 0x165   : > { %v660_v49 = vmul.f32 %v658_v7, %v2640_v48  ;;  %v739_v44 = vmul.f32 %v738_v39, %v2690_v32  ;;  %v1603_v5 = vsub.f32 1.0, %v1601_v0  ;;  %v740_v40 = vmul.f32 %v738_v39, %v2695_v41  ;;  %v3570_v0 = vld [vmem:[#allocation10_spill] sm:$0xff] }
 0x166   : > { %v661_v37 = vadd.f32 %v659_v28, %v581_v38  ;;  %v818_v4 = vrot.slane %v3217_v54, %v2281_v24  ;;  %v1604_v45 = vsub.f32 1.0, %v1602_v34  ;;  %v898_v42 = vrot.slane %v3217_v54, %v3567_v43  ;;  %v3571_v28 = vld [vmem:[#allocation9_spill] sm:$0xff] }
 0x167   : > { %v662_v26 = vadd.f32 %v660_v49, %v582_v51  ;;  %v978_v7 = vrot.slane %v3224_v60, %v2281_v24  ;;  %v1534_v63 = vadd.f32 %v1532_v15, %v1454_v19  ;;  %v3228_v35 = vmax.f32 %v1603_v5, 0.0  ;;  %v3572_v15 = vld [vmem:[#allocation11_spill] sm:$0xff] }
 0x168   : > { %v741_v1 = vadd.f32 %v739_v44, %v661_v37  ;;  %v819_v39 = vmul.f32 %v818_v4, %v2746_v61  ;;  %v2081_v9 = vpop.eup %2080  ;;  %v3231_v52 = vmax.f32 %v1604_v45, 0.0  ;;  %v820_v38 = vmul.f32 %v818_v4, %v3570_v0  ;;  %v3574_v0 = vld [vmem:[#allocation13_spill] sm:$0xff] }
 0x169   : > { %v742_v57 = vadd.f32 %v740_v40, %v662_v26  ;;  %v899_v34 = vmul.f32 %v898_v42, %v3571_v28  ;;  %v2083_v51 = vpop.eup %2082  ;;  %v1611_v49 = vmul.f32 %v3137_v53, %v3228_v35  ;;  %v1668_v47 = vmul.f32 %v2081_v9, %v3162_v55  ;;  %v3573_v40 = vld [vmem:[#allocation15_spill] sm:$0xff] }
 0x16a   : > { %v821_v19 = vadd.f32 %v819_v39, %v741_v1  ;;  %v900_v5 = vmul.f32 %v898_v42, %v3572_v15  ;;  %v1612_v44 = vmul.f32 %v3137_v53, %v3231_v52  ;;  %v1675_v37 = vmul.f32 %v2083_v51, %v3164_v56 }
 0x16b   : > { %v822_v45 = vadd.f32 %v820_v38, %v742_v57  ;;  %v979_v26 = vmul.f32 %v978_v7, %v3573_v40  ;;  %v1670_v4 = vsel %vm1669_vm13, %v3162_v55, %v1668_v47  ;;  %v980_v61 = vmul.f32 %v978_v7, %v3574_v0 }
 0x16c   : > { %v901_v28 = vadd.f32 %v899_v34, %v821_v19  ;;  %v1058_v1 = vrot.slane %v3224_v60, %v3567_v43  ;;  %v1613_v42 = vadd.f32 %v1611_v49, %v1533_v58  ;;  %v1673_v53 = vsel %vm1671_vm14, %v1672_v23, %v1670_v4  ;;  %v3259_v49 = vld [vmem:[%s2269_s17 + $0x20] sm:$0xff] }
 0x16d   : > { %v1677_v39 = vsel %vm1676_vm15, %v3164_v56, %v1675_v37  ;;  %v902_v9 = vadd.f32 %v900_v5, %v822_v45  ;;  %v1681_v47 = vmul.f32 8.333333, %v1673_v53  ;;  %v1138_v55 = vrot.slane %v3259_v49, %v2281_v24  ;;  %v3266_v56 = vld [vmem:[%s2269_s17 + $0x28] sm:$0xff] }
 0x16e   : > { %v1680_v57 = vsel %vm1678_vm0, %v1679_v3, %v1677_v39  ;;  %v981_v38 = vadd.f32 %v979_v26, %v901_v28  ;;  %v1059_v7 = vmul.f32 %v1058_v1, %v2877_v17  ;;  %v1060_v58 = vmul.f32 %v1058_v1, %v2889_v20 }
 0x16f   : > { %v1682_v34 = vmul.f32 8.333333, %v1680_v57  ;;  %v982_v51 = vadd.f32 %v980_v61, %v902_v9  ;;  %v1683_v23 = vsub.f32 1.0, %v1681_v47  ;;  %v1218_v5 = vrot.slane %v3259_v49, %v3567_v43 }
 0x170   : > { %v1061_v19 = vadd.f32 %v1059_v7, %v981_v38  ;;  %v1298_v3 = vrot.slane %v3266_v56, %v2281_v24  ;;  %v1139_v61 = vmul.f32 %v1138_v55, %v2915_v25  ;;  %v1140_v45 = vmul.f32 %v1138_v55, %v2922_v62 }
 0x171   : > { %v1684_v28 = vsub.f32 1.0, %v1682_v34  ;;  %v1062_v37 = vadd.f32 %v1060_v58, %v982_v51  ;;  %v1614_v26 = vadd.f32 %v1612_v44, %v1534_v63  ;;  %v3272_v4 = vmax.f32 %v1683_v23, 0.0 }
 0x172   : > { %v1219_v1 = vmul.f32 %v1218_v5, %v2984_v31  ;;  %v1220_v53 = vmul.f32 %v1218_v5, %v2986_v46  ;;  %v1141_v9 = vadd.f32 %v1139_v61, %v1061_v19  ;;  %v1299_v47 = vmul.f32 %v1298_v3, %v3034_v18 }
 0x173   : > { %v3276_v39 = vmax.f32 %v1684_v28, 0.0  ;;  %v1142_v57 = vadd.f32 %v1140_v45, %v1062_v37  ;;  %v1691_v38 = vmul.f32 %v3174_v2, %v3272_v4  ;;  %v1378_v7 = vrot.slane %v3266_v56, %v3567_v43 }
 0x174   : > { %v1458_v63 = vrot.slane %v3011_v13, %v2281_v24  ;;  %v1538_v44 = vrot.slane %v3011_v13, %v3567_v43  ;;  %v1221_v51 = vadd.f32 %v1219_v1, %v1141_v9  ;;  %v1300_v55 = vmul.f32 %v1298_v3, %v3050_v27 }
 0x175   : > { %v1692_v34 = vmul.f32 %v3174_v2, %v3276_v39  ;;  %v1222_v58 = vadd.f32 %v1220_v53, %v1142_v57  ;;  %v1693_v23 = vadd.f32 %v1691_v38, %v1613_v42  ;;  %v1379_v19 = vmul.f32 %v1378_v7, %v3055_v14 }
 0x176   : > { %v1618_v5 = vrot.slane %v3117_v11, %v2281_v24  ;;  %v1301_v37 = vadd.f32 %v1299_v47, %v1221_v51  ;;  %v1380_v45 = vmul.f32 %v1378_v7, %v3070_v16  ;;  %v1459_v18 = vmul.f32 %v1458_v63, %v3101_v36 }
 0x177   : > { %v1694_v28 = vadd.f32 %v1692_v34, %v1614_v26  ;;  %v1302_v61 = vadd.f32 %v1300_v55, %v1222_v58  ;;  %v1460_v46 = vmul.f32 %v1458_v63, %v3109_v59  ;;  %v1539_v2 = vmul.f32 %v1538_v44, %v3166_v33  ;;  %v3575_v26 = vld [vmem:[#allocation6_spill] sm:$0xff] }
 0x178   : > { %v1540_v1 = vmul.f32 %v1538_v44, %v3183_v10  ;;  %v1381_v42 = vadd.f32 %v1379_v19, %v1301_v37  ;;  %v1698_v9 = vrot.slane %v3117_v11, %v3567_v43  ;;  %v1619_v24 = vmul.f32 %v1618_v5, %v3228_v35 }
 0x179   : > { %v1721_v3 = vpack.c.bf16 %v1694_v28, %v1693_v23  ;;  %v1382_v53 = vadd.f32 %v1380_v45, %v1302_v61  ;;  %v506_v57 = vrot.slane %v3156_v12, %v3575_v26  ;;  %v586_v47 = vrot.slane %v3156_v12, %v2290_v29 }
 0x17a   : > { %v666_v38 = vrot.slane %v3177_v8, %v3575_v26  ;;  %v1461_v7 = vadd.f32 %v1459_v18, %v1381_v42  ;;  %v1620_v44 = vmul.f32 %v1618_v5, %v3231_v52  ;;  %v746_v34 = vrot.slane %v3177_v8, %v2290_v29 }
 0x17b   : > { %1938 = vmatpush3.bf16.msra.mxu0 %v1721_v3  ;;  %v1462_v63 = vadd.f32 %v1460_v46, %v1382_v53  ;;  %v3576_v43 = vmov 0.0   ;;  %v507_v51 = vmul.f32 %v506_v57, %v2601_v22  ;;  %v508_v58 = vmul.f32 %v506_v57, %v2605_v50 }
 0x17c   : > { %1939 = vmatprep.subr.bf16.mxu0 %v3576_v43  ;;  %v587_v55 = vmul.f32 %v586_v47, %v2609_v30  ;;  %v588_v23 = vmul.f32 %v586_v47, %v2612_v6  ;;  %v1541_v19 = vadd.f32 %v1539_v2, %v1461_v7  ;;  %v1699_v18 = vmul.f32 %v1698_v9, %v3272_v4 }
 0x17d   : > { %v1542_v28 = vadd.f32 %v1540_v1, %v1462_v63  ;;  %v1700_v46 = vmul.f32 %v1698_v9, %v3276_v39  ;;  %v667_v61 = vmul.f32 %v666_v38, %v2625_v21  ;;  %v668_v45 = vmul.f32 %v666_v38, %v2640_v48 }
 0x17e   : > { %v589_v5 = vadd.f32 %v587_v55, %v507_v51  ;;  %v590_v37 = vadd.f32 %v588_v23, %v508_v58  ;;  %v1621_v3 = vadd.f32 %v1619_v24, %v1541_v19  ;;  %v747_v53 = vmul.f32 %v746_v34, %v2690_v32  ;;  %v3578_v55 = vld [vmem:[#allocation10_spill] sm:$0xff] }
 0x17f   : > { %v1622_v42 = vadd.f32 %v1620_v44, %v1542_v28  ;;  %v826_v57 = vrot.slane %v3217_v54, %v3575_v26  ;;  %v748_v1 = vmul.f32 %v746_v34, %v2695_v41  ;;  %v906_v9 = vrot.slane %v3217_v54, %v2290_v29  ;;  %v3577_v44 = vld [vmem:[#allocation26_spill] sm:$0xff] }
 0x180   : > { %v669_v47 = vadd.f32 %v667_v61, %v589_v5  ;;  %v670_v2 = vadd.f32 %v668_v45, %v590_v37  ;;  %v1701_v7 = vadd.f32 %v1699_v18, %v1621_v3  ;;  %v986_v51 = vrot.slane %v3224_v60, %v3575_v26  ;;  %v3579_v37 = vld [vmem:[#allocation9_spill] sm:$0xff] }
 0x181   : > { %v1702_v63 = vadd.f32 %v1700_v46, %v1622_v42  ;;  %v827_v58 = vmul.f32 %v826_v57, %v3577_v44  ;;  %v828_v23 = vmul.f32 %v826_v57, %v3578_v55  ;;  %v1066_v28 = vrot.slane %v3224_v60, %v2290_v29 }
 0x182   : > { %v749_v38 = vadd.f32 %v747_v53, %v669_v47  ;;  %v750_v24 = vadd.f32 %v748_v1, %v670_v2  ;;  %v907_v61 = vmul.f32 %v906_v9, %v3579_v37  ;;  %v908_v18 = vmul.f32 %v906_v9, %v3572_v15 }
 0x183   : > { %v1722_v19 = vpack.c.bf16 %v1702_v63, %v1701_v7  ;;  %v987_v46 = vmul.f32 %v986_v51, %v3573_v40  ;;  %v1146_v45 = vrot.slane %v3259_v49, %v3575_v26  ;;  %v1226_v3 = vrot.slane %v3259_v49, %v2290_v29 }
 0x184   : > { %v829_v5 = vadd.f32 %v827_v58, %v749_v38  ;;  %v830_v34 = vadd.f32 %v828_v23, %v750_v24  ;;  %v988_v57 = vmul.f32 %v986_v51, %v3574_v0  ;;  %v1306_v47 = vrot.slane %v3266_v56, %v3575_v26  ;;  %v3580_v23 = vld [vmem:[#allocation16_spill] sm:$0xff] }
 0x185   : > { %1940 = vmatpush3.bf16.msra.mxu0 %v1722_v19  ;;  %v1067_v2 = vmul.f32 %v1066_v28, %v2877_v17  ;;  %v1386_v1 = vrot.slane %v3266_v56, %v2290_v29  ;;  %v1068_v63 = vmul.f32 %v1066_v28, %v2889_v20  ;;  %v1466_v38 = vrot.slane %v3011_v13, %v3575_v26 }
 0x186   : > { %1941 = vmatprep.subr.bf16.mxu0 %v3576_v43  ;;  %v909_v42 = vadd.f32 %v907_v61, %v829_v5  ;;  %v910_v53 = vadd.f32 %v908_v18, %v830_v34  ;;  %v1147_v24 = vmul.f32 %v1146_v45, %v2915_v25  ;;  %v1148_v58 = vmul.f32 %v1146_v45, %v2922_v62  ;;  %v3581_v61 = vld [vmem:[#allocation20_spill] sm:$0xff]  ;;  %v3582_v43 = vld [vmem:[#allocation5_spill] sm:$0xff] }
 0x187   : > { %v1227_v51 = vmul.f32 %v1226_v3, %v2984_v31  ;;  %v1228_v19 = vmul.f32 %v1226_v3, %v3580_v23  ;;  %v1307_v18 = vmul.f32 %v1306_v47, %v3581_v61  ;;  %v1308_v28 = vmul.f32 %v1306_v47, %v3050_v27 }
 0x188   : > { %v989_v9 = vadd.f32 %v987_v46, %v909_v42  ;;  %v990_v7 = vadd.f32 %v988_v57, %v910_v53  ;;  %v514_v46 = vrot.slane %v3156_v12, %v3582_v43  ;;  %v1387_v42 = vmul.f32 %v1386_v1, %v3055_v14 }
 0x189   : > { %v1388_v53 = vmul.f32 %v1386_v1, %v3070_v16  ;;  %v1546_v45 = vrot.slane %v3011_v13, %v2290_v29  ;;  %v1467_v3 = vmul.f32 %v1466_v38, %v3101_v36  ;;  %v674_v14 = vrot.slane %v3177_v8, %v3582_v43 }
 0x18a   : > { %v1069_v5 = vadd.f32 %v1067_v2, %v989_v9  ;;  %v1070_v34 = vadd.f32 %v1068_v63, %v990_v7  ;;  %v1468_v2 = vmul.f32 %v1466_v38, %v3109_v59  ;;  %v515_v9 = vmul.f32 %v514_v46, %v2601_v22  ;;  %v3583_v63 = vld [vmem:[#allocation7_spill] sm:$0xff] }
 0x18b   : > { %v516_v7 = vmul.f32 %v514_v46, %v2605_v50  ;;  %v594_v47 = vrot.slane %v3156_v12, %v3583_v63  ;;  %v1547_v38 = vmul.f32 %v1546_v45, %v3166_v33  ;;  %v1706_v22 = vrot.slane %v3117_v11, %v2290_v29 }
 0x18c   : > { %v1149_v57 = vadd.f32 %v1147_v24, %v1069_v5  ;;  %v1150_v31 = vadd.f32 %v1148_v58, %v1070_v34  ;;  %v1626_v24 = vrot.slane %v3117_v11, %v3575_v26  ;;  %v754_v58 = vrot.slane %v3177_v8, %v3583_v63 }
 0x18d   : > { %v595_v50 = vmul.f32 %v594_v47, %v2609_v30  ;;  %v596_v12 = vmul.f32 %v594_v47, %v2612_v6  ;;  %v675_v8 = vmul.f32 %v674_v14, %v2625_v21  ;;  %v676_v46 = vmul.f32 %v674_v14, %v2640_v48 }
 0x18e   : > { %v1229_v1 = vadd.f32 %v1227_v51, %v1149_v57  ;;  %v1230_v16 = vadd.f32 %v1228_v19, %v1150_v31  ;;  %v1548_v51 = vmul.f32 %v1546_v45, %v3183_v10  ;;  %v834_v31 = vrot.slane %v3217_v54, %v3582_v43 }
 0x18f   : > { %v597_v26 = vadd.f32 %v595_v50, %v515_v9  ;;  %v598_v19 = vadd.f32 %v596_v12, %v516_v7  ;;  %v1627_v29 = vmul.f32 %v1626_v24, %v3228_v35  ;;  %v755_v30 = vmul.f32 %v754_v58, %v2690_v32 }
 0x190   : > { %v1309_v5 = vadd.f32 %v1307_v18, %v1229_v1  ;;  %v1310_v34 = vadd.f32 %v1308_v28, %v1230_v16  ;;  %v756_v16 = vmul.f32 %v754_v58, %v2695_v41  ;;  %v914_v28 = vrot.slane %v3217_v54, %v3583_v63 }
 0x191   : > { %v677_v6 = vadd.f32 %v675_v8, %v597_v26  ;;  %v678_v18 = vadd.f32 %v676_v46, %v598_v19  ;;  %v1628_v7 = vmul.f32 %v1626_v24, %v3231_v52  ;;  %v835_v21 = vmul.f32 %v834_v31, %v3577_v44 }
 0x192   : > { %v1389_v57 = vadd.f32 %v1387_v42, %v1309_v5  ;;  %v1390_v33 = vadd.f32 %v1388_v53, %v1310_v34  ;;  %v836_v42 = vmul.f32 %v834_v31, %v3578_v55  ;;  %v994_v32 = vrot.slane %v3224_v60, %v3582_v43 }
 0x193   : > { %v757_v48 = vadd.f32 %v755_v30, %v677_v6  ;;  %v758_v14 = vadd.f32 %v756_v16, %v678_v18  ;;  %v1707_v41 = vmul.f32 %v1706_v22, %v3272_v4  ;;  %v1074_v54 = vrot.slane %v3224_v60, %v3583_v63  ;;  %v3585_v30 = vld [vmem:[#allocation12_spill] sm:$0xff] }
 0x194   : > { %v1469_v45 = vadd.f32 %v1467_v3, %v1389_v57  ;;  %v1470_v9 = vadd.f32 %v1468_v2, %v1390_v33  ;;  %v915_v2 = vmul.f32 %v914_v28, %v3579_v37  ;;  %v916_v44 = vmul.f32 %v914_v28, %v3572_v15  ;;  %v3586_v28 = vld [vmem:[#allocation14_spill] sm:$0xff] }
 0x195   : > { %v837_v3 = vadd.f32 %v835_v21, %v757_v48  ;;  %v838_v33 = vadd.f32 %v836_v42, %v758_v14  ;;  %v1708_v55 = vmul.f32 %v1706_v22, %v3276_v39  ;;  %v1154_v58 = vrot.slane %v3259_v49, %v3582_v43  ;;  %v3587_v21 = vld [vmem:[#allocation17_spill] sm:$0xff] }
 0x196   : > { %v1549_v53 = vadd.f32 %v1547_v38, %v1469_v45  ;;  %v1550_v47 = vadd.f32 %v1548_v51, %v1470_v9  ;;  %v995_v12 = vmul.f32 %v994_v32, %v3573_v40  ;;  %v996_v5 = vmul.f32 %v994_v32, %v3574_v0 }
 0x197   : > { %v917_v38 = vadd.f32 %v915_v2, %v837_v3  ;;  %v918_v50 = vadd.f32 %v916_v44, %v838_v33  ;;  %v1075_v51 = vmul.f32 %v1074_v54, %v2877_v17  ;;  %v1076_v15 = vmul.f32 %v1074_v54, %v2889_v20  ;;  %v3588_v54 = vld [vmem:[#allocation18_spill] sm:$0xff] }
 0x198   : > { %v1629_v1 = vadd.f32 %v1627_v29, %v1549_v53  ;;  %v1630_v24 = vadd.f32 %v1628_v7, %v1550_v47  ;;  %v1234_v22 = vrot.slane %v3259_v49, %v3583_v63  ;;  %v1155_v19 = vmul.f32 %v1154_v58, %v2915_v25 }
 0x199   : > { %v997_v37 = vadd.f32 %v995_v12, %v917_v38  ;;  %v998_v31 = vadd.f32 %v996_v5, %v918_v50  ;;  %v1156_v40 = vmul.f32 %v1154_v58, %v2922_v62  ;;  %v1314_v0 = vrot.slane %v3266_v56, %v3582_v43  ;;  %v2019_v58 = vld [vmem:[%s3466_s3] sm:$0xff]  }
 0x19a   : > { %v1709_v60 = vadd.f32 %v1707_v41, %v1629_v1  ;;  %v1710_v34 = vadd.f32 %v1708_v55, %v1630_v24  ;;  %v1394_v17 = vrot.slane %v3266_v56, %v3583_v63  ;;  %v3584_v57 = vmov 0.0  }
 0x19b   : > { %v1077_v8 = vadd.f32 %v1075_v51, %v997_v37  ;;  %v1078_v46 = vadd.f32 %v1076_v15, %v998_v31  ;;  %v1235_v49 = vmul.f32 %v1234_v22, %v3585_v30  ;;  %v1236_v6 = vmul.f32 %v1234_v22, %v3580_v23  ;;  %v1793_v37 = vld [vmem:[#allocation2] sm:$0xff]  ;;  %v1794_v15 = vld [vmem:[#allocation2 + $0x8] sm:$0xff] }
 0x19c   : > { %v1723_v26 = vpack.c.bf16 %v1710_v34, %v1709_v60  ;;  %v1474_v25 = vrot.slane %v3011_v13, %v3582_v43  ;;  %vm2151_vm1 = vmmov 0   ;;  %v1315_v16 = vmul.f32 %v1314_v0, %v3581_v61 }
 0x19d   : > { %v1157_v20 = vadd.f32 %v1155_v19, %v1077_v8  ;;  %v1158_v29 = vadd.f32 %v1156_v40, %v1078_v46  ;;  %1945 = vmatprep.mubr.msk.bf16.mxu0 %vm2151_vm1, %v3584_v57  ;;  %v1316_v56 = vmul.f32 %v1314_v0, %v3050_v27  ;;  %v1395_v45 = vmul.f32 %v1394_v17, %v3586_v28 }
 0x19e   : > { %1942 = vmatpush3.bf16.msra.mxu0 %v1723_v26  ;;  %v1396_v48 = vmul.f32 %v1394_v17, %v3587_v21  ;;  %v1554_v23 = vrot.slane %v3011_v13, %v3583_v63  ;;  %v1475_v14 = vmul.f32 %v1474_v25, %v3101_v36  ;;  %v1476_v53 = vmul.f32 %v1474_v25, %v3109_v59 }
 0x19f   : > { %1943 = vmatprep.subr.bf16.mxu0 %v3584_v57  ;;  %v1237_v62 = vadd.f32 %v1235_v49, %v1157_v20  ;;  %v1238_v18 = vadd.f32 %v1236_v6, %v1158_v29  ;;  %v1634_v61 = vrot.slane %v3117_v11, %v3582_v43  ;;  %v1714_v27 = vrot.slane %v3117_v11, %v3583_v63 }
 0x1a0   : > { %v1555_v3 = vmul.f32 %v1554_v23, %v3588_v54  ;;  %v1556_v33 = vmul.f32 %v1554_v23, %v3183_v10  ;;  %vm1742_vm2 = vcmask 523264   ;;  %vm1801_vm5 = vcmask 7168  }
 0x1a1   : > { %v1317_v9 = vadd.f32 %v1315_v16, %v1237_v62  ;;  %v1318_v7 = vadd.f32 %v1316_v56, %v1238_v18  ;;  %v1635_v36 = vmul.f32 %v1634_v61, %v3228_v35  ;;  %v1636_v44 = vmul.f32 %v1634_v61, %v3231_v52 }
 0x1a2   : > { %v1715_v24 = vmul.f32 %v1714_v27, %v3272_v4  ;;  %v1716_v43 = vmul.f32 %v1714_v27, %v3276_v39 }
 0x1a3   : > { %v1397_v42 = vadd.f32 %v1395_v45, %v1317_v9  ;;  %v1398_v32 = vadd.f32 %v1396_v48, %v1318_v7 }
 0x1a5   : > { %v1477_v47 = vadd.f32 %v1475_v14, %v1397_v42  ;;  %v1478_v41 = vadd.f32 %v1476_v53, %v1398_v32 }
 0x1a7   : > { %v1557_v2 = vadd.f32 %v1555_v3, %v1477_v47  ;;  %v1558_v13 = vadd.f32 %v1556_v33, %v1478_v41 }
 0x1a9   : > { %v1637_v1 = vadd.f32 %v1635_v36, %v1557_v2  ;;  %v1638_v59 = vadd.f32 %v1636_v44, %v1558_v13 }
 0x1ab   : > { %v1717_v55 = vadd.f32 %v1715_v24, %v1637_v1  ;;  %v1718_v11 = vadd.f32 %v1716_v43, %v1638_v59 }
 0x1ad   : > { %v1724_v63 = vpack.c.bf16 %v1718_v11, %v1717_v55  ;;  %v1730_v10 = vpop.permute.xlu1 %1729  ;;  %v1735_v38 = vpop.permute.xlu0 %1734 }
 0x1af   : > { %1944 = vmatpush3.bf16.msra.mxu0 %v1724_v63 }
 0x1b2   : > { %1946 = vmatmul.mubr.msk.bf16.vlgmr.msra.gmra.mrb[0].mxu0 %vm1742_vm2, %v2019_v58 }
 0x285   : > { %v1780_v35 = vpop.f32.mrb[0].mxu0 }
 0x286   : > { %v1781_v52 = vadd.f32 %v1780_v35, %v1730_v10  ;;  %v1947_v50 = vpop.f32.mrb[1].mxu0 }
 0x287   : > { %v1783_v12 = vpop.f32.mrb[2].mxu0 }
 0x288   : > { %v1784_v5 = vadd.f32 %v1783_v12, %v1735_v38  ;;  %v1948_v4 = vpop.f32.mrb[3].mxu0  ;;  %vm1787_vm3 = vcmp.ge.f32.partialorder %v1781_v52, 0.0  ;;  %v1789_v39 = vmul.f32 0.1, %v1781_v52 }
 0x28a   : > { %v1791_v60 = vsel %vm1787_vm3, %v1781_v52, %v1789_v39  ;;  %vm1788_vm4 = vcmp.ge.f32.partialorder %v1784_v5, 0.0  ;;  %v1790_v34 = vmul.f32 0.1, %v1784_v5 }
 0x28b   : > { %1795 = vadd.xlane.f32.xlu1 %v1791_v60 }
 0x28c   : > { %v1792_v51 = vsel %vm1788_vm4, %v1784_v5, %v1790_v34 }
 0x28d   : > { %1797 = vadd.xlane.f32.xlu0 %v1792_v51 }
 0x317   : > { %1807 = sbr.rel (%p1928_p12) target bundleno = 808 (0x328), region = 124 }
 0x318   : > { %v1796_v31 = vpop.xlane.xlu1 %1795 }
 0x319   : > { %v1799_v22 = vadd.f32 %v1796_v31, %v1793_v37 }
 0x31a   : > { %v1798_v26 = vpop.xlane.xlu0 %1797 }
 0x31b   : > { %1802 = vst.msk [vmem:[#allocation2] sm:$0xff] %vm1801_vm5, %v1799_v22  ;;  %v1800_v19 = vadd.f32 %v1798_v26, %v1794_v15 }
 0x31d   : > { %1803 = vst.msk [vmem:[#allocation2 + $0x8] sm:$0xff] %vm1801_vm5, %v1800_v19 }
 0x322   : > { %v1808_v8 = vld [vmem:[#allocation2] sm:$0xff] }
 0x323   : > { %v1810_v40 = vmul.f32 0.001953125, %v1808_v8 }
 0x324   : > { %v1809_v46 = vld [vmem:[#allocation2 + $0x8] sm:$0xff] }
 0x325   : > { %v1811_v0 = vmul.f32 0.001953125, %v1809_v46  ;;  %1812 = vst.msk [vmem:[%s2265_s15] sm:$0xff] %vm1801_vm5, %v1810_v40 }
 0x327   : > { %1813 = vst.msk [vmem:[%s2265_s15 + $0x8] sm:$0xff] %vm1801_vm5, %v1811_v0 }
 0x328 PF: > { %s15_s24 = sadd.s32 1, %s2144_s24   ;;  %s3589_s18 = smov %s2124_s19 }
 0x329   : > { %p12_p13 = scmp.ge.s32.totalorder %s15_s24, 10   ;;  %s3590_s19 = smov %s2240_s9 }
 0x32a   : > { %s3591_s20 = smov %s2136_s22  ;;  %s3592_s21 = smov %s2140_s23 }
 0x32b   : > { %s3593_s22 = smov %s3596_s25  ;;  %s3594_s23 = smov %s3600_s26 }
 0x32c   :  { %14 = sbr.rel (!%p12_p13) target bundleno = 4 (0x4), region = 167 }

// kernel: forward.3
= control target key start
LH: loop header
LB: loop body
LE: loop exit
PB: predicated region body
PF: predicated region fallthrough
CT: control target
= control target key end

     0   :  { %v1267_v6 = vmov 0   ;;  %vm114_vm0 = vcmask 130048   ;;  %s1566_s0 = inlined_call_operand.vmem [shape: f32[2,16], index: 0, kind: input, shape index: {}]   ;;  %s1567_s1 = inlined_call_operand.vmem [shape: bf16[16,1024], index: 1, kind: input, shape index: {}]   ;;  %s1568_s2 = inlined_call_operand.vmem [shape: f32[1,1024], index: 2, kind: input, shape index: {}]   ;;  %s1569_s3 = inlined_call_operand.vmem [shape: bf16[1024,8], index: 3, kind: input, shape index: {}]   ;;  %s1570_s4 = inlined_call_operand.vmem [shape: f32[1,8], index: 4, kind: input, shape index: {}]   ;;  %s1571_s5 = inlined_call_operand.hbm [shape: f32[2,8], index: 5, kind: output, shape index: {}]  }
   0x1   :  { %v24_v0 = vld [vmem:[%s1567_s1] sm:$0xff]  ;;  %v25_v2 = vld [vmem:[%s1567_s1 + $0x8] sm:$0xff]  ;;  %150 = vmatprep.mubr.bf16.mxu0 %v1267_v6  ;;  %191 = vmatprep.mubr.bf16.mxu1 %v1267_v6  ;;  %v26_v8 = vld [vmem:[%s1567_s1 + $0x10] sm:$0xff] }
   0x2   :  { %v28_v1 = vld [vmem:[%s1567_s1 + $0x20] sm:$0xff]  ;;  %v29_v4 = vld [vmem:[%s1567_s1 + $0x28] sm:$0xff]  ;;  %v30_v11 = vld [vmem:[%s1567_s1 + $0x30] sm:$0xff] }
   0x3   :  { %v1013_v3 = vcombine.high %v24_v0, %v28_v1  ;;  %v1012_v5 = vcombine.low %v24_v0, %v28_v1  ;;  %v22_v7 = vld [vmem:[%s1566_s0] sm:$0x3]  ;;  %v1015_v9 = vcombine.high %v25_v2, %v29_v4  ;;  %v1014_v10 = vcombine.low %v25_v2, %v29_v4  ;;  %v27_v12 = vld [vmem:[%s1567_s1 + $0x18] sm:$0xff]  ;;  %v1183_v23 = vld [vmem:[%s1569_s3 + $0x48] sm:$0xff]  }
   0x4   :  { %v31_v13 = vld [vmem:[%s1567_s1 + $0x38] sm:$0xff]  ;;  %v23_v14 = vpack.c.bf16 %v22_v7, %v22_v7  ;;  %v1017_v15 = vcombine.high %v26_v8, %v30_v11  ;;  %v1016_v17 = vcombine.low %v26_v8, %v30_v11  ;;  %v1179_v19 = vld [vmem:[%s1569_s3 + $0x40] sm:$0xff]   ;;  %v1184_v24 = vld [vmem:[%s1569_s3 + $0xc8] sm:$0xff]  }
   0x5   :  { %118 = vmatprep.subr.bf16.mxu0 %v1013_v3  ;;  %v1019_v16 = vcombine.high %v27_v12, %v31_v13  ;;  %159 = vmatprep.subr.bf16.mxu1 %v1015_v9  ;;  %v1018_v18 = vcombine.low %v27_v12, %v31_v13  ;;  %v1180_v20 = vld [vmem:[%s1569_s3 + $0xc0] sm:$0xff]   ;;  %v1185_v25 = vld [vmem:[%s1569_s3 + $0x8] sm:$0xff]   ;;  %v1187_v27 = vld [vmem:[%s1569_s3 + $0x50] sm:$0xff]  }
   0x6   :  { %119 = vmatpush1.bf16.msra.mxu0 %v1012_v5  ;;  %160 = vmatpush1.bf16.msra.mxu1 %v1014_v10  ;;  %v1181_v21 = vld [vmem:[%s1569_s3] sm:$0xff]   ;;  %v1186_v26 = vld [vmem:[%s1569_s3 + $0x88] sm:$0xff]   ;;  %v1188_v28 = vld [vmem:[%s1569_s3 + $0xd0] sm:$0xff]  }
   0x7   :  { %200 = vmatprep.subr.bf16.mxu0 %v1017_v15  ;;  %241 = vmatprep.subr.bf16.mxu1 %v1019_v16  ;;  %v1182_v22 = vld [vmem:[%s1569_s3 + $0x80] sm:$0xff]   ;;  %v1189_v29 = vld [vmem:[%s1569_s3 + $0x10] sm:$0xff]   ;;  %v1191_v31 = vld [vmem:[%s1569_s3 + $0x58] sm:$0xff]  }
   0x8   :  { %v1190_v30 = vld [vmem:[%s1569_s3 + $0x90] sm:$0xff]   ;;  %v1192_v32 = vld [vmem:[%s1569_s3 + $0xd8] sm:$0xff]   ;;  %v1195_v35 = vld [vmem:[%s1569_s3 + $0x60] sm:$0xff]  }
   0x9   :  { %1020 = vmatmul.mubr.msk.bf16.vlgmr.msra.gmra.mrb[0].mxu0 %vm114_vm0, %v23_v14  ;;  %1021 = vmatmul.mubr.msk.bf16.vlgmr.msra.gmra.mrb[0].mxu1 %vm114_vm0, %v23_v14  ;;  %v1193_v33 = vld [vmem:[%s1569_s3 + $0x18] sm:$0xff]   ;;  %v1196_v36 = vld [vmem:[%s1569_s3 + $0xe0] sm:$0xff]   ;;  %v1199_v39 = vld [vmem:[%s1569_s3 + $0x68] sm:$0xff]  }
   0xa   :  { %201 = vmatpush1.bf16.msra.mxu0 %v1016_v17  ;;  %242 = vmatpush1.bf16.msra.mxu1 %v1018_v18  ;;  %v1194_v34 = vld [vmem:[%s1569_s3 + $0x98] sm:$0xff]   ;;  %v1197_v37 = vld [vmem:[%s1569_s3 + $0x20] sm:$0xff]   ;;  %v1200_v40 = vld [vmem:[%s1569_s3 + $0xe8] sm:$0xff]  }
   0xb   :  { %232 = vmatprep.mubr.bf16.mxu0 %v1267_v6  ;;  %273 = vmatprep.mubr.bf16.mxu1 %v1267_v6  ;;  %v1198_v38 = vld [vmem:[%s1569_s3 + $0xa0] sm:$0xff]   ;;  %v1201_v41 = vld [vmem:[%s1569_s3 + $0x28] sm:$0xff]  }
   0xc   :  { %1089 = vmatprep.subr.bf16.mxu0 %v1179_v19  ;;  %1111 = vmatprep.subr.bf16.mxu1 %v1180_v20  ;;  %v1202_v42 = vld [vmem:[%s1569_s3 + $0xa8] sm:$0xff]  }
  0x11   :  { %1022 = vmatmul.mubr.msk.bf16.vlgmr.msra.gmra.mrb[4].mxu0 %vm114_vm0, %v23_v14  ;;  %1023 = vmatmul.mubr.msk.bf16.vlgmr.msra.gmra.mrb[4].mxu1 %vm114_vm0, %v23_v14 }
  0x12   :  { %1090 = vmatpush3.bf16.msra.mxu0 %v1181_v21  ;;  %1112 = vmatpush3.bf16.msra.mxu1 %v1182_v22 }
  0x13   :  { %1091 = vmatprep.subr.bf16.mxu0 %v1183_v23  ;;  %1113 = vmatprep.subr.bf16.mxu1 %v1184_v24 }
  0x16   :  { %1092 = vmatpush3.bf16.msra.mxu0 %v1185_v25  ;;  %1114 = vmatpush3.bf16.msra.mxu1 %v1186_v26 }
  0x17   :  { %1093 = vmatprep.subr.bf16.mxu0 %v1187_v27  ;;  %1115 = vmatprep.subr.bf16.mxu1 %v1188_v28 }
  0x1a   :  { %1094 = vmatpush3.bf16.msra.mxu0 %v1189_v29  ;;  %1116 = vmatpush3.bf16.msra.mxu1 %v1190_v30 }
  0x1b   :  { %1095 = vmatprep.subr.bf16.mxu0 %v1191_v31  ;;  %1117 = vmatprep.subr.bf16.mxu1 %v1192_v32 }
  0x1e   :  { %1096 = vmatpush3.bf16.msra.mxu0 %v1193_v33  ;;  %1118 = vmatpush3.bf16.msra.mxu1 %v1194_v34 }
  0x1f   :  { %1097 = vmatprep.subr.bf16.mxu0 %v1195_v35  ;;  %1119 = vmatprep.subr.bf16.mxu1 %v1196_v36 }
  0x22   :  { %1098 = vmatpush3.bf16.msra.mxu0 %v1197_v37  ;;  %1120 = vmatpush3.bf16.msra.mxu1 %v1198_v38 }
  0x23   :  { %1099 = vmatprep.subr.bf16.mxu0 %v1199_v39  ;;  %1121 = vmatprep.subr.bf16.mxu1 %v1200_v40 }
  0x26   :  { %1100 = vmatpush3.bf16.msra.mxu0 %v1201_v41  ;;  %1122 = vmatpush3.bf16.msra.mxu1 %v1202_v42 }
  0x27   :  { %10 = vsyncpa [#allocation3], 0  ;;  %v1203_v43 = vld [vmem:[%s1569_s3 + $0x70] sm:$0xff]   ;;  %v1207_v47 = vld [vmem:[%s1569_s3 + $0x78] sm:$0xff]   ;;  %v34_v53 = vlaneseq  ;;  %vm996_vm10 = vcmask 58368  }
  0x28   :  { %v1204_v44 = vld [vmem:[%s1569_s3 + $0xf0] sm:$0xff]   ;;  %1101 = vmatprep.subr.bf16.mxu0 %v1203_v43  ;;  %v1208_v48 = vld [vmem:[%s1569_s3 + $0xf8] sm:$0xff]   ;;  %v1211_v51 = vld [vmem:[%s1569_s3 + $0x140] sm:$0xff]  }
  0x29   :  { %v1205_v45 = vld [vmem:[%s1569_s3 + $0x30] sm:$0xff]   ;;  %1123 = vmatprep.subr.bf16.mxu1 %v1204_v44  ;;  %v1209_v49 = vld [vmem:[%s1569_s3 + $0x38] sm:$0xff]   ;;  %v1212_v52 = vld [vmem:[%s1569_s3 + $0x1c0] sm:$0xff]   ;;  %v1432_v54 = vshrl.u32 %v34_v53, 7 }
  0x2a   :  { %v1206_v46 = vld [vmem:[%s1569_s3 + $0xb0] sm:$0xff]   ;;  %1102 = vmatpush3.bf16.msra.mxu0 %v1205_v45  ;;  %v1210_v50 = vld [vmem:[%s1569_s3 + $0xb8] sm:$0xff]   ;;  %v1438_v56 = vld [vmem:[%s1568_s2] sm:$0xff] }
  0x2b   :  { %1124 = vmatpush3.bf16.msra.mxu1 %v1206_v46  ;;  %1103 = vmatprep.subr.bf16.mxu0 %v1207_v47  ;;  %v36_v55 = vsub.s32 0, %v1432_v54  ;;  %v44_v57 = vsub.s32 2, %v1432_v54  ;;  %v40_v58 = vsub.s32 1, %v1432_v54  ;;  %v48_v59 = vsub.s32 3, %v1432_v54  ;;  %v1213_v24 = vld [vmem:[%s1569_s3 + $0x100] sm:$0xff]   ;;  %v1215_v29 = vld [vmem:[%s1569_s3 + $0x148] sm:$0xff]  }
  0x2c   :  { %1125 = vmatprep.subr.bf16.mxu1 %v1208_v48  ;;  %v56_v8 = vsub.s32 5, %v1432_v54  ;;  %v64_v13 = vsub.s32 7, %v1432_v54  ;;  %v1214_v28 = vld [vmem:[%s1569_s3 + $0x180] sm:$0xff]   ;;  %v1216_v32 = vld [vmem:[%s1569_s3 + $0x1c8] sm:$0xff]   ;;  %v1219_v43 = vld [vmem:[%s1569_s3 + $0x150] sm:$0xff]  }
  0x2d   :  { %v37_v60 = vrot.slane %v1438_v56, %v36_v55  ;;  %v45_v61 = vrot.slane %v1438_v56, %v44_v57  ;;  %v41_v62 = vrot.slane %v1438_v56, %v40_v58  ;;  %v49_v63 = vrot.slane %v1438_v56, %v48_v59  ;;  %v1217_v38 = vld [vmem:[%s1569_s3 + $0x108] sm:$0xff]   ;;  %v1220_v45 = vld [vmem:[%s1569_s3 + $0x1d0] sm:$0xff]   ;;  %v1223_v53 = vld [vmem:[%s1569_s3 + $0x158] sm:$0xff]  }
  0x2e   :  { %1104 = vmatpush3.bf16.msra.mxu0 %v1209_v49  ;;  %v57_v21 = vrot.slane %v1438_v56, %v56_v8  ;;  %v65_v25 = vrot.slane %v1438_v56, %v64_v13  ;;  %v1218_v42 = vld [vmem:[%s1569_s3 + $0x188] sm:$0xff]   ;;  %v1221_v49 = vld [vmem:[%s1569_s3 + $0x110] sm:$0xff]   ;;  %v1224_v57 = vld [vmem:[%s1569_s3 + $0x1d8] sm:$0xff]  }
  0x2f   :  { %1126 = vmatpush3.bf16.msra.mxu1 %v1210_v50  ;;  %1133 = vmatprep.subr.bf16.mxu0 %v1211_v51  ;;  %v1225_v58 = vld [vmem:[%s1569_s3 + $0x118] sm:$0xff]  }
  0x30   :  { %1155 = vmatprep.subr.bf16.mxu1 %v1212_v52  ;;  %v1222_v52 = vld [vmem:[%s1569_s3 + $0x190] sm:$0xff]   ;;  %v1226_v59 = vld [vmem:[%s1569_s3 + $0x198] sm:$0xff]  }
  0xdc   :  { %v152_v0 = vpop.f32.mrb[0].mxu0  ;;  %v193_v2 = vpop.f32.mrb[0].mxu1 }
  0xdd   :  { %v153_v1 = vadd.f32 %v152_v0, %v37_v60  ;;  %v154_v3 = vpop.f32.mrb[1].mxu0  ;;  %v194_v4 = vadd.f32 %v193_v2, %v45_v61  ;;  %v195_v6 = vpop.f32.mrb[1].mxu1  ;;  %v1227_v60 = vld [vmem:[%s1569_s3 + $0x160] sm:$0xff]   ;;  %v1231_v2 = vld [vmem:[%s1569_s3 + $0x168] sm:$0xff]  }
  0xde   :  { %v155_v5 = vadd.f32 %v154_v3, %v41_v62  ;;  %v156_v7 = vpop.f32.mrb[2].mxu0  ;;  %v196_v10 = vadd.f32 %v195_v6, %v49_v63  ;;  %v197_v11 = vpop.f32.mrb[2].mxu1  ;;  %v1228_v61 = vld [vmem:[%s1569_s3 + $0x1e0] sm:$0xff]   ;;  %v52_v62 = vsub.s32 4, %v1432_v54  ;;  %v60_v63 = vsub.s32 6, %v1432_v54  ;;  %v1232_v54 = vld [vmem:[%s1569_s3 + $0x1e8] sm:$0xff]  }
  0xdf   :  { %vm282_vm1 = vcmp.ge.f32.partialorder %v153_v1, 0.0  ;;  %v290_v9 = vmul.f32 0.1, %v153_v1  ;;  %v157_v12 = vpop.f32.mrb[3].mxu0  ;;  %vm284_vm2 = vcmp.ge.f32.partialorder %v194_v4, 0.0  ;;  %v198_v18 = vpop.f32.mrb[3].mxu1 }
  0xe0   :  { %v292_v14 = vmul.f32 0.1, %v194_v4  ;;  %vm283_vm3 = vcmp.ge.f32.partialorder %v155_v5, 0.0  ;;  %v291_v15 = vmul.f32 0.1, %v155_v5  ;;  %vm285_vm4 = vcmp.ge.f32.partialorder %v196_v10, 0.0 }
  0xe1   :  { %v298_v16 = vsel %vm282_vm1, %v153_v1, %v290_v9  ;;  %v293_v17 = vmul.f32 0.1, %v196_v10  ;;  %v1229_v0 = vld [vmem:[%s1569_s3 + $0x120] sm:$0xff]   ;;  %v53_v3 = vrot.slane %v1438_v56, %v52_v62  ;;  %v1234_v6 = vld [vmem:[%s1569_s3 + $0x1a8] sm:$0xff]   ;;  %v1235_v7 = vld [vmem:[%s1569_s3 + $0x170] sm:$0xff]  }
  0xe2   :  { %v300_v19 = vsel %vm284_vm2, %v194_v4, %v292_v14  ;;  %v299_v20 = vsel %vm283_vm3, %v155_v5, %v291_v15  ;;  %v306_v26 = vpack.c.bf16 %v298_v16, %v298_v16  ;;  %v1230_v1 = vld [vmem:[%s1569_s3 + $0x1a0] sm:$0xff]   ;;  %v61_v4 = vrot.slane %v1438_v56, %v60_v63  ;;  %v1233_v5 = vld [vmem:[%s1569_s3 + $0x128] sm:$0xff]   ;;  %v1236_v56 = vld [vmem:[%s1569_s3 + $0x1f0] sm:$0xff]  }
  0xe3   :  { %v307_v22 = vpack.c.bf16 %v299_v20, %v299_v20  ;;  %v301_v23 = vsel %vm285_vm4, %v196_v10, %v293_v17  ;;  %v308_v31 = vpack.c.bf16 %v300_v19, %v300_v19  ;;  %v1237_v10 = vld [vmem:[%s1569_s3 + $0x130] sm:$0xff]   ;;  %v1239_v12 = vld [vmem:[%s1569_s3 + $0x178] sm:$0xff]  }
  0xe4   :  { %v309_v27 = vpack.c.bf16 %v301_v23, %v301_v23  ;;  %v1460_v30 = vpop.f32.mrb[4].mxu0  ;;  %v1465_v34 = vpop.f32.mrb[4].mxu1  ;;  %v1238_v11 = vld [vmem:[%s1569_s3 + $0x1b0] sm:$0xff]   ;;  %v1240_v14 = vld [vmem:[%s1569_s3 + $0x1f8] sm:$0xff]  }
  0xe5   :  { %865 = vmatprep.mubr.bf16.mxu0 %v307_v22  ;;  %v236_v33 = vpop.f32.mrb[5].mxu0  ;;  %v277_v37 = vpop.f32.mrb[5].mxu1  ;;  %v235_v8 = vadd.f32 %v1460_v30, %v53_v3  ;;  %v276_v9 = vadd.f32 %v1465_v34, %v61_v4  ;;  %v1241_v16 = vld [vmem:[%s1569_s3 + $0x138] sm:$0xff]  }
  0xe6   :  { %905 = vmatprep.mubr.bf16.mxu1 %v309_v27  ;;  %866 = vmatmul.mubr.bf16.vlgmr.msra.gmra.mrb[8].mxu0 %v306_v26  ;;  %v237_v35 = vadd.f32 %v236_v33, %v57_v21  ;;  %v238_v36 = vpop.f32.mrb[6].mxu0  ;;  %v278_v40 = vadd.f32 %v277_v37, %v65_v25  ;;  %v279_v41 = vpop.f32.mrb[6].mxu1  ;;  %v1242_v17 = vld [vmem:[%s1569_s3 + $0x1b8] sm:$0xff]   ;;  %s1268_s3 = smov [#allocation2]  }
  0xe7   :  { %906 = vmatmul.mubr.bf16.vlgmr.msra.gmra.mrb[8].mxu1 %v308_v31  ;;  %1134 = vmatpush3.bf16.msra.mxu0 %v1213_v24  ;;  %v239_v39 = vpop.f32.mrb[7].mxu0  ;;  %v280_v47 = vpop.f32.mrb[7].mxu1  ;;  %v294_v13 = vmul.f32 0.1, %v235_v8  ;;  %vm286_vm7 = vcmp.ge.f32.partialorder %v235_v8, 0.0  ;;  %vm288_vm8 = vcmp.ge.f32.partialorder %v276_v9, 0.0 }
  0xe8   :  { %1156 = vmatpush3.bf16.msra.mxu1 %v1214_v28  ;;  %1135 = vmatprep.subr.bf16.mxu0 %v1215_v29  ;;  %vm287_vm5 = vcmp.ge.f32.partialorder %v237_v35, 0.0  ;;  %v295_v44 = vmul.f32 0.1, %v237_v35  ;;  %vm289_vm6 = vcmp.ge.f32.partialorder %v278_v40, 0.0  ;;  %v297_v46 = vmul.f32 0.1, %v278_v40 }
  0xe9   :  { %1157 = vmatprep.subr.bf16.mxu1 %v1216_v32  ;;  %v296_v15 = vmul.f32 0.1, %v276_v9  ;;  %v302_v18 = vsel %vm286_vm7, %v235_v8, %v294_v13  ;;  %v1024_v24 = vld [vmem:[%s1570_s4] ss:$0 sm:$0xff]  ;;  %s1004_s4 = sshll.u32 %s1268_s3, 4  ;;  %s1005_s4 = int_to_ptr.vmem [resolvable:$true] %s1004_s4 }
  0xea   :  { %v303_v48 = vsel %vm287_vm5, %v237_v35, %v295_v44  ;;  %v305_v51 = vsel %vm289_vm6, %v278_v40, %v297_v46  ;;  %v310_v20 = vpack.c.bf16 %v302_v18, %v302_v18  ;;  %s1243_s30 = scalar_lea.vmem %s1005_s4, 32  ;;  %p1248_p1 = scmp.lt.s32.totalorder %s1005_s4, %s1005_s4 }
  0xeb   :  { %1136 = vmatpush3.bf16.msra.mxu0 %v1217_v38  ;;  %v311_v50 = vpack.c.bf16 %v303_v48, %v303_v48  ;;  %v313_v55 = vpack.c.bf16 %v305_v51, %v305_v51  ;;  %v304_v19 = vsel %vm288_vm8, %v276_v9, %v296_v15  ;;  %p1244_p0 = scmp.ne.s32.totalorder %s1005_s4, %s1243_s30  ;;  %p1249_p2 = scmp.lt.s32.totalorder %s1243_s30, %s1243_s30 }
  0xec   :  { %1158 = vmatpush3.bf16.msra.mxu1 %v1218_v42  ;;  %1137 = vmatprep.subr.bf16.mxu0 %v1219_v43  ;;  %v312_v21 = vpack.c.bf16 %v304_v19, %v304_v19 }
  0xed   :  { %1159 = vmatprep.subr.bf16.mxu1 %v1220_v45  ;;  %945 = vmatprep.mubr.bf16.mxu0 %v311_v50  ;;  %p1250_p3 = por %p1249_p2, %p1248_p1 }
  0xee   :  { %985 = vmatprep.mubr.bf16.mxu1 %v313_v55 }
  0xef   :  { %1138 = vmatpush3.bf16.msra.mxu0 %v1221_v49  ;;  %p1251_p4 = pnand %p1250_p3, %p1244_p0 }
  0xf0   :  { %1160 = vmatpush3.bf16.msra.mxu1 %v1222_v52  ;;  %1139 = vmatprep.subr.bf16.mxu0 %v1223_v53 }
  0xf1   :  { %1161 = vmatprep.subr.bf16.mxu1 %v1224_v57 }
  0xf3   :  { %1140 = vmatpush3.bf16.msra.mxu0 %v1225_v58 }
  0xf4   :  { %1162 = vmatpush3.bf16.msra.mxu1 %v1226_v59  ;;  %1141 = vmatprep.subr.bf16.mxu0 %v1227_v60 }
  0xf5   :  { %1163 = vmatprep.subr.bf16.mxu1 %v1228_v61 }
  0xf7   :  { %1142 = vmatpush3.bf16.msra.mxu0 %v1229_v0 }
  0xf8   :  { %1164 = vmatpush3.bf16.msra.mxu1 %v1230_v1  ;;  %1143 = vmatprep.subr.bf16.mxu0 %v1231_v2 }
  0xf9   :  { %1165 = vmatprep.subr.bf16.mxu1 %v1232_v54 }
  0xfb   :  { %1144 = vmatpush3.bf16.msra.mxu0 %v1233_v5 }
  0xfc   :  { %1166 = vmatpush3.bf16.msra.mxu1 %v1234_v6  ;;  %1145 = vmatprep.subr.bf16.mxu0 %v1235_v7 }
  0xfd   :  { %1167 = vmatprep.subr.bf16.mxu1 %v1236_v56 }
  0xff   :  { %1146 = vmatpush3.bf16.msra.mxu0 %v1237_v10 }
 0x100   :  { %1168 = vmatpush3.bf16.msra.mxu1 %v1238_v11  ;;  %1147 = vmatprep.subr.bf16.mxu0 %v1239_v12 }
 0x101   :  { %1169 = vmatprep.subr.bf16.mxu1 %v1240_v14 }
 0x103   :  { %1148 = vmatpush3.bf16.msra.mxu0 %v1241_v16 }
 0x104   :  { %1170 = vmatpush3.bf16.msra.mxu1 %v1242_v17 }
 0x106   :  { %946 = vmatmul.mubr.bf16.vlgmr.msra.gmra.mrb[12].mxu0 %v310_v20 }
 0x107   :  { %986 = vmatmul.mubr.bf16.vlgmr.msra.gmra.mrb[12].mxu1 %v312_v21 }
 0x1b9   :  { %v1105_v22 = vpop.f32.mrb[8].mxu0 }
 0x1ba   :  { %v1127_v23 = vpop.f32.mrb[8].mxu1  ;;  %v1106_v25 = vpop.f32.mrb[9].mxu0 }
 0x1bb   :  { %v1107_v26 = vadd.f32 %v1106_v25, %v1105_v22  ;;  %v1128_v27 = vpop.f32.mrb[9].mxu1  ;;  %v1108_v28 = vpop.f32.mrb[10].mxu0 }
 0x1bc   :  { %v1129_v29 = vadd.f32 %v1128_v27, %v1127_v23  ;;  %v1130_v30 = vpop.f32.mrb[10].mxu1  ;;  %v1109_v31 = vpop.f32.mrb[11].mxu0 }
 0x1bd   :  { %v868_v32 = vadd.f32 %v1107_v26, %v1024_v24  ;;  %v1131_v33 = vpop.f32.mrb[11].mxu1 }
 0x1bf   :  { %v908_v34 = vadd.f32 %v1129_v29, %v868_v32 }
 0x1d9   :  { %v1149_v35 = vpop.f32.mrb[12].mxu0 }
 0x1da   :  { %v1171_v36 = vpop.f32.mrb[12].mxu1  ;;  %v1150_v37 = vpop.f32.mrb[13].mxu0 }
 0x1db   :  { %v1151_v38 = vadd.f32 %v1150_v37, %v1149_v35  ;;  %v1172_v39 = vpop.f32.mrb[13].mxu1  ;;  %v1152_v40 = vpop.f32.mrb[14].mxu0 }
 0x1dc   :  { %v1173_v41 = vadd.f32 %v1172_v39, %v1171_v36  ;;  %v1174_v42 = vpop.f32.mrb[14].mxu1  ;;  %v1153_v43 = vpop.f32.mrb[15].mxu0 }
 0x1dd   :  { %v948_v44 = vadd.f32 %v1151_v38, %v908_v34  ;;  %v1175_v45 = vpop.f32.mrb[15].mxu1 }
 0x1df   :  { %v988_v46 = vadd.f32 %v1173_v41, %v948_v44 }
 0x1e1   :  { %v994_v47 = vmul.f32 0.1, %v988_v46  ;;  %vm993_vm9 = vcmp.ge.f32.partialorder %v988_v46, 0.0 }
 0x1e3   :  { %v995_v48 = vsel %vm993_vm9, %v988_v46, %v994_v47 }
 0x1e4   :  { %997 = vst.msk [vmem:[#allocation2] sm:$0x3] %vm996_vm10, %v995_v48 }
 0x1e5   :  { %1254 = shalt.err (!%p1251_p4)
}
 0x1e6   :  { %s1255_s8 = scalar_lea.hbm %s1571_s5, 32 }
 0x1e7   :  { %p1256_p5 = scmp.ne.s32.totalorder %s1571_s5, %s1255_s8  ;;  %p1259_p6 = scmp.lt.u32.totalorder %s1255_s8, %s1571_s5 }
 0x1e9   :  { %p1261_p7 = pnand %p1259_p6, %p1256_p5 }
 0x1eb   :  { %1264 = shalt.err (!%p1261_p7)
}
 0x1ec   :  { %1007 = dma.vmem_to_hbm [thread:$0]  %s1005_s4, 32, %s1571_s5, [#allocation3]  }
 0x1ed   :  { %1265 = dma.done.wait [#allocation3], 32  }
 0x1ee   :  { %1266 = vsyncadd [#allocation3], 4294967264 }
 0x1ef   :  { %1011 = vsyncpa [#allocation3], 1 }

</bundles_post_ra>
